<compile_context>
chip_gen: v7x
topology: tpu7x:2x2x1
jax: 0.10.0
libtpu: 0.0.40
codegen_flags: <defaults>
</compile_context>

<pallas_src>
import functools

import jax
import jax.numpy as jnp
from jax import lax
from jax.experimental import pallas as pl
from jax.experimental.pallas import tpu as pltpu

_VMEM_LIMIT = 32 * 1024 * 1024


# ----------------------------------------------------------------------------
# In-kernel helpers (row-shifted banded conv)
# ----------------------------------------------------------------------------
def _row_shift(xp, d, rows, pos, h):
    """out[R] = x[R + d] if 0 <= (R % h) + d < h else 0.

    `xp` is x padded with 8 zero rows top & bottom (aligned sublane concat,
    and the +-1 slice never leaves the array); `pos` = R % h (row-in-frame).
    """
    s = xp[8 + d:8 + d + rows, :]
    if d == 0:
        return s
    valid = (pos < (h - d)) if d > 0 else (pos >= (-d))
    return jnp.where(valid, s, jnp.zeros_like(s))


def _conv3x3_rows(x, m_ref, bias, offsets, pos, h, piece):
    """3x3 conv on row-major activations via row shifts + banded matmul.

    x:     (rows, piece) f32, rows = frames * h, lanes = (rp, w, c).
    m_ref: (len(offsets) * piece, n_out) bf16 -- per-tap bands stacked on K.
    Returns (rows, n_out) f32 = conv(x) + bias.
    """
    rows = x.shape[0]
    zpad = jnp.zeros((8, x.shape[1]), x.dtype)
    xp = jnp.concatenate([zpad, x, zpad], axis=0)            # aligned (8-row) pad
    shifted = [_row_shift(xp, d, rows, pos, h) for d in offsets]

    if piece % 128 == 0 and len(shifted) > 1:
        # Fused taps: one deep MXU matmul (K = len(offsets) * piece).
        xs = jnp.concatenate(shifted, axis=-1).astype(jnp.bfloat16)
        acc = jnp.dot(xs, m_ref[...], preferred_element_type=jnp.float32)
    else:
        # Tap lane width not 128-aligned (stage-1 conv, Cin=1): accumulate
        # per-tap dots into a single f32 accumulator (MRB-friendly on v7x).
        m = m_ref[...]
        acc = jnp.zeros((rows, m.shape[1]), jnp.float32)
        for t, xd in enumerate(shifted):
            acc = acc + jnp.dot(xd.astype(jnp.bfloat16),
                                m[t * piece:(t + 1) * piece, :],
                                preferred_element_type=jnp.float32)
    return acc + bias


# ----------------------------------------------------------------------------
# Pallas kernels
# ----------------------------------------------------------------------------
def _fused_conv_i2h_kernel(x_ref, m1_ref, b1_ref, m2_ref, b2_ref, o_ref, *,
                           h, offs1, piece1, piece2):
    """Stage conv (stride folded into lanes) + LeakyReLU(0.2) + i2h conv."""
    x = x_ref[...].astype(jnp.float32)                       # (rows, piece1)
    rows = x.shape[0]
    pos = lax.broadcasted_iota(jnp.int32, (rows, 1), 0) % h

    y = _conv3x3_rows(x, m1_ref, b1_ref[...], offs1, pos, h, piece1)
    y = jnp.where(y > 0, y, 0.2 * y)                         # LeakyReLU(0.2)

    o = _conv3x3_rows(y, m2_ref, b2_ref[...], (-1, 0, 1), pos, h, piece2)
    o_ref[...] = o.astype(o_ref.dtype)                       # bf16, lane-dense


def _convgru_kernel(i2h_ref, mh_ref, bh_ref, seq_ref, h_ref, *, wc, h):
    """Fused ConvGRU step: h2h conv + gating; h stays VMEM-resident over S."""
    s = pl.program_id(1)

    @pl.when(s == 0)
    def _():
        h_ref[...] = jnp.zeros_like(h_ref)

    hid = h_ref[...]                                         # (rows, wc) f32
    rows = hid.shape[0]
    pos = lax.broadcasted_iota(jnp.int32, (rows, 1), 0) % h

    h2h = _conv3x3_rows(hid, mh_ref, bh_ref[...], (-1, 0, 1), pos, h, wc)
    i2h = i2h_ref[0].astype(jnp.float32)                     # (rows, 3*wc)

    # Gate-major layout: [0:wc]=update(z), [wc:2wc]=reset(r), [2wc:3wc]=cand(n)
    z = jax.nn.sigmoid(i2h[:, 0:wc] + h2h[:, 0:wc])
    r = jax.nn.sigmoid(i2h[:, wc:2 * wc] + h2h[:, wc:2 * wc])
    n = i2h[:, 2 * wc:3 * wc] + r * h2h[:, 2 * wc:3 * wc]
    n = jnp.where(n > 0, n, 0.2 * n)                         # LeakyReLU(0.2)
    h_new = z * hid + (1.0 - z) * n                          # HKO-style update

    h_ref[...] = h_new
    seq_ref[0] = h_new.astype(seq_ref.dtype)


# ----------------------------------------------------------------------------
# Banded matrix construction (wrapper-side, tiny)
# ----------------------------------------------------------------------------
def _make_band_cat(w, w_in, w_out, stride, gates=1):
    """w: (KH,KW,Cin,Cout) -> tap-stacked band matrix for the folded-row layout.

    Rows: (tap d, rp, w_in, cin) with H folded by `stride` into lanes (rp =
    sub-row).  Cols: (gate, w_out, cg), gate-major so each gate is an aligned
    128-lane block.  Returns (bf16 matrix, row-tap offsets).
    """
    kh_dim, kw_dim, cin, cout = w.shape
    cg = cout // gates
    offsets = (-1, 0, 1) if stride == 1 else (-1, 0)
    wi = jnp.arange(w_in)
    wo = jnp.arange(w_out)
    kw = wi[:, None] - stride * wo[None, :] + 1              # (w_in, w_out)
    kw_valid = ((kw >= 0) & (kw < kw_dim)).astype(w.dtype)
    kw_c = jnp.clip(kw, 0, kw_dim - 1)

    blocks = []
    for d in offsets:
        m = jnp.zeros((stride, w_in, cin, gates, w_out, cg), w.dtype)
        for rp in range(stride):
            kh = stride * d + rp + 1
            if 0 <= kh < kh_dim:
                taps = w[kh][kw_c] * kw_valid[:, :, None, None]  # (wi,wo,ci,co)
                taps = taps.reshape(w_in, w_out, cin, gates, cg)
                taps = jnp.transpose(taps, (0, 2, 3, 1, 4))      # (wi,ci,g,wo,cg)
                m = m.at[rp].set(taps)
        blocks.append(m.reshape(stride * w_in * cin, gates * w_out * cg))
    return jnp.concatenate(blocks, axis=0).astype(jnp.bfloat16), offsets


def _make_bias_row(b, w_out, gates=1):
    """Bias (gates*Cg,) -> (1, gates*W_out*Cg) row in gate-major column layout."""
    cout = b.shape[0]
    cg = cout // gates
    row = jnp.broadcast_to(b.reshape(gates, 1, cg), (gates, w_out, cg))
    return row.reshape(1, gates * w_out * cg).astype(jnp.float32)


# ----------------------------------------------------------------------------
# Tiling heuristics
# ----------------------------------------------------------------------------
def _cores_per_chip():
    # v7x has 2 TensorCores per chip; single-TC chips keep the full batch per
    # GRU block (bigger MXU M-dim).
    try:
        kind = jax.devices()[0].device_kind.lower()
    except Exception:
        return 1
    return 2 if "v7" in kind else 1


def _pick_chunk(n_frames, rows_per_frame, in_width, out_width,
                *, min_steps=4, budget_bytes=8 << 20):
    """Largest frame chunk whose double-buffered blocks fit the VMEM budget
    while keeping >= min_steps grid steps (pipelining / megacore split) and
    8-row-aligned blocks."""
    target = min(min_steps, n_frames)
    best = 1
    for c in range(1, n_frames + 1):
        if n_frames % c:
            continue
        rows = c * rows_per_frame
        if rows % 8 and c != n_frames:
            continue
        blk = 2 * rows * in_width * 4 + 2 * rows * out_width * 2
        if n_frames // c >= target and blk <= budget_bytes:
            best = c
    return best


# ----------------------------------------------------------------------------
# pallas_call wrappers
# ----------------------------------------------------------------------------
def _fused_conv_i2h(x_flat, m1, b1, m2, b2, *, chunk, n_frames, h_out, offs1,
                    piece1, piece2):
    rows_blk = chunk * h_out
    n_in = x_flat.shape[1]
    n_out = m2.shape[1]
    kern = functools.partial(_fused_conv_i2h_kernel, h=h_out, offs1=offs1,
                             piece1=piece1, piece2=piece2)
    return pl.pallas_call(
        kern,
        out_shape=jax.ShapeDtypeStruct((n_frames * h_out, n_out), jnp.bfloat16),
        grid=(n_frames // chunk,),
        in_specs=[
            pl.BlockSpec((rows_blk, n_in), lambda i: (i, 0)),
            pl.BlockSpec(m1.shape, lambda i: (0, 0)),
            pl.BlockSpec(b1.shape, lambda i: (0, 0)),
            pl.BlockSpec(m2.shape, lambda i: (0, 0)),
            pl.BlockSpec(b2.shape, lambda i: (0, 0)),
        ],
        out_specs=pl.BlockSpec((rows_blk, n_out), lambda i: (i, 0)),
        compiler_params=pltpu.CompilerParams(
            dimension_semantics=("parallel",),
            vmem_limit_bytes=_VMEM_LIMIT),
    )(x_flat, m1, b1, m2, b2)


def _convgru(i2h_seq, mh, bh, *, wc, h_out, b_split):
    s_len, rows, n3 = i2h_seq.shape
    rows_b = rows // b_split
    kern = functools.partial(_convgru_kernel, wc=wc, h=h_out)
    seq, h_final = pl.pallas_call(
        kern,
        out_shape=(jax.ShapeDtypeStruct((s_len, rows, wc), jnp.bfloat16),
                   jax.ShapeDtypeStruct((rows, wc), jnp.float32)),
        grid=(b_split, s_len),
        in_specs=[
            pl.BlockSpec((1, rows_b, n3), lambda b, s: (s, b, 0)),
            pl.BlockSpec(mh.shape, lambda b, s: (0, 0)),
            pl.BlockSpec(bh.shape, lambda b, s: (0, 0)),
        ],
        out_specs=(pl.BlockSpec((1, rows_b, wc), lambda b, s: (s, b, 0)),
                   pl.BlockSpec((rows_b, wc), lambda b, s: (b, 0))),
        compiler_params=pltpu.CompilerParams(
            dimension_semantics=("parallel", "arbitrary"),
            vmem_limit_bytes=_VMEM_LIMIT),
    )(i2h_seq, mh, bh)
    return seq, h_final


# ----------------------------------------------------------------------------
# Encoder forward
# ----------------------------------------------------------------------------
def encoder_forward(x_bschw, stage_params, rnn_params):
    """Matches Encoder.forward: x (B,S,C,H,W) -> tuple of hidden states (NCHW)."""
    B, S, C, H, W = x_bschw.shape
    # (B,S,C,H,W) -> (S,B,H,W,C): channel-minor; rows = (s,b,h), cols = (w,c).
    x = jnp.transpose(x_bschw, (1, 0, 3, 4, 2))
    cur = x.reshape(S, B, H, W * C)
    h_in, w_in, c_in = H, W, C
    n_frames = S * B
    cores = _cores_per_chip()

    hidden_states = []
    for sp, rp in zip(stage_params, rnn_params):
        stride = sp["stride"]
        # PyTorch Conv2d weight (Cout,Cin,KH,KW) -> (KH,KW,Cin,Cout).
        w_conv = jnp.transpose(sp["w"], (2, 3, 1, 0))
        w_i2h = jnp.transpose(rp["w_i2h"], (2, 3, 1, 0))
        w_h2h = jnp.transpose(rp["w_h2h"], (2, 3, 1, 0))
        ch = w_h2h.shape[3] // 3
        h_out = (h_in - 1) // stride + 1
        w_out = (w_in - 1) // stride + 1
        assert h_in % stride == 0 and h_out == h_in // stride

        piece1 = stride * w_in * c_in        # K per row tap, stage conv
        wc = w_out * ch                      # one gate's lane width (i2h/h2h tap)

        # Fold H by `stride` into lanes (space-to-depth along H): strided row
        # gather becomes ordinary row taps at offsets (-1, 0).
        # NOTE: stage-1 stays at 16 lanes/tap (Cin=1); its conv is tiny and
        # runs as 3 accumulating dots inside the fused kernel.
        x_flat = cur.reshape(S, B, h_out, piece1).reshape(n_frames * h_out, piece1)

        m1, offs1 = _make_band_cat(w_conv, w_in, w_out, stride, gates=1)
        b1 = _make_bias_row(sp["b"], w_out, gates=1)
        m2, _ = _make_band_cat(w_i2h, w_out, w_out, 1, gates=3)
        b2 = _make_bias_row(rp["b_i2h"], w_out, gates=3)

        chunk = _pick_chunk(n_frames, h_out, piece1, 3 * wc)
        i2h_flat = _fused_conv_i2h(x_flat, m1, b1, m2, b2, chunk=chunk,
                                   n_frames=n_frames, h_out=h_out, offs1=offs1,
                                   piece1=piece1, piece2=wc)
        i2h_seq = i2h_flat.reshape(S, B * h_out, 3 * wc)

        mh, _ = _make_band_cat(w_h2h, w_out, w_out, 1, gates=3)
        bh = _make_bias_row(rp["b_h2h"], w_out, gates=3)
        b_split = 2 if (cores >= 2 and B % 2 == 0
                        and ((B // 2) * h_out) % 8 == 0) else 1
        seq, h_fin = _convgru(i2h_seq, mh, bh, wc=wc, h_out=h_out,
                              b_split=b_split)

        hidden_states.append(
            jnp.transpose(h_fin.reshape(B, h_out, w_out, ch), (0, 3, 1, 2)))
        cur = seq.reshape(S, B, h_out, wc)   # next-stage input (bf16)
        h_in, w_in, c_in = h_out, w_out, ch
    return tuple(hidden_states)


# ----------------------------------------------------------------------------
# Deterministic parameter construction (PyTorch layouts)
# ----------------------------------------------------------------------------
def _make_params():
    key = jax.random.PRNGKey(0)
    ks = jax.random.split(key, 10)

    def w(k, shape, scale=0.1):
        return (scale * jax.random.normal(k, shape)).astype(jnp.float32)

    # Conv2d weight (Cout, Cin, KH, KW), bias (Cout,)
    stage_params = [
        dict(w=w(ks[0], (8, 1, 3, 3)), b=w(ks[1], (8,)), stride=1),
        dict(w=w(ks[2], (16, 8, 3, 3)), b=w(ks[3], (16,)), stride=2),
    ]
    rnn_params = [
        dict(w_i2h=w(ks[4], (24, 8, 3, 3)), b_i2h=w(ks[5], (24,), 0.05),
             w_h2h=w(ks[6], (24, 8, 3, 3)), b_h2h=jnp.zeros((24,), jnp.float32)),
        dict(w_i2h=w(ks[7], (48, 16, 3, 3)), b_i2h=w(ks[8], (48,), 0.05),
             w_h2h=w(ks[9], (48, 16, 3, 3)), b_h2h=jnp.zeros((48,), jnp.float32)),
    ]
    return stage_params, rnn_params


if __name__ == "__main__":
    B, S, C, H, W = 2, 8, 1, 16, 16
    x = jax.random.normal(jax.random.PRNGKey(0), (B, S, C, H, W), jnp.float32)

    stage_params, rnn_params = _make_params()
    fwd = jax.jit(lambda inp: encoder_forward(inp, stage_params, rnn_params))
    h1, h2 = fwd(x)
    jax.block_until_ready((h1, h2))

    assert h1.shape == (B, 8, 16, 16), h1.shape
    assert h2.shape == (B, 16, 8, 8), h2.shape
    assert bool(jnp.all(jnp.isfinite(h1))) and bool(jnp.all(jnp.isfinite(h2)))
    print("KERNEL_OK")
</pallas_src>

<mosaic_0001>
module attributes {stable_mosaic.version = 11 : i64} {
  func.func @_fused_conv_i2h_kernel(%arg0: i32, %arg1: memref<64x16xf32, #tpu.memory_space<vmem>>, %arg2: memref<48x128xbf16, #tpu.memory_space<vmem>>, %arg3: memref<1x128xf32, #tpu.memory_space<vmem>>, %arg4: memref<384x384xbf16, #tpu.memory_space<vmem>>, %arg5: memref<1x384xf32, #tpu.memory_space<vmem>>, %arg6: memref<64x384xbf16, #tpu.memory_space<vmem>>) attributes {dimension_semantics = [#tpu.dimension_semantics<parallel>], iteration_bounds = array<i64: 4>, scalar_prefetch = 0 : i64, scratch_operands = 0 : i64, tpu.core_type = #tpu.core_type<tc>, window_params = [{transform_indices = @transform_0, window_bounds = array<i64: 64, 16>}, {pipeline_mode = #tpu.pipeline_mode<synchronous>, transform_indices = @transform_1, window_bounds = array<i64: 48, 128>}, {pipeline_mode = #tpu.pipeline_mode<synchronous>, transform_indices = @transform_2, window_bounds = array<i64: 1, 128>}, {pipeline_mode = #tpu.pipeline_mode<synchronous>, transform_indices = @transform_3, window_bounds = array<i64: 384, 384>}, {pipeline_mode = #tpu.pipeline_mode<synchronous>, transform_indices = @transform_4, window_bounds = array<i64: 1, 384>}, {transform_indices = @transform_5, window_bounds = array<i64: 64, 384>}]} {
    %c0 = arith.constant 0 : index
    %c0_0 = arith.constant 0 : index
    %0 = vector.load %arg1[%c0, %c0_0] : memref<64x16xf32, #tpu.memory_space<vmem>>, vector<64x16xf32>
    %1 = tpu.iota {dimensions = array<i32: 0>} : vector<64x1xi32>
    %c16_i32 = arith.constant 16 : i32
    %c0_i32 = arith.constant 0 : i32
    %2 = arith.cmpi eq, %c16_i32, %c0_i32 : i32
    %c1_i32 = arith.constant 1 : i32
    %3 = arith.select %2, %c1_i32, %c16_i32 : i32
    %4 = vector.broadcast %3 : i32 to vector<64x1xi32>
    %5 = arith.remsi %1, %4 : vector<64x1xi32>
    %c0_i32_1 = arith.constant 0 : i32
    %6 = vector.broadcast %c0_i32_1 : i32 to vector<64x1xi32>
    %7 = arith.cmpi ne, %5, %6 : vector<64x1xi32>
    %c0_i32_2 = arith.constant 0 : i32
    %8 = vector.broadcast %c0_i32_2 : i32 to vector<64x1xi32>
    %9 = arith.cmpi slt, %5, %8 : vector<64x1xi32>
    %c0_i32_3 = arith.constant 0 : i32
    %10 = arith.cmpi slt, %3, %c0_i32_3 : i32
    %11 = vector.broadcast %10 : i1 to vector<64x1xi1>
    %12 = vector.broadcast %11 : vector<64x1xi1> to vector<64x1xi1>
    %13 = arith.xori %9, %12 : vector<64x1xi1>
    %14 = arith.andi %13, %7 : vector<64x1xi1>
    %15 = vector.broadcast %3 : i32 to vector<64x1xi32>
    %16 = arith.addi %5, %15 : vector<64x1xi32>
    %17 = arith.select %14, %16, %5 : vector<64x1xi1>, vector<64x1xi32>
    %c0_4 = arith.constant 0 : index
    %c0_5 = arith.constant 0 : index
    %18 = vector.load %arg3[%c0_4, %c0_5] : memref<1x128xf32, #tpu.memory_space<vmem>>, vector<1x128xf32>
    %cst = arith.constant 0.000000e+00 : f32
    %19 = vector.broadcast %cst : f32 to vector<8x16xf32>
    %20 = tpu.concatenate %19, %0, %19 in 0 : vector<8x16xf32>, vector<64x16xf32>, vector<8x16xf32> -> vector<80x16xf32>
    %21 = vector.extract_strided_slice %20 {offsets = [7, 0], sizes = [64, 16], strides = [1, 1]} : vector<80x16xf32> to vector<64x16xf32>
    %c1_i32_6 = arith.constant 1 : i32
    %22 = vector.broadcast %c1_i32_6 : i32 to vector<64x1xi32>
    %23 = arith.cmpi sge, %17, %22 : vector<64x1xi32>
    %cst_7 = arith.constant 0.000000e+00 : f32
    %24 = vector.broadcast %cst_7 : f32 to vector<64x16xf32>
    %25 = vector.shape_cast %23 : vector<64x1xi1> to vector<64x1xi1>
    %26 = vector.broadcast %25 : vector<64x1xi1> to vector<64x16xi1>
    %27 = arith.select %26, %21, %24 : vector<64x16xi1>, vector<64x16xf32>
    %28 = vector.extract_strided_slice %20 {offsets = [8, 0], sizes = [64, 16], strides = [1, 1]} : vector<80x16xf32> to vector<64x16xf32>
    %29 = vector.extract_strided_slice %20 {offsets = [9, 0], sizes = [64, 16], strides = [1, 1]} : vector<80x16xf32> to vector<64x16xf32>
    %c15_i32 = arith.constant 15 : i32
    %30 = vector.broadcast %c15_i32 : i32 to vector<64x1xi32>
    %31 = arith.cmpi slt, %17, %30 : vector<64x1xi32>
    %cst_8 = arith.constant 0.000000e+00 : f32
    %32 = vector.broadcast %cst_8 : f32 to vector<64x16xf32>
    %33 = vector.shape_cast %31 : vector<64x1xi1> to vector<64x1xi1>
    %34 = vector.broadcast %33 : vector<64x1xi1> to vector<64x16xi1>
    %35 = arith.select %34, %29, %32 : vector<64x16xi1>, vector<64x16xf32>
    %c0_9 = arith.constant 0 : index
    %c0_10 = arith.constant 0 : index
    %36 = vector.load %arg2[%c0_9, %c0_10] : memref<48x128xbf16, #tpu.memory_space<vmem>>, vector<48x128xbf16>
    %cst_11 = arith.constant 0.000000e+00 : f32
    %37 = vector.broadcast %cst_11 : f32 to vector<64x128xf32>
    %38 = arith.truncf %27 : vector<64x16xf32> to vector<64x16xbf16>
    %39 = vector.extract_strided_slice %36 {offsets = [0, 0], sizes = [16, 128], strides = [1, 1]} : vector<48x128xbf16> to vector<16x128xbf16>
    %cst_12 = arith.constant dense<0.000000e+00> : vector<64x128xf32>
    %40 = tpu.matmul %38, %39, %cst_12 {dimension_numbers = #tpu.dot_dimension_numbers<[1], [0], [0], [1], [0, 0, 1, 1], [], []>} : vector<64x16xbf16>, vector<16x128xbf16>, vector<64x128xf32> -> vector<64x128xf32>
    %41 = arith.addf %37, %40 : vector<64x128xf32>
    %42 = arith.truncf %28 : vector<64x16xf32> to vector<64x16xbf16>
    %43 = vector.extract_strided_slice %36 {offsets = [16, 0], sizes = [16, 128], strides = [1, 1]} : vector<48x128xbf16> to vector<16x128xbf16>
    %cst_13 = arith.constant dense<0.000000e+00> : vector<64x128xf32>
    %44 = tpu.matmul %42, %43, %cst_13 {dimension_numbers = #tpu.dot_dimension_numbers<[1], [0], [0], [1], [0, 0, 1, 1], [], []>} : vector<64x16xbf16>, vector<16x128xbf16>, vector<64x128xf32> -> vector<64x128xf32>
    %45 = arith.addf %41, %44 : vector<64x128xf32>
    %46 = arith.truncf %35 : vector<64x16xf32> to vector<64x16xbf16>
    %47 = vector.extract_strided_slice %36 {offsets = [32, 0], sizes = [16, 128], strides = [1, 1]} : vector<48x128xbf16> to vector<16x128xbf16>
    %cst_14 = arith.constant dense<0.000000e+00> : vector<64x128xf32>
    %48 = tpu.matmul %46, %47, %cst_14 {dimension_numbers = #tpu.dot_dimension_numbers<[1], [0], [0], [1], [0, 0, 1, 1], [], []>} : vector<64x16xbf16>, vector<16x128xbf16>, vector<64x128xf32> -> vector<64x128xf32>
    %49 = arith.addf %45, %48 : vector<64x128xf32>
    %50 = vector.broadcast %18 : vector<1x128xf32> to vector<64x128xf32>
    %51 = arith.addf %49, %50 : vector<64x128xf32>
    %cst_15 = arith.constant 0.000000e+00 : f32
    %52 = vector.broadcast %cst_15 : f32 to vector<64x128xf32>
    %53 = arith.cmpf ogt, %51, %52 : vector<64x128xf32>
    %cst_16 = arith.constant 2.000000e-01 : f32
    %54 = vector.broadcast %cst_16 : f32 to vector<64x128xf32>
    %55 = arith.mulf %54, %51 : vector<64x128xf32>
    %56 = arith.select %53, %51, %55 : vector<64x128xi1>, vector<64x128xf32>
    %c0_17 = arith.constant 0 : index
    %c0_18 = arith.constant 0 : index
    %57 = vector.load %arg5[%c0_17, %c0_18] : memref<1x384xf32, #tpu.memory_space<vmem>>, vector<1x384xf32>
    %cst_19 = arith.constant 0.000000e+00 : f32
    %58 = vector.broadcast %cst_19 : f32 to vector<8x128xf32>
    %59 = tpu.concatenate %58, %56, %58 in 0 : vector<8x128xf32>, vector<64x128xf32>, vector<8x128xf32> -> vector<80x128xf32>
    %60 = vector.extract_strided_slice %59 {offsets = [7, 0], sizes = [64, 128], strides = [1, 1]} : vector<80x128xf32> to vector<64x128xf32>
    %c1_i32_20 = arith.constant 1 : i32
    %61 = vector.broadcast %c1_i32_20 : i32 to vector<64x1xi32>
    %62 = arith.cmpi sge, %17, %61 : vector<64x1xi32>
    %cst_21 = arith.constant 0.000000e+00 : f32
    %63 = vector.broadcast %cst_21 : f32 to vector<64x128xf32>
    %64 = vector.shape_cast %62 : vector<64x1xi1> to vector<64x1xi1>
    %65 = vector.broadcast %64 : vector<64x1xi1> to vector<64x128xi1>
    %66 = arith.select %65, %60, %63 : vector<64x128xi1>, vector<64x128xf32>
    %67 = vector.extract_strided_slice %59 {offsets = [8, 0], sizes = [64, 128], strides = [1, 1]} : vector<80x128xf32> to vector<64x128xf32>
    %68 = vector.extract_strided_slice %59 {offsets = [9, 0], sizes = [64, 128], strides = [1, 1]} : vector<80x128xf32> to vector<64x128xf32>
    %c15_i32_22 = arith.constant 15 : i32
    %69 = vector.broadcast %c15_i32_22 : i32 to vector<64x1xi32>
    %70 = arith.cmpi slt, %17, %69 : vector<64x1xi32>
    %cst_23 = arith.constant 0.000000e+00 : f32
    %71 = vector.broadcast %cst_23 : f32 to vector<64x128xf32>
    %72 = vector.shape_cast %70 : vector<64x1xi1> to vector<64x1xi1>
    %73 = vector.broadcast %72 : vector<64x1xi1> to vector<64x128xi1>
    %74 = arith.select %73, %68, %71 : vector<64x128xi1>, vector<64x128xf32>
    %75 = tpu.concatenate %66, %67, %74 in 1 : vector<64x128xf32>, vector<64x128xf32>, vector<64x128xf32> -> vector<64x384xf32>
    %76 = arith.truncf %75 : vector<64x384xf32> to vector<64x384xbf16>
    %c0_24 = arith.constant 0 : index
    %c0_25 = arith.constant 0 : index
    %77 = vector.load %arg4[%c0_24, %c0_25] : memref<384x384xbf16, #tpu.memory_space<vmem>>, vector<384x384xbf16>
    %cst_26 = arith.constant dense<0.000000e+00> : vector<64x384xf32>
    %78 = tpu.matmul %76, %77, %cst_26 {dimension_numbers = #tpu.dot_dimension_numbers<[1], [0], [0], [1], [0, 0, 1, 1], [], []>} : vector<64x384xbf16>, vector<384x384xbf16>, vector<64x384xf32> -> vector<64x384xf32>
    %79 = vector.broadcast %57 : vector<1x384xf32> to vector<64x384xf32>
    %80 = arith.addf %78, %79 : vector<64x384xf32>
    %81 = arith.truncf %80 : vector<64x384xf32> to vector<64x384xbf16>
    %c0_27 = arith.constant 0 : index
    %c0_28 = arith.constant 0 : index
    %82 = vector.load %arg6[%c0_27, %c0_28] : memref<64x384xbf16, #tpu.memory_space<vmem>>, vector<64x384xbf16>
    tpu.vector_store %arg6[%c0_27, %c0_28], %81 {strides = array<i32>} : memref<64x384xbf16, #tpu.memory_space<vmem>>, vector<64x384xbf16>,
    return
  }
  func.func @transform_0(%arg0: i32) -> (i32, i32) {
    %c0_i32 = arith.constant 0 : i32
    %c0_i32_0 = arith.constant 0 : i32
    return %arg0, %c0_i32 : i32, i32
  }
  func.func @transform_1(%arg0: i32) -> (i32, i32) {
    %c0_i32 = arith.constant 0 : i32
    %c0_i32_0 = arith.constant 0 : i32
    %c0_i32_1 = arith.constant 0 : i32
    return %c0_i32, %c0_i32_0 : i32, i32
  }
  func.func @transform_2(%arg0: i32) -> (i32, i32) {
    %c0_i32 = arith.constant 0 : i32
    %c0_i32_0 = arith.constant 0 : i32
    %c0_i32_1 = arith.constant 0 : i32
    return %c0_i32, %c0_i32_0 : i32, i32
  }
  func.func @transform_3(%arg0: i32) -> (i32, i32) {
    %c0_i32 = arith.constant 0 : i32
    %c0_i32_0 = arith.constant 0 : i32
    %c0_i32_1 = arith.constant 0 : i32
    return %c0_i32, %c0_i32_0 : i32, i32
  }
  func.func @transform_4(%arg0: i32) -> (i32, i32) {
    %c0_i32 = arith.constant 0 : i32
    %c0_i32_0 = arith.constant 0 : i32
    %c0_i32_1 = arith.constant 0 : i32
    return %c0_i32, %c0_i32_0 : i32, i32
  }
  func.func @transform_5(%arg0: i32) -> (i32, i32) {
    %c0_i32 = arith.constant 0 : i32
    %c0_i32_0 = arith.constant 0 : i32
    return %arg0, %c0_i32 : i32, i32
  }
}

module attributes {stable_mosaic.version = 11 : i64} {
  func.func @_convgru_kernel(%arg0: i32, %arg1: i32, %arg2: memref<1x32x384xbf16, #tpu.memory_space<vmem>>, %arg3: memref<384x384xbf16, #tpu.memory_space<vmem>>, %arg4: memref<1x384xf32, #tpu.memory_space<vmem>>, %arg5: memref<1x32x128xbf16, #tpu.memory_space<vmem>>, %arg6: memref<32x128xf32, #tpu.memory_space<vmem>>) attributes {dimension_semantics = [#tpu.dimension_semantics<parallel>, #tpu.dimension_semantics<arbitrary>], iteration_bounds = array<i64: 1, 8>, scalar_prefetch = 0 : i64, scratch_operands = 0 : i64, tpu.core_type = #tpu.core_type<tc>, window_params = [{transform_indices = @transform_0, window_bounds = array<i64: 1, 32, 384>}, {pipeline_mode = #tpu.pipeline_mode<synchronous>, transform_indices = @transform_1, window_bounds = array<i64: 384, 384>}, {pipeline_mode = #tpu.pipeline_mode<synchronous>, transform_indices = @transform_2, window_bounds = array<i64: 1, 384>}, {transform_indices = @transform_3, window_bounds = array<i64: 1, 32, 128>}, {transform_indices = @transform_4, window_bounds = array<i64: 32, 128>}]} {
    %c0_i32 = arith.constant 0 : i32
    %0 = arith.cmpi eq, %arg1, %c0_i32 : i32
    %1 = arith.extui %0 : i1 to i32
    %c0_i32_0 = arith.constant 0 : i32
    %2 = arith.cmpi ne, %1, %c0_i32_0 : i32
    scf.if %2 {
      %cst_27 = arith.constant 0.000000e+00 : f32
      %83 = vector.broadcast %cst_27 : f32 to vector<32x128xf32>
      %c0_28 = arith.constant 0 : index
      %c0_29 = arith.constant 0 : index
      %84 = vector.load %arg6[%c0_28, %c0_29] : memref<32x128xf32, #tpu.memory_space<vmem>>, vector<32x128xf32>
      tpu.vector_store %arg6[%c0_28, %c0_29], %83 {strides = array<i32>} : memref<32x128xf32, #tpu.memory_space<vmem>>, vector<32x128xf32>,
    } else {
    }
    %c0 = arith.constant 0 : index
    %c0_1 = arith.constant 0 : index
    %3 = vector.load %arg6[%c0, %c0_1] : memref<32x128xf32, #tpu.memory_space<vmem>>, vector<32x128xf32>
    %4 = tpu.iota {dimensions = array<i32: 0>} : vector<32x1xi32>
    %c16_i32 = arith.constant 16 : i32
    %c0_i32_2 = arith.constant 0 : i32
    %5 = arith.cmpi eq, %c16_i32, %c0_i32_2 : i32
    %c1_i32 = arith.constant 1 : i32
    %6 = arith.select %5, %c1_i32, %c16_i32 : i32
    %7 = vector.broadcast %6 : i32 to vector<32x1xi32>
    %8 = arith.remsi %4, %7 : vector<32x1xi32>
    %c0_i32_3 = arith.constant 0 : i32
    %9 = vector.broadcast %c0_i32_3 : i32 to vector<32x1xi32>
    %10 = arith.cmpi ne, %8, %9 : vector<32x1xi32>
    %c0_i32_4 = arith.constant 0 : i32
    %11 = vector.broadcast %c0_i32_4 : i32 to vector<32x1xi32>
    %12 = arith.cmpi slt, %8, %11 : vector<32x1xi32>
    %c0_i32_5 = arith.constant 0 : i32
    %13 = arith.cmpi slt, %6, %c0_i32_5 : i32
    %14 = vector.broadcast %13 : i1 to vector<32x1xi1>
    %15 = vector.broadcast %14 : vector<32x1xi1> to vector<32x1xi1>
    %16 = arith.xori %12, %15 : vector<32x1xi1>
    %17 = arith.andi %16, %10 : vector<32x1xi1>
    %18 = vector.broadcast %6 : i32 to vector<32x1xi32>
    %19 = arith.addi %8, %18 : vector<32x1xi32>
    %20 = arith.select %17, %19, %8 : vector<32x1xi1>, vector<32x1xi32>
    %c0_6 = arith.constant 0 : index
    %c0_7 = arith.constant 0 : index
    %21 = vector.load %arg4[%c0_6, %c0_7] : memref<1x384xf32, #tpu.memory_space<vmem>>, vector<1x384xf32>
    %cst = arith.constant 0.000000e+00 : f32
    %22 = vector.broadcast %cst : f32 to vector<8x128xf32>
    %23 = tpu.concatenate %22, %3, %22 in 0 : vector<8x128xf32>, vector<32x128xf32>, vector<8x128xf32> -> vector<48x128xf32>
    %24 = vector.extract_strided_slice %23 {offsets = [7, 0], sizes = [32, 128], strides = [1, 1]} : vector<48x128xf32> to vector<32x128xf32>
    %c1_i32_8 = arith.constant 1 : i32
    %25 = vector.broadcast %c1_i32_8 : i32 to vector<32x1xi32>
    %26 = arith.cmpi sge, %20, %25 : vector<32x1xi32>
    %cst_9 = arith.constant 0.000000e+00 : f32
    %27 = vector.broadcast %cst_9 : f32 to vector<32x128xf32>
    %28 = vector.shape_cast %26 : vector<32x1xi1> to vector<32x1xi1>
    %29 = vector.broadcast %28 : vector<32x1xi1> to vector<32x128xi1>
    %30 = arith.select %29, %24, %27 : vector<32x128xi1>, vector<32x128xf32>
    %31 = vector.extract_strided_slice %23 {offsets = [8, 0], sizes = [32, 128], strides = [1, 1]} : vector<48x128xf32> to vector<32x128xf32>
    %32 = vector.extract_strided_slice %23 {offsets = [9, 0], sizes = [32, 128], strides = [1, 1]} : vector<48x128xf32> to vector<32x128xf32>
    %c15_i32 = arith.constant 15 : i32
    %33 = vector.broadcast %c15_i32 : i32 to vector<32x1xi32>
    %34 = arith.cmpi slt, %20, %33 : vector<32x1xi32>
    %cst_10 = arith.constant 0.000000e+00 : f32
    %35 = vector.broadcast %cst_10 : f32 to vector<32x128xf32>
    %36 = vector.shape_cast %34 : vector<32x1xi1> to vector<32x1xi1>
    %37 = vector.broadcast %36 : vector<32x1xi1> to vector<32x128xi1>
    %38 = arith.select %37, %32, %35 : vector<32x128xi1>, vector<32x128xf32>
    %39 = tpu.concatenate %30, %31, %38 in 1 : vector<32x128xf32>, vector<32x128xf32>, vector<32x128xf32> -> vector<32x384xf32>
    %40 = arith.truncf %39 : vector<32x384xf32> to vector<32x384xbf16>
    %c0_11 = arith.constant 0 : index
    %c0_12 = arith.constant 0 : index
    %41 = vector.load %arg3[%c0_11, %c0_12] : memref<384x384xbf16, #tpu.memory_space<vmem>>, vector<384x384xbf16>
    %cst_13 = arith.constant dense<0.000000e+00> : vector<32x384xf32>
    %42 = tpu.matmul %40, %41, %cst_13 {dimension_numbers = #tpu.dot_dimension_numbers<[1], [0], [0], [1], [0, 0, 1, 1], [], []>} : vector<32x384xbf16>, vector<384x384xbf16>, vector<32x384xf32> -> vector<32x384xf32>
    %43 = vector.broadcast %21 : vector<1x384xf32> to vector<32x384xf32>
    %44 = arith.addf %42, %43 : vector<32x384xf32>
    %c0_14 = arith.constant 0 : index
    %c0_15 = arith.constant 0 : index
    %c0_16 = arith.constant 0 : index
    %45 = vector.load %arg2[%c0_14, %c0_15, %c0_16] : memref<1x32x384xbf16, #tpu.memory_space<vmem>>, vector<1x32x384xbf16>
    %46 = vector.shape_cast %45 : vector<1x32x384xbf16> to vector<32x384xbf16>
    %47 = arith.extf %46 : vector<32x384xbf16> to vector<32x384xf32>
    %48 = vector.extract_strided_slice %47 {offsets = [0, 0], sizes = [32, 128], strides = [1, 1]} : vector<32x384xf32> to vector<32x128xf32>
    %49 = vector.extract_strided_slice %44 {offsets = [0, 0], sizes = [32, 128], strides = [1, 1]} : vector<32x384xf32> to vector<32x128xf32>
    %50 = arith.addf %48, %49 : vector<32x128xf32>
    %51 = arith.negf %50 : vector<32x128xf32>
    %52 = math.exp %51 : vector<32x128xf32>
    %cst_17 = arith.constant 1.000000e+00 : f32
    %53 = vector.broadcast %cst_17 : f32 to vector<32x128xf32>
    %54 = arith.addf %53, %52 : vector<32x128xf32>
    %55 = arith.divf %53, %54 : vector<32x128xf32>
    %56 = vector.extract_strided_slice %47 {offsets = [0, 128], sizes = [32, 128], strides = [1, 1]} : vector<32x384xf32> to vector<32x128xf32>
    %57 = vector.extract_strided_slice %44 {offsets = [0, 128], sizes = [32, 128], strides = [1, 1]} : vector<32x384xf32> to vector<32x128xf32>
    %58 = arith.addf %56, %57 : vector<32x128xf32>
    %59 = arith.negf %58 : vector<32x128xf32>
    %60 = math.exp %59 : vector<32x128xf32>
    %cst_18 = arith.constant 1.000000e+00 : f32
    %61 = vector.broadcast %cst_18 : f32 to vector<32x128xf32>
    %62 = arith.addf %61, %60 : vector<32x128xf32>
    %63 = arith.divf %61, %62 : vector<32x128xf32>
    %64 = vector.extract_strided_slice %47 {offsets = [0, 256], sizes = [32, 128], strides = [1, 1]} : vector<32x384xf32> to vector<32x128xf32>
    %65 = vector.extract_strided_slice %44 {offsets = [0, 256], sizes = [32, 128], strides = [1, 1]} : vector<32x384xf32> to vector<32x128xf32>
    %66 = arith.mulf %63, %65 : vector<32x128xf32>
    %67 = arith.addf %64, %66 : vector<32x128xf32>
    %cst_19 = arith.constant 0.000000e+00 : f32
    %68 = vector.broadcast %cst_19 : f32 to vector<32x128xf32>
    %69 = arith.cmpf ogt, %67, %68 : vector<32x128xf32>
    %cst_20 = arith.constant 2.000000e-01 : f32
    %70 = vector.broadcast %cst_20 : f32 to vector<32x128xf32>
    %71 = arith.mulf %70, %67 : vector<32x128xf32>
    %72 = arith.select %69, %67, %71 : vector<32x128xi1>, vector<32x128xf32>
    %73 = arith.mulf %55, %3 : vector<32x128xf32>
    %cst_21 = arith.constant 1.000000e+00 : f32
    %74 = vector.broadcast %cst_21 : f32 to vector<32x128xf32>
    %75 = arith.subf %74, %55 : vector<32x128xf32>
    %76 = arith.mulf %75, %72 : vector<32x128xf32>
    %77 = arith.addf %73, %76 : vector<32x128xf32>
    %c0_22 = arith.constant 0 : index
    %c0_23 = arith.constant 0 : index
    %78 = vector.load %arg6[%c0_22, %c0_23] : memref<32x128xf32, #tpu.memory_space<vmem>>, vector<32x128xf32>
    tpu.vector_store %arg6[%c0_22, %c0_23], %77 {strides = array<i32>} : memref<32x128xf32, #tpu.memory_space<vmem>>, vector<32x128xf32>,
    %79 = arith.truncf %77 : vector<32x128xf32> to vector<32x128xbf16>
    %c0_24 = arith.constant 0 : index
    %c0_25 = arith.constant 0 : index
    %c0_26 = arith.constant 0 : index
    %80 = vector.load %arg5[%c0_24, %c0_25, %c0_26] : memref<1x32x128xbf16, #tpu.memory_space<vmem>>, vector<1x32x128xbf16>
    %81 = vector.shape_cast %80 : vector<1x32x128xbf16> to vector<32x128xbf16>
    %82 = vector.shape_cast %79 : vector<32x128xbf16> to vector<1x32x128xbf16>
    tpu.vector_store %arg5[%c0_24, %c0_25, %c0_26], %82 {strides = array<i32>} : memref<1x32x128xbf16, #tpu.memory_space<vmem>>, vector<1x32x128xbf16>,
    return
  }
  func.func @transform_0(%arg0: i32, %arg1: i32) -> (i32, i32, i32) {
    %c0_i32 = arith.constant 0 : i32
    %c0_i32_0 = arith.constant 0 : i32
    return %arg1, %arg0, %c0_i32 : i32, i32, i32
  }
  func.func @transform_1(%arg0: i32, %arg1: i32) -> (i32, i32) {
    %c0_i32 = arith.constant 0 : i32
    %c0_i32_0 = arith.constant 0 : i32
    %c0_i32_1 = arith.constant 0 : i32
    return %c0_i32, %c0_i32_0 : i32, i32
  }
  func.func @transform_2(%arg0: i32, %arg1: i32) -> (i32, i32) {
    %c0_i32 = arith.constant 0 : i32
    %c0_i32_0 = arith.constant 0 : i32
    %c0_i32_1 = arith.constant 0 : i32
    return %c0_i32, %c0_i32_0 : i32, i32
  }
  func.func @transform_3(%arg0: i32, %arg1: i32) -> (i32, i32, i32) {
    %c0_i32 = arith.constant 0 : i32
    %c0_i32_0 = arith.constant 0 : i32
    return %arg1, %arg0, %c0_i32 : i32, i32, i32
  }
  func.func @transform_4(%arg0: i32, %arg1: i32) -> (i32, i32) {
    %c0_i32 = arith.constant 0 : i32
    %c0_i32_0 = arith.constant 0 : i32
    return %arg0, %c0_i32 : i32, i32
  }
}

module attributes {stable_mosaic.version = 11 : i64} {
  func.func @_fused_conv_i2h_kernel(%arg0: i32, %arg1: memref<32x256xbf16, #tpu.memory_space<vmem>>, %arg2: memref<512x128xbf16, #tpu.memory_space<vmem>>, %arg3: memref<1x128xf32, #tpu.memory_space<vmem>>, %arg4: memref<384x384xbf16, #tpu.memory_space<vmem>>, %arg5: memref<1x384xf32, #tpu.memory_space<vmem>>, %arg6: memref<32x384xbf16, #tpu.memory_space<vmem>>) attributes {dimension_semantics = [#tpu.dimension_semantics<parallel>], iteration_bounds = array<i64: 4>, scalar_prefetch = 0 : i64, scratch_operands = 0 : i64, tpu.core_type = #tpu.core_type<tc>, window_params = [{transform_indices = @transform_0, window_bounds = array<i64: 32, 256>}, {pipeline_mode = #tpu.pipeline_mode<synchronous>, transform_indices = @transform_1, window_bounds = array<i64: 512, 128>}, {pipeline_mode = #tpu.pipeline_mode<synchronous>, transform_indices = @transform_2, window_bounds = array<i64: 1, 128>}, {pipeline_mode = #tpu.pipeline_mode<synchronous>, transform_indices = @transform_3, window_bounds = array<i64: 384, 384>}, {pipeline_mode = #tpu.pipeline_mode<synchronous>, transform_indices = @transform_4, window_bounds = array<i64: 1, 384>}, {transform_indices = @transform_5, window_bounds = array<i64: 32, 384>}]} {
    %c0 = arith.constant 0 : index
    %c0_0 = arith.constant 0 : index
    %0 = vector.load %arg1[%c0, %c0_0] : memref<32x256xbf16, #tpu.memory_space<vmem>>, vector<32x256xbf16>
    %1 = arith.extf %0 : vector<32x256xbf16> to vector<32x256xf32>
    %2 = tpu.iota {dimensions = array<i32: 0>} : vector<32x1xi32>
    %c8_i32 = arith.constant 8 : i32
    %c0_i32 = arith.constant 0 : i32
    %3 = arith.cmpi eq, %c8_i32, %c0_i32 : i32
    %c1_i32 = arith.constant 1 : i32
    %4 = arith.select %3, %c1_i32, %c8_i32 : i32
    %5 = vector.broadcast %4 : i32 to vector<32x1xi32>
    %6 = arith.remsi %2, %5 : vector<32x1xi32>
    %c0_i32_1 = arith.constant 0 : i32
    %7 = vector.broadcast %c0_i32_1 : i32 to vector<32x1xi32>
    %8 = arith.cmpi ne, %6, %7 : vector<32x1xi32>
    %c0_i32_2 = arith.constant 0 : i32
    %9 = vector.broadcast %c0_i32_2 : i32 to vector<32x1xi32>
    %10 = arith.cmpi slt, %6, %9 : vector<32x1xi32>
    %c0_i32_3 = arith.constant 0 : i32
    %11 = arith.cmpi slt, %4, %c0_i32_3 : i32
    %12 = vector.broadcast %11 : i1 to vector<32x1xi1>
    %13 = vector.broadcast %12 : vector<32x1xi1> to vector<32x1xi1>
    %14 = arith.xori %10, %13 : vector<32x1xi1>
    %15 = arith.andi %14, %8 : vector<32x1xi1>
    %16 = vector.broadcast %4 : i32 to vector<32x1xi32>
    %17 = arith.addi %6, %16 : vector<32x1xi32>
    %18 = arith.select %15, %17, %6 : vector<32x1xi1>, vector<32x1xi32>
    %c0_4 = arith.constant 0 : index
    %c0_5 = arith.constant 0 : index
    %19 = vector.load %arg3[%c0_4, %c0_5] : memref<1x128xf32, #tpu.memory_space<vmem>>, vector<1x128xf32>
    %cst = arith.constant 0.000000e+00 : f32
    %20 = vector.broadcast %cst : f32 to vector<8x256xf32>
    %21 = tpu.concatenate %20, %1, %20 in 0 : vector<8x256xf32>, vector<32x256xf32>, vector<8x256xf32> -> vector<48x256xf32>
    %22 = vector.extract_strided_slice %21 {offsets = [7, 0], sizes = [32, 256], strides = [1, 1]} : vector<48x256xf32> to vector<32x256xf32>
    %c1_i32_6 = arith.constant 1 : i32
    %23 = vector.broadcast %c1_i32_6 : i32 to vector<32x1xi32>
    %24 = arith.cmpi sge, %18, %23 : vector<32x1xi32>
    %cst_7 = arith.constant 0.000000e+00 : f32
    %25 = vector.broadcast %cst_7 : f32 to vector<32x256xf32>
    %26 = vector.shape_cast %24 : vector<32x1xi1> to vector<32x1xi1>
    %27 = vector.broadcast %26 : vector<32x1xi1> to vector<32x256xi1>
    %28 = arith.select %27, %22, %25 : vector<32x256xi1>, vector<32x256xf32>
    %29 = vector.extract_strided_slice %21 {offsets = [8, 0], sizes = [32, 256], strides = [1, 1]} : vector<48x256xf32> to vector<32x256xf32>
    %30 = tpu.concatenate %28, %29 in 1 : vector<32x256xf32>, vector<32x256xf32> -> vector<32x512xf32>
    %31 = arith.truncf %30 : vector<32x512xf32> to vector<32x512xbf16>
    %c0_8 = arith.constant 0 : index
    %c0_9 = arith.constant 0 : index
    %32 = vector.load %arg2[%c0_8, %c0_9] : memref<512x128xbf16, #tpu.memory_space<vmem>>, vector<512x128xbf16>
    %cst_10 = arith.constant dense<0.000000e+00> : vector<32x128xf32>
    %33 = tpu.matmul %31, %32, %cst_10 {dimension_numbers = #tpu.dot_dimension_numbers<[1], [0], [0], [1], [0, 0, 1, 1], [], []>} : vector<32x512xbf16>, vector<512x128xbf16>, vector<32x128xf32> -> vector<32x128xf32>
    %34 = vector.broadcast %19 : vector<1x128xf32> to vector<32x128xf32>
    %35 = arith.addf %33, %34 : vector<32x128xf32>
    %cst_11 = arith.constant 0.000000e+00 : f32
    %36 = vector.broadcast %cst_11 : f32 to vector<32x128xf32>
    %37 = arith.cmpf ogt, %35, %36 : vector<32x128xf32>
    %cst_12 = arith.constant 2.000000e-01 : f32
    %38 = vector.broadcast %cst_12 : f32 to vector<32x128xf32>
    %39 = arith.mulf %38, %35 : vector<32x128xf32>
    %40 = arith.select %37, %35, %39 : vector<32x128xi1>, vector<32x128xf32>
    %c0_13 = arith.constant 0 : index
    %c0_14 = arith.constant 0 : index
    %41 = vector.load %arg5[%c0_13, %c0_14] : memref<1x384xf32, #tpu.memory_space<vmem>>, vector<1x384xf32>
    %cst_15 = arith.constant 0.000000e+00 : f32
    %42 = vector.broadcast %cst_15 : f32 to vector<8x128xf32>
    %43 = tpu.concatenate %42, %40, %42 in 0 : vector<8x128xf32>, vector<32x128xf32>, vector<8x128xf32> -> vector<48x128xf32>
    %44 = vector.extract_strided_slice %43 {offsets = [7, 0], sizes = [32, 128], strides = [1, 1]} : vector<48x128xf32> to vector<32x128xf32>
    %c1_i32_16 = arith.constant 1 : i32
    %45 = vector.broadcast %c1_i32_16 : i32 to vector<32x1xi32>
    %46 = arith.cmpi sge, %18, %45 : vector<32x1xi32>
    %cst_17 = arith.constant 0.000000e+00 : f32
    %47 = vector.broadcast %cst_17 : f32 to vector<32x128xf32>
    %48 = vector.shape_cast %46 : vector<32x1xi1> to vector<32x1xi1>
    %49 = vector.broadcast %48 : vector<32x1xi1> to vector<32x128xi1>
    %50 = arith.select %49, %44, %47 : vector<32x128xi1>, vector<32x128xf32>
    %51 = vector.extract_strided_slice %43 {offsets = [8, 0], sizes = [32, 128], strides = [1, 1]} : vector<48x128xf32> to vector<32x128xf32>
    %52 = vector.extract_strided_slice %43 {offsets = [9, 0], sizes = [32, 128], strides = [1, 1]} : vector<48x128xf32> to vector<32x128xf32>
    %c7_i32 = arith.constant 7 : i32
    %53 = vector.broadcast %c7_i32 : i32 to vector<32x1xi32>
    %54 = arith.cmpi slt, %18, %53 : vector<32x1xi32>
    %cst_18 = arith.constant 0.000000e+00 : f32
    %55 = vector.broadcast %cst_18 : f32 to vector<32x128xf32>
    %56 = vector.shape_cast %54 : vector<32x1xi1> to vector<32x1xi1>
    %57 = vector.broadcast %56 : vector<32x1xi1> to vector<32x128xi1>
    %58 = arith.select %57, %52, %55 : vector<32x128xi1>, vector<32x128xf32>
    %59 = tpu.concatenate %50, %51, %58 in 1 : vector<32x128xf32>, vector<32x128xf32>, vector<32x128xf32> -> vector<32x384xf32>
    %60 = arith.truncf %59 : vector<32x384xf32> to vector<32x384xbf16>
    %c0_19 = arith.constant 0 : index
    %c0_20 = arith.constant 0 : index
    %61 = vector.load %arg4[%c0_19, %c0_20] : memref<384x384xbf16, #tpu.memory_space<vmem>>, vector<384x384xbf16>
    %cst_21 = arith.constant dense<0.000000e+00> : vector<32x384xf32>
    %62 = tpu.matmul %60, %61, %cst_21 {dimension_numbers = #tpu.dot_dimension_numbers<[1], [0], [0], [1], [0, 0, 1, 1], [], []>} : vector<32x384xbf16>, vector<384x384xbf16>, vector<32x384xf32> -> vector<32x384xf32>
    %63 = vector.broadcast %41 : vector<1x384xf32> to vector<32x384xf32>
    %64 = arith.addf %62, %63 : vector<32x384xf32>
    %65 = arith.truncf %64 : vector<32x384xf32> to vector<32x384xbf16>
    %c0_22 = arith.constant 0 : index
    %c0_23 = arith.constant 0 : index
    %66 = vector.load %arg6[%c0_22, %c0_23] : memref<32x384xbf16, #tpu.memory_space<vmem>>, vector<32x384xbf16>
    tpu.vector_store %arg6[%c0_22, %c0_23], %65 {strides = array<i32>} : memref<32x384xbf16, #tpu.memory_space<vmem>>, vector<32x384xbf16>,
    return
  }
  func.func @transform_0(%arg0: i32) -> (i32, i32) {
    %c0_i32 = arith.constant 0 : i32
    %c0_i32_0 = arith.constant 0 : i32
    return %arg0, %c0_i32 : i32, i32
  }
  func.func @transform_1(%arg0: i32) -> (i32, i32) {
    %c0_i32 = arith.constant 0 : i32
    %c0_i32_0 = arith.constant 0 : i32
    %c0_i32_1 = arith.constant 0 : i32
    return %c0_i32, %c0_i32_0 : i32, i32
  }
  func.func @transform_2(%arg0: i32) -> (i32, i32) {
    %c0_i32 = arith.constant 0 : i32
    %c0_i32_0 = arith.constant 0 : i32
    %c0_i32_1 = arith.constant 0 : i32
    return %c0_i32, %c0_i32_0 : i32, i32
  }
  func.func @transform_3(%arg0: i32) -> (i32, i32) {
    %c0_i32 = arith.constant 0 : i32
    %c0_i32_0 = arith.constant 0 : i32
    %c0_i32_1 = arith.constant 0 : i32
    return %c0_i32, %c0_i32_0 : i32, i32
  }
  func.func @transform_4(%arg0: i32) -> (i32, i32) {
    %c0_i32 = arith.constant 0 : i32
    %c0_i32_0 = arith.constant 0 : i32
    %c0_i32_1 = arith.constant 0 : i32
    return %c0_i32, %c0_i32_0 : i32, i32
  }
  func.func @transform_5(%arg0: i32) -> (i32, i32) {
    %c0_i32 = arith.constant 0 : i32
    %c0_i32_0 = arith.constant 0 : i32
    return %arg0, %c0_i32 : i32, i32
  }
}

module attributes {stable_mosaic.version = 11 : i64} {
  func.func @_convgru_kernel(%arg0: i32, %arg1: i32, %arg2: memref<1x16x384xbf16, #tpu.memory_space<vmem>>, %arg3: memref<384x384xbf16, #tpu.memory_space<vmem>>, %arg4: memref<1x384xf32, #tpu.memory_space<vmem>>, %arg5: memref<1x16x128xbf16, #tpu.memory_space<vmem>>, %arg6: memref<16x128xf32, #tpu.memory_space<vmem>>) attributes {dimension_semantics = [#tpu.dimension_semantics<parallel>, #tpu.dimension_semantics<arbitrary>], iteration_bounds = array<i64: 1, 8>, scalar_prefetch = 0 : i64, scratch_operands = 0 : i64, tpu.core_type = #tpu.core_type<tc>, window_params = [{transform_indices = @transform_0, window_bounds = array<i64: 1, 16, 384>}, {pipeline_mode = #tpu.pipeline_mode<synchronous>, transform_indices = @transform_1, window_bounds = array<i64: 384, 384>}, {pipeline_mode = #tpu.pipeline_mode<synchronous>, transform_indices = @transform_2, window_bounds = array<i64: 1, 384>}, {transform_indices = @transform_3, window_bounds = array<i64: 1, 16, 128>}, {transform_indices = @transform_4, window_bounds = array<i64: 16, 128>}]} {
    %c0_i32 = arith.constant 0 : i32
    %0 = arith.cmpi eq, %arg1, %c0_i32 : i32
    %1 = arith.extui %0 : i1 to i32
    %c0_i32_0 = arith.constant 0 : i32
    %2 = arith.cmpi ne, %1, %c0_i32_0 : i32
    scf.if %2 {
      %cst_27 = arith.constant 0.000000e+00 : f32
      %83 = vector.broadcast %cst_27 : f32 to vector<16x128xf32>
      %c0_28 = arith.constant 0 : index
      %c0_29 = arith.constant 0 : index
      %84 = vector.load %arg6[%c0_28, %c0_29] : memref<16x128xf32, #tpu.memory_space<vmem>>, vector<16x128xf32>
      tpu.vector_store %arg6[%c0_28, %c0_29], %83 {strides = array<i32>} : memref<16x128xf32, #tpu.memory_space<vmem>>, vector<16x128xf32>,
    } else {
    }
    %c0 = arith.constant 0 : index
    %c0_1 = arith.constant 0 : index
    %3 = vector.load %arg6[%c0, %c0_1] : memref<16x128xf32, #tpu.memory_space<vmem>>, vector<16x128xf32>
    %4 = tpu.iota {dimensions = array<i32: 0>} : vector<16x1xi32>
    %c8_i32 = arith.constant 8 : i32
    %c0_i32_2 = arith.constant 0 : i32
    %5 = arith.cmpi eq, %c8_i32, %c0_i32_2 : i32
    %c1_i32 = arith.constant 1 : i32
    %6 = arith.select %5, %c1_i32, %c8_i32 : i32
    %7 = vector.broadcast %6 : i32 to vector<16x1xi32>
    %8 = arith.remsi %4, %7 : vector<16x1xi32>
    %c0_i32_3 = arith.constant 0 : i32
    %9 = vector.broadcast %c0_i32_3 : i32 to vector<16x1xi32>
    %10 = arith.cmpi ne, %8, %9 : vector<16x1xi32>
    %c0_i32_4 = arith.constant 0 : i32
    %11 = vector.broadcast %c0_i32_4 : i32 to vector<16x1xi32>
    %12 = arith.cmpi slt, %8, %11 : vector<16x1xi32>
    %c0_i32_5 = arith.constant 0 : i32
    %13 = arith.cmpi slt, %6, %c0_i32_5 : i32
    %14 = vector.broadcast %13 : i1 to vector<16x1xi1>
    %15 = vector.broadcast %14 : vector<16x1xi1> to vector<16x1xi1>
    %16 = arith.xori %12, %15 : vector<16x1xi1>
    %17 = arith.andi %16, %10 : vector<16x1xi1>
    %18 = vector.broadcast %6 : i32 to vector<16x1xi32>
    %19 = arith.addi %8, %18 : vector<16x1xi32>
    %20 = arith.select %17, %19, %8 : vector<16x1xi1>, vector<16x1xi32>
    %c0_6 = arith.constant 0 : index
    %c0_7 = arith.constant 0 : index
    %21 = vector.load %arg4[%c0_6, %c0_7] : memref<1x384xf32, #tpu.memory_space<vmem>>, vector<1x384xf32>
    %cst = arith.constant 0.000000e+00 : f32
    %22 = vector.broadcast %cst : f32 to vector<8x128xf32>
    %23 = tpu.concatenate %22, %3, %22 in 0 : vector<8x128xf32>, vector<16x128xf32>, vector<8x128xf32> -> vector<32x128xf32>
    %24 = vector.extract_strided_slice %23 {offsets = [7, 0], sizes = [16, 128], strides = [1, 1]} : vector<32x128xf32> to vector<16x128xf32>
    %c1_i32_8 = arith.constant 1 : i32
    %25 = vector.broadcast %c1_i32_8 : i32 to vector<16x1xi32>
    %26 = arith.cmpi sge, %20, %25 : vector<16x1xi32>
    %cst_9 = arith.constant 0.000000e+00 : f32
    %27 = vector.broadcast %cst_9 : f32 to vector<16x128xf32>
    %28 = vector.shape_cast %26 : vector<16x1xi1> to vector<16x1xi1>
    %29 = vector.broadcast %28 : vector<16x1xi1> to vector<16x128xi1>
    %30 = arith.select %29, %24, %27 : vector<16x128xi1>, vector<16x128xf32>
    %31 = vector.extract_strided_slice %23 {offsets = [8, 0], sizes = [16, 128], strides = [1, 1]} : vector<32x128xf32> to vector<16x128xf32>
    %32 = vector.extract_strided_slice %23 {offsets = [9, 0], sizes = [16, 128], strides = [1, 1]} : vector<32x128xf32> to vector<16x128xf32>
    %c7_i32 = arith.constant 7 : i32
    %33 = vector.broadcast %c7_i32 : i32 to vector<16x1xi32>
    %34 = arith.cmpi slt, %20, %33 : vector<16x1xi32>
    %cst_10 = arith.constant 0.000000e+00 : f32
    %35 = vector.broadcast %cst_10 : f32 to vector<16x128xf32>
    %36 = vector.shape_cast %34 : vector<16x1xi1> to vector<16x1xi1>
    %37 = vector.broadcast %36 : vector<16x1xi1> to vector<16x128xi1>
    %38 = arith.select %37, %32, %35 : vector<16x128xi1>, vector<16x128xf32>
    %39 = tpu.concatenate %30, %31, %38 in 1 : vector<16x128xf32>, vector<16x128xf32>, vector<16x128xf32> -> vector<16x384xf32>
    %40 = arith.truncf %39 : vector<16x384xf32> to vector<16x384xbf16>
    %c0_11 = arith.constant 0 : index
    %c0_12 = arith.constant 0 : index
    %41 = vector.load %arg3[%c0_11, %c0_12] : memref<384x384xbf16, #tpu.memory_space<vmem>>, vector<384x384xbf16>
    %cst_13 = arith.constant dense<0.000000e+00> : vector<16x384xf32>
    %42 = tpu.matmul %40, %41, %cst_13 {dimension_numbers = #tpu.dot_dimension_numbers<[1], [0], [0], [1], [0, 0, 1, 1], [], []>} : vector<16x384xbf16>, vector<384x384xbf16>, vector<16x384xf32> -> vector<16x384xf32>
    %43 = vector.broadcast %21 : vector<1x384xf32> to vector<16x384xf32>
    %44 = arith.addf %42, %43 : vector<16x384xf32>
    %c0_14 = arith.constant 0 : index
    %c0_15 = arith.constant 0 : index
    %c0_16 = arith.constant 0 : index
    %45 = vector.load %arg2[%c0_14, %c0_15, %c0_16] : memref<1x16x384xbf16, #tpu.memory_space<vmem>>, vector<1x16x384xbf16>
    %46 = vector.shape_cast %45 : vector<1x16x384xbf16> to vector<16x384xbf16>
    %47 = arith.extf %46 : vector<16x384xbf16> to vector<16x384xf32>
    %48 = vector.extract_strided_slice %47 {offsets = [0, 0], sizes = [16, 128], strides = [1, 1]} : vector<16x384xf32> to vector<16x128xf32>
    %49 = vector.extract_strided_slice %44 {offsets = [0, 0], sizes = [16, 128], strides = [1, 1]} : vector<16x384xf32> to vector<16x128xf32>
    %50 = arith.addf %48, %49 : vector<16x128xf32>
    %51 = arith.negf %50 : vector<16x128xf32>
    %52 = math.exp %51 : vector<16x128xf32>
    %cst_17 = arith.constant 1.000000e+00 : f32
    %53 = vector.broadcast %cst_17 : f32 to vector<16x128xf32>
    %54 = arith.addf %53, %52 : vector<16x128xf32>
    %55 = arith.divf %53, %54 : vector<16x128xf32>
    %56 = vector.extract_strided_slice %47 {offsets = [0, 128], sizes = [16, 128], strides = [1, 1]} : vector<16x384xf32> to vector<16x128xf32>
    %57 = vector.extract_strided_slice %44 {offsets = [0, 128], sizes = [16, 128], strides = [1, 1]} : vector<16x384xf32> to vector<16x128xf32>
    %58 = arith.addf %56, %57 : vector<16x128xf32>
    %59 = arith.negf %58 : vector<16x128xf32>
    %60 = math.exp %59 : vector<16x128xf32>
    %cst_18 = arith.constant 1.000000e+00 : f32
    %61 = vector.broadcast %cst_18 : f32 to vector<16x128xf32>
    %62 = arith.addf %61, %60 : vector<16x128xf32>
    %63 = arith.divf %61, %62 : vector<16x128xf32>
    %64 = vector.extract_strided_slice %47 {offsets = [0, 256], sizes = [16, 128], strides = [1, 1]} : vector<16x384xf32> to vector<16x128xf32>
    %65 = vector.extract_strided_slice %44 {offsets = [0, 256], sizes = [16, 128], strides = [1, 1]} : vector<16x384xf32> to vector<16x128xf32>
    %66 = arith.mulf %63, %65 : vector<16x128xf32>
    %67 = arith.addf %64, %66 : vector<16x128xf32>
    %cst_19 = arith.constant 0.000000e+00 : f32
    %68 = vector.broadcast %cst_19 : f32 to vector<16x128xf32>
    %69 = arith.cmpf ogt, %67, %68 : vector<16x128xf32>
    %cst_20 = arith.constant 2.000000e-01 : f32
    %70 = vector.broadcast %cst_20 : f32 to vector<16x128xf32>
    %71 = arith.mulf %70, %67 : vector<16x128xf32>
    %72 = arith.select %69, %67, %71 : vector<16x128xi1>, vector<16x128xf32>
    %73 = arith.mulf %55, %3 : vector<16x128xf32>
    %cst_21 = arith.constant 1.000000e+00 : f32
    %74 = vector.broadcast %cst_21 : f32 to vector<16x128xf32>
    %75 = arith.subf %74, %55 : vector<16x128xf32>
    %76 = arith.mulf %75, %72 : vector<16x128xf32>
    %77 = arith.addf %73, %76 : vector<16x128xf32>
    %c0_22 = arith.constant 0 : index
    %c0_23 = arith.constant 0 : index
    %78 = vector.load %arg6[%c0_22, %c0_23] : memref<16x128xf32, #tpu.memory_space<vmem>>, vector<16x128xf32>
    tpu.vector_store %arg6[%c0_22, %c0_23], %77 {strides = array<i32>} : memref<16x128xf32, #tpu.memory_space<vmem>>, vector<16x128xf32>,
    %79 = arith.truncf %77 : vector<16x128xf32> to vector<16x128xbf16>
    %c0_24 = arith.constant 0 : index
    %c0_25 = arith.constant 0 : index
    %c0_26 = arith.constant 0 : index
    %80 = vector.load %arg5[%c0_24, %c0_25, %c0_26] : memref<1x16x128xbf16, #tpu.memory_space<vmem>>, vector<1x16x128xbf16>
    %81 = vector.shape_cast %80 : vector<1x16x128xbf16> to vector<16x128xbf16>
    %82 = vector.shape_cast %79 : vector<16x128xbf16> to vector<1x16x128xbf16>
    tpu.vector_store %arg5[%c0_24, %c0_25, %c0_26], %82 {strides = array<i32>} : memref<1x16x128xbf16, #tpu.memory_space<vmem>>, vector<1x16x128xbf16>,
    return
  }
  func.func @transform_0(%arg0: i32, %arg1: i32) -> (i32, i32, i32) {
    %c0_i32 = arith.constant 0 : i32
    %c0_i32_0 = arith.constant 0 : i32
    return %arg1, %arg0, %c0_i32 : i32, i32, i32
  }
  func.func @transform_1(%arg0: i32, %arg1: i32) -> (i32, i32) {
    %c0_i32 = arith.constant 0 : i32
    %c0_i32_0 = arith.constant 0 : i32
    %c0_i32_1 = arith.constant 0 : i32
    return %c0_i32, %c0_i32_0 : i32, i32
  }
  func.func @transform_2(%arg0: i32, %arg1: i32) -> (i32, i32) {
    %c0_i32 = arith.constant 0 : i32
    %c0_i32_0 = arith.constant 0 : i32
    %c0_i32_1 = arith.constant 0 : i32
    return %c0_i32, %c0_i32_0 : i32, i32
  }
  func.func @transform_3(%arg0: i32, %arg1: i32) -> (i32, i32, i32) {
    %c0_i32 = arith.constant 0 : i32
    %c0_i32_0 = arith.constant 0 : i32
    return %arg1, %arg0, %c0_i32 : i32, i32, i32
  }
  func.func @transform_4(%arg0: i32, %arg1: i32) -> (i32, i32) {
    %c0_i32 = arith.constant 0 : i32
    %c0_i32_0 = arith.constant 0 : i32
    return %arg0, %c0_i32 : i32, i32
  }
}

</mosaic_0001>

<bundles_post_ra>
// kernel: _lambda_.4
= control target key start
LH: loop header
LB: loop body
LE: loop exit
PB: predicated region body
PF: predicated region fallthrough
CT: control target
= control target key end

     0   :  { %s2295_s18 = smov 0   ;;  %s2842_s0 = inlined_call_operand.vmem [shape: f32[256,16], index: 0, kind: input, shape index: {}]   ;;  %s2843_s1 = inlined_call_operand.vmem [shape: bf16[48,128], index: 1, kind: input, shape index: {}]   ;;  %s2844_s2 = inlined_call_operand.vmem [shape: f32[1,128], index: 2, kind: input, shape index: {}]   ;;  %s2845_s3 = inlined_call_operand.vmem [shape: bf16[384,384], index: 3, kind: input, shape index: {}]   ;;  %s2846_s4 = inlined_call_operand.vmem [shape: f32[1,384], index: 4, kind: input, shape index: {}]   ;;  %s2847_s5 = inlined_call_operand.vmem [shape: bf16[256,384], index: 5, kind: output, shape index: {}]  }
   0x1 LB: > { %s1795_s19 = sadd.s32 4294967295, %s2260_s18   ;;  %p1799_p0 = scmp.ge.s32.totalorder %s2260_s18, 1  ;;  %s2260_s18 = sphi %s2295_s18, %s15_s18  }
   0x2   : > { %p188_p1 = scmp.lt.s32.totalorder %s2260_s18, 5 }
   0x4   : > { %p189_p2 = pnand %p1799_p0, %p188_p1 }
   0x5   : > { %v2155_v0 = vld [vmem:[%s2843_s1 + $0x8] sm:$0xff] (!%p189_p2)   ;;  %s1800_s22 = sshll.u32 (!%p189_p2), %s1795_s19, 3  ;;  %v239_v1 = vlaneseq (!%p189_p2)  ;;  %v2156_v2 = vld [vmem:[%s2843_s1] sm:$0xff] (!%p189_p2)   ;;  %vm490_vm0 = vcmask (!%p189_p2), 130048   ;;  %vm378_vm1 = vcmask (!%p189_p2), 1040384   ;;  %v2262_v12 = vmov (!%p189_p2), 0.0  }
   0x6   : > { %192 = sbr.rel (%p189_p2) target bundleno = 553 (0x229), region = 40  ;;  %p218_p3 = scmp.lt.s32.totalorder (!%p189_p2), %s1800_s22, 31  ;;  %2041 = vmatprep.subr.bf16.mxu0 (!%p189_p2), %v2155_v0  ;;  %v2158_v4 = vld [vmem:[%s2845_s3 + $0x4] ss:$12 sps:$4 sm:$0xff] (!%p189_p2)   ;;  %v2341_v13 = vrot.slane (!%p189_p2), %v2262_v12, 7  ;;  %vm436_vm5 = vcmask (!%p189_p2), 1046528  }
   0x7   : > { %2042 = vmatpush3.bf16.msra.mxu0 (!%p189_p2), %v2155_v0  ;;  %v2311_v3 = vshrl.u32 (!%p189_p2), %v239_v1, 7  ;;  %1365 = vmatprep.subr.bf16.mxu1 (!%p189_p2), %v2158_v4  ;;  %v2346_v14 = vld [vmem:[%s2843_s1 + $0x10] sm:$0xff] (!%p189_p2)   ;;  %v2160_v19 = vld [vmem:[%s2845_s3] ss:$12 sps:$4 sm:$0xff] (!%p189_p2)   ;;  %v2161_v22 = vld [vmem:[%s2845_s3 + $0x1c] ss:$12 sps:$4 sm:$0xff] (!%p189_p2)  }
   0x8   : > { %2051 = vmatprep.subr.bf16.mxu0 (!%p189_p2), %v2156_v2  ;;  %1366 = vmatpush1.bf16.msra.mxu1 (!%p189_p2), %v2160_v19  ;;  %v2163_v25 = vld [vmem:[%s2845_s3 + $0x18] ss:$12 sps:$4 sm:$0xff] (!%p189_p2)   ;;  %v2164_v28 = vld [vmem:[%s2845_s3 + $0x34] ss:$12 sps:$4 sm:$0xff] (!%p189_p2)   ;;  %v2166_v38 = vld [vmem:[%s2845_s3 + $0x30] ss:$12 sps:$4 sm:$0xff] (!%p189_p2)  }
   0x9   : > { %v252_v9 = vand.u32 (!%p189_p2), 15, %v2311_v3  ;;  %v242_v16 = vadd.s32 (!%p189_p2), 16, %v2311_v3  ;;  %v244_v21 = vadd.s32 (!%p189_p2), 32, %v2311_v3  ;;  %1367 = vmatprep.subr.bf16.mxu1 (!%p189_p2), %v2161_v22  ;;  %v246_v37 = vadd.s32 (!%p189_p2), 48, %v2311_v3  ;;  %v2167_v41 = vld [vmem:[%s2845_s3 + $0x4c] ss:$12 sps:$4 sm:$0xff] (!%p189_p2)  }
   0xa   : > { %v241_v45 = vadd.s32 (!%p189_p2), 8, %v2311_v3  ;;  %v2169_v49 = vld [vmem:[%s2845_s3 + $0x48] ss:$12 sps:$4 sm:$0xff] (!%p189_p2)   ;;  %v2170_v53 = vld [vmem:[%s2845_s3 + $0x64] ss:$12 sps:$4 sm:$0xff] (!%p189_p2)   ;;  %v243_v54 = vadd.s32 (!%p189_p2), 24, %v2311_v3 }
   0xb   : > { %vm2368_vm2 = vcmp.ge.s32.totalorder (!%p189_p2), %v252_v9, 1  ;;  %v266_v29 = vand.u32 (!%p189_p2), 15, %v242_v16  ;;  %v280_v35 = vand.u32 (!%p189_p2), 15, %v244_v21  ;;  %v294_v48 = vand.u32 (!%p189_p2), 15, %v246_v37  ;;  %v2172_v62 = vld [vmem:[%s2845_s3 + $0x60] ss:$12 sps:$4 sm:$0xff] (!%p189_p2)  }
   0xc   : > { %1368 = vmatpush1.bf16.msra.mxu1 (!%p189_p2), %v2163_v25  ;;  %v259_v57 = vand.u32 (!%p189_p2), 15, %v241_v45  ;;  %v2173_v4 = vld [vmem:[%s2845_s3 + $0x7c] ss:$12 sps:$4 sm:$0xff] (!%p189_p2)   ;;  %v245_v9 = vadd.s32 (!%p189_p2), 40, %v2311_v3  ;;  %v2242_v46 = vld [vmem:[%s2845_s3 + $0x1f8] ss:$12 sps:$4 sm:$0xff] (!%p189_p2)  }
   0xd   : > { %s2871_s22 = smov (!%p218_p3, %s1800_s22), 31  ;;  %1369 = vmatprep.subr.bf16.mxu1 %v2164_v28  ;;  %vm2402_vm3 = vcmp.ge.s32.totalorder %v266_v29, 1  ;;  %vm2409_vm4 = vcmp.ge.s32.totalorder %v280_v35, 1  ;;  %vm2437_vm6 = vcmp.ge.s32.totalorder %v294_v48, 1  ;;  %v247_v28 = vadd.s32 56, %v2311_v3 }
   0xe   : > { %s1801_s25 = sshll.u32 %s2871_s22, 3  ;;  %vm2448_vm7 = vcmp.lt.s32.totalorder %v259_v57, 15  ;;  %v2181_v35 = vld [vmem:[%s2845_s3 + $0xa8] ss:$12 sps:$4 sm:$0xff]   ;;  %v2190_v48 = vld [vmem:[%s2845_s3 + $0xe0] ss:$12 sps:$4 sm:$0xff]  }
   0xf   : > { %s2317_s28 = scalar_lea.vmem %s2842_s0, %s1801_s25  ;;  %v2194_v57 = vld [vmem:[%s2845_s3 + $0xf0] ss:$12 sps:$4 sm:$0xff]   ;;  %s2143_s16 = smul.u32 12, %s2871_s22 }
  0x10   : > { %v2323_v5 = vld [vmem:[%s2317_s28] sm:$0xff]  ;;  %v2326_v6 = vld [vmem:[%s2317_s28 + $0x8] sm:$0xff]  ;;  %v2329_v7 = vld [vmem:[%s2317_s28 + $0x10] sm:$0xff]  ;;  %1370 = vmatpush1.bf16.msra.mxu1 %v2166_v38 }
  0x11   : > { %v2332_v8 = vld [vmem:[%s2317_s28 + $0x18] sm:$0xff]  ;;  %v480_v10 = vpack.c.bf16 %v2326_v6, %v2323_v5  ;;  %v2338_v11 = vld [vmem:[%s2317_s28 + $0x20] sm:$0xff]  ;;  %v380_v15 = vrot.slane %v2323_v5, 7  ;;  %v2353_v18 = vld [vmem:[%s2317_s28 + $0x28] sm:$0xff]  ;;  %v382_v20 = vrot.slane %v2326_v6, 7  ;;  %v384_v30 = vrot.slane %v2329_v7, 7  ;;  %1371 = vmatprep.subr.bf16.mxu1 %v2167_v41  ;;  %s2806_s20 = scalar_lea.vmem %s2847_s5, %s2143_s16 }
  0x12   : > { %v481_v17 = vpack.c.bf16 %v2332_v8, %v2329_v7  ;;  %v2366_v23 = vld [vmem:[%s2317_s28 + $0x30] sm:$0xff]  ;;  %v482_v26 = vpack.c.bf16 %v2353_v18, %v2338_v11  ;;  %v2378_v27 = vld [vmem:[%s2317_s28 + $0x38] sm:$0xff]  ;;  %v388_v32 = vrot.slane %v2338_v11, 7  ;;  %v386_v39 = vrot.slane %v2332_v8, 7 }
  0x13   : > { %2043 = vmatprep.mubr.msk.bf16.mxu0 %vm490_vm0, %v480_v10  ;;  %v381_v31 = vsel %vm378_vm1, %v2341_v13, %v380_v15  ;;  %v383_v33 = vsel %vm378_vm1, %v380_v15, %v382_v20  ;;  %v483_v36 = vpack.c.bf16 %v2378_v27, %v2366_v23  ;;  %v385_v43 = vsel %vm378_vm1, %v382_v20, %v384_v30  ;;  %v2182_v38 = vld [vmem:[%s2845_s3 + $0xc4] ss:$12 sps:$4 sm:$0xff]  }
  0x14   : > { %2044 = vmatmul.mubr.msk.bf16.vlgmr.msra.gmra.mrb[0].mxu0 %vm490_vm0, %v481_v17  ;;  %v404_v34 = vsel %vm2368_vm2, %v381_v31, 0.0  ;;  %v390_v44 = vrot.slane %v2353_v18, 7  ;;  %v389_v47 = vsel %vm378_vm1, %v386_v39, %v388_v32  ;;  %v387_v50 = vsel %vm378_vm1, %v384_v30, %v386_v39  ;;  %1372 = vmatpush1.bf16.msra.mxu1 %v2169_v49  ;;  %v2175_v17 = vld [vmem:[%s2845_s3 + $0x78] ss:$12 sps:$4 sm:$0xff]   ;;  %v2253_v1 = vld [vmem:[%s2845_s3 + $0x230] ss:$12 sps:$4 sm:$0xff]  }
  0x15   : > { %2052 = vmatpush3.bf16.msra.mxu0 %v2156_v2  ;;  %2047 = vmatprep.mubr.msk.bf16.mxu0 %vm490_vm0, %v482_v26  ;;  %v476_v40 = vpack.c.bf16 %v383_v33, %v404_v34  ;;  %v406_v51 = vsel %vm2402_vm3, %v385_v43, 0.0  ;;  %v392_v52 = vrot.slane %v2366_v23, 7  ;;  %v408_v56 = vsel %vm2409_vm4, %v389_v47, 0.0  ;;  %v2179_v31 = vld [vmem:[%s2845_s3 + $0xac] ss:$12 sps:$4 sm:$0xff]  }
  0x16   : > { %2061 = vmatprep.subr.bf16.mxu0 %v2346_v14  ;;  %v391_v55 = vsel %vm378_vm1, %v388_v32, %v390_v44  ;;  %v438_v58 = vrot.slane %v2326_v6, 1  ;;  %v440_v59 = vrot.slane %v2329_v7, 1  ;;  %v437_v60 = vrot.slane %v2323_v5, 1  ;;  %1373 = vmatprep.subr.bf16.mxu1 %v2170_v53  ;;  %v2185_v5 = vld [vmem:[%s2845_s3 + $0xc8] ss:$12 sps:$4 sm:$0xff]  }
  0x17   : > { %v477_v61 = vpack.c.bf16 %v387_v50, %v406_v51  ;;  %v394_v63 = vrot.slane %v2378_v27, 7  ;;  %v478_v0 = vpack.c.bf16 %v391_v55, %v408_v56  ;;  %v393_v2 = vsel %vm378_vm1, %v390_v44, %v392_v52  ;;  %v2184_v43 = vld [vmem:[%s2845_s3 + $0xc0] ss:$12 sps:$4 sm:$0xff]   ;;  %v2186_v44 = vld [vmem:[%s2845_s3 + $0x8] ss:$12 sps:$4 sm:$0xff]  }
  0x18   : > { %v441_v7 = vsel %vm436_vm5, %v438_v58, %v440_v59  ;;  %v442_v10 = vrot.slane %v2332_v8, 1  ;;  %v273_v15 = vand.u32 15, %v243_v54  ;;  %v410_v16 = vsel %vm2437_vm6, %v393_v2, 0.0  ;;  %1374 = vmatpush1.bf16.msra.mxu1 %v2172_v62  ;;  %v2176_v8 = vld [vmem:[%s2845_s3 + $0x94] ss:$12 sps:$4 sm:$0xff]  }
  0x19   : > { %v395_v19 = vsel %vm378_vm1, %v392_v52, %v394_v63  ;;  %v444_v20 = vrot.slane %v2338_v11, 1  ;;  %v439_v21 = vsel %vm436_vm5, %v437_v60, %v438_v58  ;;  %v463_v22 = vsel %vm2448_vm7, %v441_v7, 0.0  ;;  %1375 = vmatprep.subr.bf16.mxu1 %v2173_v4  ;;  %v2178_v11 = vld [vmem:[%s2845_s3 + $0x90] ss:$12 sps:$4 sm:$0xff]   ;;  %v2189_v51 = vld [vmem:[%s2845_s3 + $0xd8] ss:$12 sps:$4 sm:$0xff]  }
  0x1a   : > { %v446_v25 = vrot.slane %v2353_v18, 1  ;;  %v287_v26 = vand.u32 15, %v245_v9  ;;  %v479_v29 = vpack.c.bf16 %v395_v19, %v410_v16  ;;  %v651_v30 = vpack.c.bf16 %v463_v22, %v439_v21  ;;  %v2187_v47 = vld [vmem:[%s2845_s3 + $0xdc] ss:$12 sps:$4 sm:$0xff]   ;;  %v2191_v52 = vld [vmem:[%s2845_s3 + $0x20] ss:$12 sps:$4 sm:$0xff]  }
  0x1b   : > { %vm2480_vm8 = vcmp.lt.s32.totalorder %v273_v15, 15  ;;  %v445_v18 = vsel %vm436_vm5, %v442_v10, %v444_v20  ;;  %v2506_v41 = vrot.slane %v2262_v12, 1  ;;  %v2192_v53 = vld [vmem:[%s2845_s3 + $0xf4] ss:$12 sps:$4 sm:$0xff]   ;;  %v2195_v54 = vld [vmem:[%s2845_s3 + $0xf8] ss:$12 sps:$4 sm:$0xff]  }
  0x1c   : > { %2048 = vmatmul.mubr.msk.bf16.gmra.mrb[4].mxu0 %vm490_vm0, %v483_v36  ;;  %1376 = vmatpush1.bf16.msra.mxu1 %v2175_v17  ;;  %vm2486_vm9 = vcmp.lt.s32.totalorder %v287_v26, 15  ;;  %v443_v36 = vsel %vm436_vm5, %v440_v59, %v442_v10  ;;  %v465_v37 = vsel %vm2480_vm8, %v445_v18, 0.0  ;;  %v447_v39 = vsel %vm436_vm5, %v444_v20, %v446_v25  ;;  %v2196_v58 = vld [vmem:[%s2845_s3 + $0x38] ss:$12 sps:$4 sm:$0xff]   ;;  %v2199_v62 = vld [vmem:[%s2845_s3 + $0x108] ss:$12 sps:$4 sm:$0xff]  }
  0x1d   : > { %2053 = vmatprep.mubr.msk.bf16.mxu0 %vm490_vm0, %v476_v40  ;;  %1377 = vmatprep.subr.bf16.mxu1 %v2176_v8  ;;  %v652_v45 = vpack.c.bf16 %v465_v37, %v443_v36  ;;  %v2197_v59 = vld [vmem:[%s2845_s3 + $0x10c] ss:$12 sps:$4 sm:$0xff]   ;;  %v2201_v63 = vld [vmem:[%s2845_s3 + $0x50] ss:$12 sps:$4 sm:$0xff]   ;;  %v2205_v2 = vld [vmem:[%s2845_s3 + $0x128] ss:$12 sps:$4 sm:$0xff]  }
  0x1e   : > { %v2204_v4 = vld [vmem:[%s2845_s3 + $0x120] ss:$12 sps:$4 sm:$0xff]   ;;  %v2207_v7 = vld [vmem:[%s2845_s3 + $0x13c] ss:$12 sps:$4 sm:$0xff]   ;;  %v2209_v10 = vld [vmem:[%s2845_s3 + $0x138] ss:$12 sps:$4 sm:$0xff]  }
  0x1f   : > { %v2210_v9 = vld [vmem:[%s2845_s3 + $0x140] ss:$12 sps:$4 sm:$0xff]   ;;  %v2215_v17 = vld [vmem:[%s2845_s3 + $0x158] ss:$12 sps:$4 sm:$0xff]   ;;  %v2214_v19 = vld [vmem:[%s2845_s3 + $0x150] ss:$12 sps:$4 sm:$0xff]  }
  0x20   : > { %1378 = vmatpush1.bf16.msra.mxu1 %v2178_v11  ;;  %v2211_v15 = vld [vmem:[%s2845_s3 + $0x80] ss:$12 sps:$4 sm:$0xff]   ;;  %v2216_v8 = vld [vmem:[%s2845_s3 + $0x98] ss:$12 sps:$4 sm:$0xff]   ;;  %v2220_v21 = vld [vmem:[%s2845_s3 + $0x170] ss:$12 sps:$4 sm:$0xff]  }
  0x21   : > { %1379 = vmatprep.subr.bf16.mxu1 %v2179_v31  ;;  %v2212_v16 = vld [vmem:[%s2845_s3 + $0x154] ss:$12 sps:$4 sm:$0xff]   ;;  %v2217_v20 = vld [vmem:[%s2845_s3 + $0x16c] ss:$12 sps:$4 sm:$0xff]  }
  0x22   : > { %v2219_v22 = vld [vmem:[%s2845_s3 + $0x168] ss:$12 sps:$4 sm:$0xff]  }
  0x23   : > { %v2616_v26 = vld [vmem:[%s2845_s3 + $0x188] ss:$12 sps:$4 sm:$0xff]  }
  0x24   : > { %2054 = vmatmul.mubr.msk.bf16.vlgmr.msra.gmra.mrb[0].mxu0 %vm490_vm0, %v477_v61  ;;  %1380 = vmatpush1.bf16.msra.mxu1 %v2181_v35  ;;  %v2200_v61 = vld [vmem:[%s2845_s3 + $0x110] ss:$12 sps:$4 sm:$0xff]   ;;  %v2250_v6 = vld [vmem:[%s2845_s3 + $0x228] ss:$12 sps:$4 sm:$0xff]  }
  0x25   : > { %2062 = vmatpush3.bf16.msra.mxu0 %v2346_v14  ;;  %2057 = vmatprep.mubr.msk.bf16.mxu0 %vm490_vm0, %v478_v0  ;;  %v448_v14 = vrot.slane %v2366_v23, 1  ;;  %v450_v23 = vrot.slane %v2378_v27, 1  ;;  %v301_v27 = vand.u32 15, %v247_v28  ;;  %v2202_v0 = vld [vmem:[%s2845_s3 + $0x124] ss:$12 sps:$4 sm:$0xff]  }
  0x26   : > { %1989 = vmatprep.subr.bf16.mxu0 %v2185_v5  ;;  %1381 = vmatprep.subr.bf16.mxu1 %v2182_v38  ;;  %v2206_v5 = vld [vmem:[%s2845_s3 + $0x68] ss:$12 sps:$4 sm:$0xff]   ;;  %v1819_v28 = vld [vmem:[%s2844_s2] ss:$0 sm:$0xff] }
  0x27   : > { %v449_v34 = vsel %vm436_vm5, %v446_v25, %v448_v14  ;;  %vm2520_vm10 = vcmp.lt.s32.totalorder %v301_v27, 15  ;;  %v453_v50 = vsel %vm436_vm5, %v450_v23, %v2506_v41  ;;  %v451_v55 = vsel %vm436_vm5, %v448_v14, %v450_v23  ;;  %v2221_v25 = vld [vmem:[%s2845_s3 + $0xb0] ss:$12 sps:$4 sm:$0xff]  }
  0x28   : > { %v467_v40 = vsel %vm2486_vm9, %v449_v34, 0.0  ;;  %1382 = vmatpush1.bf16.msra.mxu1 %v2184_v43  ;;  %v469_v56 = vsel %vm2520_vm10, %v453_v50, 0.0  ;;  %v2224_v14 = vld [vmem:[%s2845_s3 + $0x184] ss:$12 sps:$4 sm:$0xff]  }
  0x29   : > { %v653_v12 = vpack.c.bf16 %v467_v40, %v447_v39  ;;  %1383 = vmatprep.subr.bf16.mxu1 %v2187_v47  ;;  %v654_v60 = vpack.c.bf16 %v469_v56, %v451_v55 }
  0x2c   : > { %2058 = vmatmul.mubr.msk.bf16.gmra.mrb[4].mxu0 %vm490_vm0, %v479_v29  ;;  %1384 = vmatpush1.bf16.msra.mxu1 %v2189_v51 }
  0x2d   : > { %2063 = vmatprep.mubr.msk.bf16.mxu0 %vm490_vm0, %v651_v30  ;;  %1385 = vmatprep.subr.bf16.mxu1 %v2192_v53 }
  0x30   : > { %1386 = vmatpush1.bf16.msra.mxu1 %v2194_v57 }
  0x31   : > { %1387 = vmatprep.subr.bf16.mxu1 %v2197_v59 }
  0x34   : > { %2064 = vmatmul.mubr.msk.bf16.vlgmr.msra.gmra.mrb[0].mxu0 %vm490_vm0, %v652_v45  ;;  %1388 = vmatpush1.bf16.msra.mxu1 %v2199_v62 }
  0x35   : > { %2067 = vmatprep.mubr.msk.bf16.mxu0 %vm490_vm0, %v653_v12  ;;  %1990 = vmatpush3.bf16.msra.mxu0 %v2186_v44 }
  0x36   : > { %1991 = vmatprep.subr.bf16.mxu0 %v2190_v48  ;;  %1389 = vmatprep.subr.bf16.mxu1 %v2202_v0 }
  0x38   : > { %1390 = vmatpush1.bf16.msra.mxu1 %v2204_v4 }
  0x39   : > { %1992 = vmatpush3.bf16.msra.mxu0 %v2191_v52  ;;  %1391 = vmatprep.subr.bf16.mxu1 %v2207_v7  ;;  %v2228_v7 = vld [vmem:[%s2845_s3 + $0x19c] ss:$12 sps:$4 sm:$0xff]  }
  0x3a   : > { %1993 = vmatprep.subr.bf16.mxu0 %v2195_v54 }
  0x3c   : > { %2068 = vmatmul.mubr.msk.bf16.gmra.mrb[4].mxu0 %vm490_vm0, %v654_v60  ;;  %1392 = vmatpush1.bf16.msra.mxu1 %v2209_v10  ;;  %vm2263_vm0 = vmmov 1  }
  0x3d   : > { %1994 = vmatpush3.bf16.msra.mxu0 %v2196_v58  ;;  %1393 = vmatprep.subr.bf16.mxu1 %v2212_v16 }
  0x3e   : > { %1995 = vmatprep.subr.bf16.mxu0 %v2200_v61 }
  0x40   : > { %1394 = vmatpush1.bf16.msra.mxu1 %v2214_v19 }
  0x41   : > { %1996 = vmatpush3.bf16.msra.mxu0 %v2201_v63  ;;  %1395 = vmatprep.subr.bf16.mxu1 %v2217_v20  ;;  %v2222_v63 = vld [vmem:[%s2845_s3 + $0x180] ss:$12 sps:$4 sm:$0xff]  }
  0x42   : > { %1997 = vmatprep.subr.bf16.mxu0 %v2205_v2  ;;  %v2245_v2 = vld [vmem:[%s2845_s3 + $0x200] ss:$12 sps:$4 sm:$0xff]  }
  0x44   : > { %1396 = vmatpush1.bf16.msra.mxu1 %v2219_v22 }
  0x45   : > { %1998 = vmatpush3.bf16.msra.mxu0 %v2206_v5  ;;  %1438 = vmatprep.subr.bf16.mxu1 %v2224_v14 }
  0x46   : > { %1999 = vmatprep.subr.bf16.mxu0 %v2210_v9 }
  0x49   : > { %2000 = vmatpush3.bf16.msra.mxu0 %v2211_v15  ;;  %v2229_v15 = vld [vmem:[%s2845_s3 + $0x1a0] ss:$12 sps:$4 sm:$0xff]  }
  0x4a   : > { %2001 = vmatprep.subr.bf16.mxu0 %v2215_v17 }
  0x4d   : > { %2002 = vmatpush3.bf16.msra.mxu0 %v2216_v8 }
  0x4e   : > { %2003 = vmatprep.subr.bf16.mxu0 %v2220_v21 }
  0x51   : > { %2004 = vmatpush3.bf16.msra.mxu0 %v2221_v25  ;;  %v2226_v25 = vld [vmem:[%s2845_s3 + $0x198] ss:$12 sps:$4 sm:$0xff]  }
  0x52   : > { %2071 = vmatprep.subr.bf16.mxu0 %v2616_v26 }
 0x107   : > { %v2065_v29 = vpop.f32.mrb[0].mxu0 }
 0x108   : > { %v754_v11 = vadd.f32 %v2065_v29, %v1819_v28  ;;  %v707_v30 = vpop.f32.mrb[1].mxu0  ;;  %v2232_v29 = vld [vmem:[%s2845_s3 + $0x1b4] ss:$12 sps:$4 sm:$0xff]  }
 0x109   : > { %v752_v31 = vadd.f32 %v1819_v28, %v707_v30  ;;  %v2066_v18 = vpop.f32.mrb[2].mxu0 }
 0x10a   : > { %vm762_vm11 = vcmp.gt.f32.partialorder %v754_v11, 0.0  ;;  %v770_v23 = vmul.f32 0.2, %v754_v11  ;;  %v755_v34 = vadd.f32 %v2066_v18, %v1819_v28  ;;  %v710_v35 = vpop.f32.mrb[3].mxu0 }
 0x10b   : > { %vm760_vm12 = vcmp.gt.f32.partialorder %v752_v31, 0.0  ;;  %v768_v36 = vmul.f32 0.2, %v752_v31  ;;  %v753_v37 = vadd.f32 %v1819_v28, %v710_v35 }
 0x10c   : > { %v2622_v27 = vsel %vm762_vm11, %v754_v11, %v770_v23  ;;  %vm763_vm13 = vcmp.gt.f32.partialorder %v755_v34, 0.0  ;;  %v771_v38 = vmul.f32 0.2, %v755_v34  ;;  %vm2650_vm11 = vmpackc.low %vm2263_vm0, %vm2368_vm2 }
 0x10d   : > { %vm761_vm14 = vcmp.gt.f32.partialorder %v753_v37, 0.0  ;;  %v769_v39 = vmul.f32 0.2, %v753_v37  ;;  %v2626_v43 = vsel %vm760_vm12, %v752_v31, %v768_v36  ;;  %v828_v44 = vrot.slane %v2622_v27, 1 }
 0x10e   : > { %v2624_v40 = vsel %vm763_vm13, %v755_v34, %v771_v38  ;;  %v793_v12 = vrot.slane %v2626_v43, 7  ;;  %v797_v50 = vrot.slane %v2622_v27, 7  ;;  %v825_v17 = vrot.slane %v2626_v43, 1 }
 0x10f   : > { %v830_v45 = vrot.slane %v2624_v40, 1  ;;  %v2069_v47 = vpop.f32.mrb[4].mxu0  ;;  %v2630_v48 = vsel %vm761_vm14, %v753_v37, %v769_v39  ;;  %v799_v51 = vrot.slane %v2624_v40, 7  ;;  %v861_v24 = vpack.c.bf16 %v2624_v40, %v2622_v27  ;;  %v2230_v39 = vld [vmem:[%s2845_s3 + $0x1b0] ss:$12 sps:$4 sm:$0xff]   ;;  %vm2692_vm14 = vmpackc.low %vm2263_vm0, %vm2402_vm3 }
 0x110   : > { %v758_v52 = vadd.f32 %v2069_v47, %v1819_v28  ;;  %v723_v53 = vpop.f32.mrb[5].mxu0  ;;  %v795_v54 = vrot.slane %v2630_v48, 7  ;;  %v858_v58 = vpack.c.bf16 %v2630_v48, %v2626_v43  ;;  %v794_v59 = vsel %vm378_vm1, %v2341_v13, %v793_v12  ;;  %v2236_v40 = vld [vmem:[%s2845_s3 + $0x1cc] ss:$12 sps:$4 sm:$0xff]   ;;  %vm1901_vm3 = vmpackc.low %vm2263_vm0, %vm2437_vm6 }
 0x111   : > { %v831_v55 = vsel %vm436_vm5, %v828_v44, %v830_v45  ;;  %v756_v56 = vadd.f32 %v1819_v28, %v723_v53  ;;  %v2070_v57 = vpop.f32.mrb[6].mxu0  ;;  %v826_v19 = vrot.slane %v2630_v48, 1  ;;  %v800_v30 = vsel %vm378_vm1, %v797_v50, %v799_v51  ;;  %vm1910_vm6 = vmpackc.low %vm2486_vm9, %vm2263_vm0 }
 0x112   : > { %vm766_vm15 = vcmp.gt.f32.partialorder %v758_v52, 0.0  ;;  %v774_v60 = vmul.f32 0.2, %v758_v52  ;;  %v759_v61 = vadd.f32 %v2070_v57, %v1819_v28  ;;  %v726_v62 = vpop.f32.mrb[7].mxu0  ;;  %v796_v0 = vsel %vm378_vm1, %v793_v12, %v795_v54  ;;  %1397 = vmatprep.mubr.bf16.mxu1 %v858_v58  ;;  %1543 = vmatprep.mubr.bf16.mxu0 %v858_v58 }
 0x113   : > { %vm764_vm12 = vcmp.gt.f32.partialorder %v756_v56, 0.0  ;;  %v772_v13 = vmul.f32 0.2, %v756_v56  ;;  %v757_v4 = vadd.f32 %v1819_v28, %v726_v62  ;;  %v1893_v5 = vpack.c.bf16 %v796_v0, %v794_v59  ;;  %v2234_v59 = vld [vmem:[%s2845_s3 + $0x1c8] ss:$12 sps:$4 sm:$0xff]  }
 0x114   : > { %v782_v9 = vsel %vm766_vm15, %v758_v52, %v774_v60  ;;  %vm767_vm13 = vcmp.gt.f32.partialorder %v759_v61, 0.0  ;;  %v775_v10 = vmul.f32 0.2, %v759_v61  ;;  %v798_v11 = vsel %vm378_vm1, %v795_v54, %v797_v50  ;;  %v2240_v62 = vld [vmem:[%s2845_s3 + $0x1e4] ss:$12 sps:$4 sm:$0xff]  }
 0x115   : > { %v780_v16 = vsel %vm764_vm12, %v756_v56, %v772_v13  ;;  %vm765_vm2 = vcmp.gt.f32.partialorder %v757_v4, 0.0  ;;  %1894 = vmatmul.mubr.msk.bf16.vlgmr.msra.gmra.mrb[0].mxu1 %vm2650_vm11, %v1893_v5  ;;  %1918 = vmatmul.mubr.msk.bf16.vlgmr.msra.gmra.mrb[8].mxu0 %vm2650_vm11, %v1893_v5  ;;  %v773_v22 = vmul.f32 0.2, %v757_v4  ;;  %v805_v14 = vrot.slane %v782_v9, 7  ;;  %v2244_v0 = vld [vmem:[%s2845_s3 + $0x1fc] ss:$12 sps:$4 sm:$0xff]  }
 0x116   : > { %v801_v8 = vrot.slane %v780_v16, 7  ;;  %v832_v20 = vrot.slane %v780_v16, 1  ;;  %v783_v21 = vsel %vm767_vm13, %v759_v61, %v775_v10  ;;  %1439 = vmatpush1.bf16.msra.mxu1 %v2222_v63  ;;  %1407 = vmatprep.mubr.bf16.mxu1 %v861_v24  ;;  %v1896_v34 = vpack.c.bf16 %v800_v30, %v798_v11  ;;  %v2238_v63 = vld [vmem:[%s2845_s3 + $0x1e0] ss:$12 sps:$4 sm:$0xff]   ;;  %v2246_v5 = vld [vmem:[%s2845_s3 + $0x210] ss:$12 sps:$4 sm:$0xff]  }
 0x117   : > { %v807_v28 = vrot.slane %v783_v21, 7  ;;  %1551 = vmatprep.mubr.bf16.mxu0 %v861_v24  ;;  %2072 = vmatpush3.bf16.msra.mxu0 %v2616_v26  ;;  %v838_v18 = vrot.slane %v783_v21, 1  ;;  %v781_v23 = vsel %vm765_vm2, %v757_v4, %v773_v22  ;;  %v2233_v26 = vld [vmem:[%s2845_s3 + $0x1b8] ss:$12 sps:$4 sm:$0xff]   ;;  %v867_v47 = vpack.c.bf16 %v783_v21, %v782_v9  ;;  %v2248_v13 = vld [vmem:[%s2845_s3 + $0x214] ss:$12 sps:$4 sm:$0xff]  }
 0x118   : > { %v833_v31 = vsel %vm436_vm5, %v830_v45, %v832_v20  ;;  %1440 = vmatprep.subr.bf16.mxu1 %v2228_v7  ;;  %2073 = vmatprep.subr.bf16.mxu0 %v2229_v15  ;;  %v803_v36 = vrot.slane %v781_v23, 7  ;;  %v834_v37 = vrot.slane %v781_v23, 1  ;;  %v864_v38 = vpack.c.bf16 %v781_v23, %v780_v16  ;;  %v2249_v4 = vld [vmem:[%s2845_s3 + $0x218] ss:$12 sps:$4 sm:$0xff]  }
 0x119   : > { %v2684_v35 = vpack.c.bf16 %v833_v31, %v831_v55  ;;  %v802_v45 = vsel %vm378_vm1, %v799_v51, %v801_v8  ;;  %v808_v48 = vsel %vm378_vm1, %v805_v14, %v807_v28  ;;  %v827_v12 = vsel %vm436_vm5, %v825_v17, %v826_v19  ;;  %v2237_v51 = vld [vmem:[%s2845_s3 + $0x1d0] ss:$12 sps:$4 sm:$0xff]  }
 0x11a   : > { %1441 = vmatpush1.bf16.msra.mxu1 %v2226_v25  ;;  %v836_v50 = vrot.slane %v782_v9, 1  ;;  %v804_v52 = vsel %vm378_vm1, %v801_v8, %v803_v36  ;;  %v806_v42 = vsel %vm378_vm1, %v803_v36, %v805_v14  ;;  %v829_v53 = vsel %vm436_vm5, %v826_v19, %v828_v44  ;;  %vm1898_vm1 = vmpackc.low %vm2263_vm0, %vm2409_vm4  ;;  %v2252_v9 = vld [vmem:[%s2845_s3 + $0x22c] ss:$12 sps:$4 sm:$0xff]   ;;  %v784_v36 = vld [vmem:[%s2846_s4] sm:$0x7] }
 0x11b   : > { %2074 = vmatpush3.bf16.msra.mxu0 %v2229_v15  ;;  %1442 = vmatprep.subr.bf16.mxu1 %v2232_v29  ;;  %v1899_v54 = vpack.c.bf16 %v804_v52, %v802_v45  ;;  %v1902_v55 = vpack.c.bf16 %v808_v48, %v806_v42  ;;  %v1905_v56 = vpack.c.bf16 %v829_v53, %v827_v12  ;;  %vm2760_vm4 = vmpackc.low %vm2448_vm7, %vm2263_vm0  ;;  %v2264_v10 = vmov 0  }
 0x11c   : > { %2075 = vmatprep.subr.bf16.mxu0 %v2233_v26  ;;  %v835_v57 = vsel %vm436_vm5, %v832_v20, %v834_v37  ;;  %v837_v27 = vsel %vm436_vm5, %v834_v37, %v836_v50  ;;  %v839_v44 = vsel %vm436_vm5, %v836_v50, %v838_v18  ;;  %v840_v58 = vsel %vm436_vm5, %v838_v18, %v2506_v41  ;;  %v2241_v41 = vld [vmem:[%s2845_s3 + $0x1e8] ss:$12 sps:$4 sm:$0xff]   ;;  %vm1907_vm5 = vmpackc.low %vm2480_vm8, %vm2263_vm0 }
 0x11d   : > { %1897 = vmatmul.mubr.msk.bf16.gmra.mrb[4].mxu1 %vm2692_vm14, %v1896_v34  ;;  %1921 = vmatmul.mubr.msk.bf16.gmra.mrb[12].mxu0 %vm2692_vm14, %v1896_v34  ;;  %v1911_v60 = vpack.c.bf16 %v837_v27, %v835_v57  ;;  %v1914_v61 = vpack.c.bf16 %v840_v58, %v839_v44  ;;  %vm1913_vm7 = vmpackc.low %vm2520_vm10, %vm2263_vm0  ;;  %v968_v23 = vsub.s32 0, %v2311_v3  ;;  %v976_v34 = vsub.s32 2, %v2311_v3 }
 0x11e   : > { %1443 = vmatpush1.bf16.msra.mxu1 %v2230_v39  ;;  %1417 = vmatprep.mubr.bf16.mxu1 %v864_v38  ;;  %v972_v37 = vsub.s32 1, %v2311_v3 }
 0x11f   : > { %1559 = vmatprep.mubr.bf16.mxu0 %v864_v38  ;;  %2076 = vmatpush3.bf16.msra.mxu0 %v2233_v26  ;;  %v2796_v43 = vrot.slane %v784_v36, %v968_v23  ;;  %v977_v45 = vrot.slane %v784_v36, %v976_v34 }
 0x120   : > { %1444 = vmatprep.subr.bf16.mxu1 %v2236_v40  ;;  %2077 = vmatprep.subr.bf16.mxu0 %v2237_v51 }
 0x122   : > { %1445 = vmatpush1.bf16.msra.mxu1 %v2234_v59 }
 0x123   : > { %2078 = vmatpush3.bf16.msra.mxu0 %v2237_v51  ;;  %1446 = vmatprep.subr.bf16.mxu1 %v2240_v62 }
 0x124   : > { %2079 = vmatprep.subr.bf16.mxu0 %v2241_v41 }
 0x125   : > { %1900 = vmatmul.mubr.msk.bf16.gmra.mrb[8].mxu1 %vm1898_vm1, %v1899_v54  ;;  %1924 = vmatmul.mubr.msk.bf16.gmra.mrb[16].mxu0 %vm1898_vm1, %v1899_v54 }
 0x126   : > { %1447 = vmatpush1.bf16.msra.mxu1 %v2238_v63  ;;  %1427 = vmatprep.mubr.bf16.mxu1 %v867_v47 }
 0x127   : > { %1567 = vmatprep.mubr.bf16.mxu0 %v867_v47  ;;  %2080 = vmatpush3.bf16.msra.mxu0 %v2241_v41  ;;  %v2798_v47 = vrot.slane %v784_v36, %v972_v37 }
 0x128   : > { %1448 = vmatprep.subr.bf16.mxu1 %v2244_v0  ;;  %2081 = vmatprep.subr.bf16.mxu0 %v2245_v2 }
 0x12a   : > { %1449 = vmatpush1.bf16.msra.mxu1 %v2242_v46 }
 0x12b   : > { %2082 = vmatpush3.bf16.msra.mxu0 %v2245_v2  ;;  %1450 = vmatprep.subr.bf16.mxu1 %v2248_v13 }
 0x12c   : > { %2083 = vmatprep.subr.bf16.mxu0 %v2249_v4 }
 0x12d   : > { %1903 = vmatmul.mubr.msk.bf16.gmra.mrb[12].mxu1 %vm1901_vm3, %v1902_v55  ;;  %1927 = vmatmul.mubr.msk.bf16.gmra.mrb[20].mxu0 %vm1901_vm3, %v1902_v55 }
 0x12e   : > { %1451 = vmatpush1.bf16.msra.mxu1 %v2246_v5  ;;  %2087 = vmatprep.mubr.msk.bf16.mxu0 %vm2760_vm4, %v1905_v56 }
 0x12f   : > { %2084 = vmatpush3.bf16.msra.mxu0 %v2249_v4  ;;  %1452 = vmatprep.subr.bf16.mxu1 %v2252_v9 }
 0x130   : > { %2085 = vmatprep.subr.bf16.mxu0 %v2253_v1  ;;  %1470 = vmatprep.mubr.bf16.mxu1 %v2264_v10 }
 0x132   : > { %1453 = vmatpush1.bf16.msra.mxu1 %v2250_v6 }
 0x133   : > { %2086 = vmatpush3.bf16.msra.mxu0 %v2253_v1 }
 0x135   : > { %1906 = vmatmul.mubr.msk.bf16.vlgmr.msra.gmra.mrb[0].mxu1 %vm2760_vm4, %v1905_v56 }
 0x136   : > { %2088 = vmatmul.mubr.msk.bf16.vlgmr.msra.gmra.mrb[24].mxu0 %vm1907_vm5, %v2684_v35  ;;  %1480 = vmatprep.mubr.bf16.mxu1 %v2264_v10 }
 0x137   : > { %2091 = vmatprep.mubr.msk.bf16.mxu0 %vm1910_vm6, %v1911_v60 }
 0x13d   : > { %1909 = vmatmul.mubr.msk.bf16.gmra.mrb[4].mxu1 %vm1907_vm5, %v2684_v35 }
 0x13e   : > { %2092 = vmatmul.mubr.msk.bf16.gmra.mrb[28].mxu0 %vm1913_vm7, %v1914_v61  ;;  %1490 = vmatprep.mubr.bf16.mxu1 %v2264_v10 }
 0x145   : > { %1912 = vmatmul.mubr.msk.bf16.gmra.mrb[8].mxu1 %vm1910_vm6, %v1911_v60 }
 0x146   : > { %1500 = vmatprep.mubr.bf16.mxu1 %v2264_v10 }
 0x14d   : > { %1915 = vmatmul.mubr.msk.bf16.gmra.mrb[12].mxu1 %vm1913_vm7, %v1914_v61 }
 0x1e8   : > { %v2005_v32 = vpop.f32.mrb[8].mxu0 }
 0x1e9   : > { %v2006_v33 = vpop.f32.mrb[9].mxu0 }
 0x1ea   : > { %v2007_v24 = vadd.f32 %v2006_v33, %v2005_v32  ;;  %v2008_v15 = vpop.f32.mrb[10].mxu0 }
 0x1eb   : > { %v2009_v16 = vpop.f32.mrb[11].mxu0 }
 0x1ec   : > { %v2010_v17 = vadd.f32 %v2009_v16, %v2008_v15  ;;  %v1546_v53 = vadd.f32 %v2007_v24, %v977_v45 }
 0x1ee   : > { %v1549_v58 = vadd.f32 %v2010_v17, %v977_v45 }
 0x1f0   : > { %v2011_v19 = vpop.f32.mrb[12].mxu0 }
 0x1f1   : > { %v2012_v8 = vpop.f32.mrb[13].mxu0 }
 0x1f2   : > { %v2013_v20 = vadd.f32 %v2012_v8, %v2011_v19  ;;  %v2014_v21 = vpop.f32.mrb[14].mxu0 }
 0x1f3   : > { %v2015_v22 = vpop.f32.mrb[15].mxu0 }
 0x1f4   : > { %v2016_v49 = vadd.f32 %v2015_v22, %v2014_v21  ;;  %v1554_v12 = vadd.f32 %v2013_v20, %v977_v45 }
 0x1f6   : > { %v1557_v55 = vadd.f32 %v2016_v49, %v977_v45 }
 0x1f8   : > { %v2017_v25 = vpop.f32.mrb[16].mxu0 }
 0x1f9   : > { %v2018_v14 = vpop.f32.mrb[17].mxu0 }
 0x1fa   : > { %v2019_v28 = vadd.f32 %v2018_v14, %v2017_v25  ;;  %v2020_v29 = vpop.f32.mrb[18].mxu0 }
 0x1fb   : > { %v2021_v11 = vpop.f32.mrb[19].mxu0 }
 0x1fc   : > { %v2788_v30 = vadd.f32 %v2021_v11, %v2020_v29  ;;  %v1562_v6 = vadd.f32 %v2019_v28, %v977_v45 }
 0x1fe   : > { %v1565_v20 = vadd.f32 %v2788_v30, %v977_v45 }
 0x200   : > { %v2023_v31 = vpop.f32.mrb[20].mxu0 }
 0x201   : > { %v2024_v18 = vpop.f32.mrb[21].mxu0 }
 0x202   : > { %v2025_v26 = vadd.f32 %v2024_v18, %v2023_v31  ;;  %v2026_v35 = vpop.f32.mrb[22].mxu0 }
 0x203   : > { %v2027_v38 = vpop.f32.mrb[23].mxu0 }
 0x204   : > { %v2028_v39 = vadd.f32 %v2027_v38, %v2026_v35  ;;  %v1570_v5 = vadd.f32 %v2025_v26, %v977_v45 }
 0x206   : > { %v1573_v15 = vadd.f32 %v2028_v39, %v977_v45 }
 0x208   : > { %v1472_v48 = vpop.f32.mrb[0].mxu1 }
 0x209   : > { %v2095_v50 = vadd.f32 %v1472_v48, %v2796_v43  ;;  %v2089_v52 = vpop.f32.mrb[24].mxu0  ;;  %v1474_v42 = vpop.f32.mrb[1].mxu1 }
 0x20a   : > { %v1619_v40 = vadd.f32 %v2089_v52, %v1554_v12  ;;  %v2096_v51 = vadd.f32 %v1474_v42, %v2798_v47  ;;  %v1610_v54 = vpop.f32.mrb[25].mxu0  ;;  %v1476_v3 = vpop.f32.mrb[2].mxu1 }
 0x20b   : > { %v1611_v56 = vadd.f32 %v1610_v54, %v1546_v53  ;;  %v2097_v57 = vadd.f32 %v1476_v3, %v2796_v43  ;;  %v2090_v27 = vpop.f32.mrb[26].mxu0  ;;  %v1478_v44 = vpop.f32.mrb[3].mxu1 }
 0x20c   : > { %v1963_v59 = vpack.c.bf16 %v1619_v40, %v1619_v40  ;;  %v1958_v60 = vpack.c.bf16 %v2096_v51, %v2095_v50  ;;  %v1622_v61 = vadd.f32 %v2090_v27, %v1557_v55  ;;  %v2098_v62 = vadd.f32 %v1478_v44, %v2798_v47  ;;  %v1613_v41 = vpop.f32.mrb[27].mxu0 }
 0x20d   : > { %v1959_v63 = vpack.c.bf16 %v1611_v56, %v1611_v56  ;;  %v1614_v0 = vadd.f32 %v1613_v41, %v1549_v58 }
 0x20e   : > { %1726 = vst [vmem:[%s2806_s20 + $0x20] sm:$0xf] %v1963_v59  ;;  %1721 = vst [vmem:[%s2806_s20] sm:$0xff] %v1958_v60  ;;  %v1965_v2 = vpack.c.bf16 %v1622_v61, %v1622_v61  ;;  %v1960_v46 = vpack.c.bf16 %v2098_v62, %v2097_v57 }
 0x20f   : > { %1722 = vst [vmem:[%s2806_s20 + $0x8] sm:$0xf] %v1959_v63  ;;  %v1961_v13 = vpack.c.bf16 %v1614_v0, %v1614_v0 }
 0x210   : > { %1728 = vst [vmem:[%s2806_s20 + $0x2c] sm:$0xf] %v1965_v2  ;;  %1723 = vst [vmem:[%s2806_s20 + $0xc] sm:$0xff] %v1960_v46  ;;  %v1482_v4 = vpop.f32.mrb[4].mxu1 }
 0x211   : > { %1724 = vst [vmem:[%s2806_s20 + $0x14] sm:$0xf] %v1961_v13  ;;  %v2099_v7 = vadd.f32 %v1482_v4, %v2796_v43  ;;  %v2093_v9 = vpop.f32.mrb[28].mxu0  ;;  %v1484_v1 = vpop.f32.mrb[5].mxu1 }
 0x212   : > { %v1635_v10 = vadd.f32 %v2093_v9, %v1570_v5  ;;  %v2100_v32 = vadd.f32 %v1484_v1, %v2798_v47  ;;  %v1626_v33 = vpop.f32.mrb[29].mxu0  ;;  %v1486_v24 = vpop.f32.mrb[6].mxu1 }
 0x213   : > { %v1627_v16 = vadd.f32 %v1626_v33, %v1562_v6  ;;  %v2101_v17 = vadd.f32 %v1486_v24, %v2796_v43  ;;  %v2094_v19 = vpop.f32.mrb[30].mxu0  ;;  %v1488_v8 = vpop.f32.mrb[7].mxu1 }
 0x214   : > { %v1971_v21 = vpack.c.bf16 %v1635_v10, %v1635_v10  ;;  %v1962_v22 = vpack.c.bf16 %v2100_v32, %v2099_v7  ;;  %v1638_v49 = vadd.f32 %v2094_v19, %v1573_v15  ;;  %v2102_v25 = vadd.f32 %v1488_v8, %v2798_v47  ;;  %v1629_v14 = vpop.f32.mrb[31].mxu0 }
 0x215   : > { %v1967_v28 = vpack.c.bf16 %v1627_v16, %v1627_v16  ;;  %v1630_v29 = vadd.f32 %v1629_v14, %v1565_v20 }
 0x216   : > { %1734 = vst [vmem:[%s2806_s20 + $0x50] sm:$0xf] %v1971_v21  ;;  %1725 = vst [vmem:[%s2806_s20 + $0x18] sm:$0xff] %v1962_v22  ;;  %v1973_v11 = vpack.c.bf16 %v1638_v49, %v1638_v49  ;;  %v1964_v31 = vpack.c.bf16 %v2102_v25, %v2101_v17 }
 0x217   : > { %1730 = vst [vmem:[%s2806_s20 + $0x38] sm:$0xf] %v1967_v28  ;;  %v1969_v18 = vpack.c.bf16 %v1630_v29, %v1630_v29 }
 0x218   : > { %1736 = vst [vmem:[%s2806_s20 + $0x5c] sm:$0xf] %v1973_v11  ;;  %1727 = vst [vmem:[%s2806_s20 + $0x24] sm:$0xff] %v1964_v31  ;;  %v1492_v30 = vpop.f32.mrb[8].mxu1 }
 0x219   : > { %1732 = vst [vmem:[%s2806_s20 + $0x44] sm:$0xf] %v1969_v18  ;;  %v2103_v23 = vadd.f32 %v1492_v30, %v2796_v43  ;;  %v1494_v34 = vpop.f32.mrb[9].mxu1 }
 0x21a   : > { %v2104_v26 = vadd.f32 %v1494_v34, %v2798_v47  ;;  %v1496_v35 = vpop.f32.mrb[10].mxu1 }
 0x21b   : > { %v2105_v36 = vadd.f32 %v1496_v35, %v2796_v43  ;;  %v1498_v37 = vpop.f32.mrb[11].mxu1 }
 0x21c   : > { %v1966_v38 = vpack.c.bf16 %v2104_v26, %v2103_v23  ;;  %v2106_v39 = vadd.f32 %v1498_v37, %v2798_v47 }
 0x21e   : > { %1729 = vst [vmem:[%s2806_s20 + $0x30] sm:$0xff] %v1966_v38  ;;  %v1968_v45 = vpack.c.bf16 %v2106_v39, %v2105_v36 }
 0x220   : > { %1731 = vst [vmem:[%s2806_s20 + $0x3c] sm:$0xff] %v1968_v45  ;;  %v1502_v48 = vpop.f32.mrb[12].mxu1 }
 0x221   : > { %v2107_v12 = vadd.f32 %v1502_v48, %v2796_v43  ;;  %v1504_v50 = vpop.f32.mrb[13].mxu1 }
 0x222   : > { %v2108_v52 = vadd.f32 %v1504_v50, %v2798_v47  ;;  %v1506_v42 = vpop.f32.mrb[14].mxu1 }
 0x223   : > { %v2109_v53 = vadd.f32 %v1506_v42, %v2796_v43  ;;  %v1508_v40 = vpop.f32.mrb[15].mxu1 }
 0x224   : > { %v1970_v51 = vpack.c.bf16 %v2108_v52, %v2107_v12  ;;  %v2110_v54 = vadd.f32 %v1508_v40, %v2798_v47 }
 0x226   : > { %1733 = vst [vmem:[%s2806_s20 + $0x48] sm:$0xff] %v1970_v51  ;;  %v1972_v3 = vpack.c.bf16 %v2110_v54, %v2109_v53 }
 0x228   : > { %1735 = vst [vmem:[%s2806_s20 + $0x54] sm:$0xff] %v1972_v3 }
 0x229 PF: > { %s15_s18 = sadd.s32 1, %s2260_s18  }
 0x22a   : > { %p12_p4 = scmp.ge.s32.totalorder %s15_s18, 6  }
 0x22c   :  { %14 = sbr.rel (!%p12_p4) target bundleno = 1 (0x1), region = 70 }

// kernel: _lambda_.5
= control target key start
LH: loop header
LB: loop body
LE: loop exit
PB: predicated region body
PF: predicated region fallthrough
CT: control target
= control target key end

     0   :  { %s1770_s15 = smov 0   ;;  %s1772_s16 = smov 0   ;;  %s2166_s0 = inlined_call_operand.vmem [shape: bf16[8,32,384], index: 0, kind: input, shape index: {}]   ;;  %s2167_s1 = inlined_call_operand.vmem [shape: bf16[384,384], index: 1, kind: input, shape index: {}]   ;;  %s2168_s2 = inlined_call_operand.vmem [shape: f32[1,384], index: 2, kind: input, shape index: {}]   ;;  %s2169_s3 = inlined_call_operand.vmem [shape: bf16[8,32,128], index: 3, kind: output, shape index: {0}]   ;;  %s2170_s4 = inlined_call_operand.vmem [shape: f32[32,128], index: 4, kind: output, shape index: {1}]  }
   0x1   :  { %s1774_s17 = smov 0  }
   0x2 LB: > { %s24_s18 = sadd.s32 1, %s1735_s16  ;;  %p1353_p0 = scmp.ge.s32.totalorder %s1739_s17, 1  ;;  %s1739_s17 = sphi %s1774_s17, %s15_s17   ;;  %s1735_s16 = sphi %s1772_s16, %s2176_s16   ;;  %s1731_s15 = sphi %s1770_s15, %s2175_s15  }
   0x3   : > { %p25_p1 = scmp.ge.s32.totalorder %s24_s18, 8  ;;  %p187_p2 = scmp.lt.s32.totalorder %s1739_s17, 9 }
   0x5   : > { %s2178_s18 = smov (%p25_p1, %s24_s18), 0  ;;  %p188_p3 = pnand %p1353_p0, %p187_p2 }
   0x6   : > { %p228_p4 = scmp.lt.s32.totalorder (!%p188_p3), %s1731_s15, 7  ;;  %p1357_p5 = scmp.ne.s32.totalorder (!%p188_p3), %s1731_s15, 0 }
   0x7   : > { %191 = sbr.rel (%p188_p3) target bundleno = 357 (0x165), region = 32 }
   0xe   : > { %s229_s19 = scalar_select %p228_p4, %s1731_s15, 7 }
   0xf   : > { %258 = sbr.rel (%p1357_p5) target bundleno = 22 (0x16), region = 36  ;;  %v1741_v0 = vmov (!%p1357_p5), 0.0  }
  0x10   : > { %s1560_s20 = smul.u32 48, %s229_s19  ;;  %s1470_s21 = sshll.u32 %s229_s19, 4  ;;  %259 = vst [vmem:[%s2170_s4] sm:$0xff] (!%p1357_p5), %v1741_v0  ;;  %260 = vst [vmem:[%s2170_s4 + $0x8] sm:$0xff] (!%p1357_p5), %v1741_v0 }
  0x11   : > { %s1791_s24 = scalar_lea.vmem %s2169_s3, %s1470_s21  ;;  %261 = vst [vmem:[%s2170_s4 + $0x10] sm:$0xff] (!%p1357_p5), %v1741_v0  ;;  %262 = vst [vmem:[%s2170_s4 + $0x18] sm:$0xff] (!%p1357_p5), %v1741_v0 }
  0x12   : > { %s1796_s27 = scalar_lea.vmem %s2166_s0, %s1560_s20 }
  0x16 PF: > { %v1589_v1 = vld [vmem:[%s2167_s1 + $0x4] ss:$12 sps:$4 sm:$0xff]   ;;  %v1742_v3 = vmov 0   ;;  %v1593_v4 = vld [vmem:[%s2167_s1] ss:$12 sps:$4 sm:$0xff]   ;;  %v267_v16 = vlaneseq  ;;  %vm368_vm0 = vcmask 1046528  }
  0x17   : > { %v1591_v2 = vld [vmem:[%s2167_s1 + $0x184] ss:$12 sps:$4 sm:$0xff]   ;;  %973 = vmatprep.mubr.bf16.mxu1 %v1742_v3  ;;  %888 = vmatprep.subr.bf16.mxu0 %v1589_v1  ;;  %v1594_v5 = vld [vmem:[%s2167_s1 + $0x180] ss:$12 sps:$4 sm:$0xff]   ;;  %v1595_v6 = vld [vmem:[%s2167_s1 + $0x1c] ss:$12 sps:$4 sm:$0xff]  }
  0x18   : > { %941 = vmatprep.subr.bf16.mxu1 %v1591_v2  ;;  %889 = vmatpush1.bf16.msra.mxu0 %v1593_v4  ;;  %v1597_v7 = vld [vmem:[%s2167_s1 + $0x19c] ss:$12 sps:$4 sm:$0xff]   ;;  %v1599_v8 = vld [vmem:[%s2167_s1 + $0x18] ss:$12 sps:$4 sm:$0xff]   ;;  %v1601_v10 = vld [vmem:[%s2167_s1 + $0x34] ss:$12 sps:$4 sm:$0xff]  }
  0x19   : > { %942 = vmatpush1.bf16.msra.mxu1 %v1594_v5  ;;  %890 = vmatprep.subr.bf16.mxu0 %v1595_v6  ;;  %v1600_v9 = vld [vmem:[%s2167_s1 + $0x198] ss:$12 sps:$4 sm:$0xff]   ;;  %v1603_v11 = vld [vmem:[%s2167_s1 + $0x1b4] ss:$12 sps:$4 sm:$0xff]   ;;  %v1605_v12 = vld [vmem:[%s2167_s1 + $0x30] ss:$12 sps:$4 sm:$0xff]  }
  0x1a   : > { %943 = vmatprep.subr.bf16.mxu1 %v1597_v7  ;;  %v1606_v13 = vld [vmem:[%s2167_s1 + $0x1b0] ss:$12 sps:$4 sm:$0xff]   ;;  %v1607_v14 = vld [vmem:[%s2167_s1 + $0x4c] ss:$12 sps:$4 sm:$0xff]   ;;  %v1611_v17 = vld [vmem:[%s2167_s1 + $0x48] ss:$12 sps:$4 sm:$0xff]  }
  0x1b   : > { %v1609_v15 = vld [vmem:[%s2167_s1 + $0x1cc] ss:$12 sps:$4 sm:$0xff]   ;;  %v1612_v18 = vld [vmem:[%s2167_s1 + $0x1c8] ss:$12 sps:$4 sm:$0xff]   ;;  %v1613_v19 = vld [vmem:[%s2167_s1 + $0x64] ss:$12 sps:$4 sm:$0xff]  }
  0x1c   : > { %891 = vmatpush1.bf16.msra.mxu0 %v1599_v8  ;;  %v1615_v20 = vld [vmem:[%s2167_s1 + $0x1e4] ss:$12 sps:$4 sm:$0xff]   ;;  %v1865_v21 = vshrl.u32 %v267_v16, 7  ;;  %v1617_v22 = vld [vmem:[%s2167_s1 + $0x60] ss:$12 sps:$4 sm:$0xff]   ;;  %vm1743_vm2 = vmmov 1  }
  0x1d   : > { %944 = vmatpush1.bf16.msra.mxu1 %v1600_v9  ;;  %892 = vmatprep.subr.bf16.mxu0 %v1601_v10  ;;  %v1618_v23 = vld [vmem:[%s2167_s1 + $0x1e0] ss:$12 sps:$4 sm:$0xff]   ;;  %v1619_v24 = vld [vmem:[%s2167_s1 + $0x7c] ss:$12 sps:$4 sm:$0xff]   ;;  %v1623_v27 = vld [vmem:[%s2167_s1 + $0x78] ss:$12 sps:$4 sm:$0xff]  }
  0x1e   : > { %945 = vmatprep.subr.bf16.mxu1 %v1603_v11  ;;  %v1621_v25 = vld [vmem:[%s2167_s1 + $0x1fc] ss:$12 sps:$4 sm:$0xff]   ;;  %v269_v26 = vadd.s32 8, %v1865_v21  ;;  %v1624_v28 = vld [vmem:[%s2167_s1 + $0x1f8] ss:$12 sps:$4 sm:$0xff]   ;;  %v1917_v38 = vld [vmem:[%s2170_s4 + $0x10] sm:$0xff] }
  0x1f   : > { %v1625_v29 = vld [vmem:[%s2167_s1 + $0x94] ss:$12 sps:$4 sm:$0xff]   ;;  %v1629_v32 = vld [vmem:[%s2167_s1 + $0x90] ss:$12 sps:$4 sm:$0xff]   ;;  %v1631_v34 = vld [vmem:[%s2167_s1 + $0xac] ss:$12 sps:$4 sm:$0xff]  }
  0x20   : > { %893 = vmatpush1.bf16.msra.mxu0 %v1605_v12  ;;  %v1627_v30 = vld [vmem:[%s2167_s1 + $0x214] ss:$12 sps:$4 sm:$0xff]   ;;  %v283_v31 = vand.u32 15, %v269_v26  ;;  %v1630_v33 = vld [vmem:[%s2167_s1 + $0x210] ss:$12 sps:$4 sm:$0xff]   ;;  %v1912_v37 = vld [vmem:[%s2170_s4 + $0x8] sm:$0xff] }
  0x21   : > { %946 = vmatpush1.bf16.msra.mxu1 %v1606_v13  ;;  %894 = vmatprep.subr.bf16.mxu0 %v1607_v14  ;;  %v1904_v35 = vld [vmem:[%s2170_s4] sm:$0xff]  ;;  %v1633_v36 = vld [vmem:[%s2167_s1 + $0x22c] ss:$12 sps:$4 sm:$0xff]   ;;  %v370_v40 = vrot.slane %v1912_v37, 1  ;;  %v372_v41 = vrot.slane %v1917_v38, 1  ;;  %v271_v55 = vadd.s32 24, %v1865_v21 }
  0x22   : > { %947 = vmatprep.subr.bf16.mxu1 %v1609_v15  ;;  %v369_v39 = vrot.slane %v1904_v35, 1  ;;  %v1924_v42 = vpack.c.bf16 %v1912_v37, %v1904_v35  ;;  %vm357_vm1 = vcmp.lt.s32.totalorder %v283_v31, 15  ;;  %v1635_v43 = vld [vmem:[%s2167_s1 + $0xa8] ss:$12 sps:$4 sm:$0xff]   ;;  %v1637_v45 = vld [vmem:[%s2167_s1 + $0xc4] ss:$12 sps:$4 sm:$0xff]  }
  0x23   : > { %v1636_v44 = vld [vmem:[%s2167_s1 + $0x228] ss:$12 sps:$4 sm:$0xff]   ;;  %v373_v47 = vsel %vm368_vm0, %v370_v40, %v372_v41  ;;  %v1640_v49 = vld [vmem:[%s2167_s1 + $0xc0] ss:$12 sps:$4 sm:$0xff]   ;;  %vm1947_vm3 = vmpackc.low %vm357_vm1, %vm1743_vm2  ;;  %v297_v61 = vand.u32 15, %v271_v55  ;;  %v276_v10 = vand.u32 15, %v1865_v21 }
  0x24   : > { %895 = vmatpush1.bf16.msra.mxu0 %v1611_v17  ;;  %920 = vmatprep.mubr.bf16.mxu0 %v1924_v42  ;;  %v371_v46 = vsel %vm368_vm0, %v369_v39, %v370_v40  ;;  %v1639_v48 = vld [vmem:[%s2167_s1 + $0xc8] ss:$12 sps:$4 sm:$0xff]   ;;  %v1644_v54 = vld [vmem:[%s2167_s1 + $0xe0] ss:$12 sps:$4 sm:$0xff]   ;;  %v1645_v56 = vld [vmem:[%s2167_s1 + $0xd8] ss:$12 sps:$4 sm:$0xff]  }
  0x25   : > { %948 = vmatpush1.bf16.msra.mxu1 %v1612_v18  ;;  %896 = vmatprep.subr.bf16.mxu0 %v1613_v19  ;;  %v1951_v51 = vpack.c.bf16 %v373_v47, %v371_v46  ;;  %v1641_v52 = vld [vmem:[%s2167_s1 + $0x8] ss:$12 sps:$4 sm:$0xff]   ;;  %v1646_v57 = vld [vmem:[%s2167_s1 + $0x20] ss:$12 sps:$4 sm:$0xff]   ;;  %v1649_v59 = vld [vmem:[%s2167_s1 + $0xf8] ss:$12 sps:$4 sm:$0xff]  }
  0x26   : > { %949 = vmatprep.subr.bf16.mxu1 %v1615_v20  ;;  %v1642_v53 = vld [vmem:[%s2167_s1 + $0xdc] ss:$12 sps:$4 sm:$0xff]   ;;  %v1647_v58 = vld [vmem:[%s2167_s1 + $0xf4] ss:$12 sps:$4 sm:$0xff]   ;;  %v1651_v62 = vld [vmem:[%s2167_s1 + $0x38] ss:$12 sps:$4 sm:$0xff]  }
  0x27   : > { %v1650_v60 = vld [vmem:[%s2167_s1 + $0xf0] ss:$12 sps:$4 sm:$0xff]   ;;  %v1652_v63 = vld [vmem:[%s2167_s1 + $0x10c] ss:$12 sps:$4 sm:$0xff]   ;;  %v1655_v1 = vld [vmem:[%s2167_s1 + $0x108] ss:$12 sps:$4 sm:$0xff]  }
  0x28   : > { %897 = vmatpush1.bf16.msra.mxu0 %v1617_v22  ;;  %v1654_v0 = vld [vmem:[%s2167_s1 + $0x110] ss:$12 sps:$4 sm:$0xff]   ;;  %vm359_vm4 = vcmp.lt.s32.totalorder %v297_v61, 15  ;;  %v1659_v6 = vld [vmem:[%s2167_s1 + $0x128] ss:$12 sps:$4 sm:$0xff]   ;;  %vm338_vm6 = vcmask 1040384  }
  0x29   : > { %950 = vmatpush1.bf16.msra.mxu1 %v1618_v23  ;;  %898 = vmatprep.subr.bf16.mxu0 %v1619_v24  ;;  %v1656_v2 = vld [vmem:[%s2167_s1 + $0x50] ss:$12 sps:$4 sm:$0xff]   ;;  %vm2010_vm5 = vmpackc.low %vm359_vm4, %vm1743_vm2  ;;  %v1660_v11 = vld [vmem:[%s2167_s1 + $0x120] ss:$12 sps:$4 sm:$0xff]   ;;  %v340_v19 = vrot.slane %v1904_v35, 7  ;;  %v342_v20 = vrot.slane %v1912_v37, 7 }
  0x2a   : > { %951 = vmatprep.subr.bf16.mxu1 %v1621_v25  ;;  %v1657_v5 = vld [vmem:[%s2167_s1 + $0x124] ss:$12 sps:$4 sm:$0xff]   ;;  %v2006_v7 = vld [vmem:[%s2170_s4 + $0x18] sm:$0xff]  ;;  %v1661_v13 = vld [vmem:[%s2167_s1 + $0x68] ss:$12 sps:$4 sm:$0xff]   ;;  %vm321_vm7 = vcmp.ge.s32.totalorder %v276_v10, 1 }
  0x2b   : > { %v374_v8 = vrot.slane %v2006_v7, 1  ;;  %v1662_v14 = vld [vmem:[%s2167_s1 + $0x13c] ss:$12 sps:$4 sm:$0xff]   ;;  %v1664_v17 = vld [vmem:[%s2167_s1 + $0x140] ss:$12 sps:$4 sm:$0xff]   ;;  %vm1430_vm8 = vmpackc.low %vm1743_vm2, %vm321_vm7  ;;  %v390_v40 = vpack.c.bf16 %v2006_v7, %v1917_v38 }
  0x2c   : > { %899 = vmatpush1.bf16.msra.mxu0 %v1623_v27  ;;  %v1665_v22 = vld [vmem:[%s2167_s1 + $0x138] ss:$12 sps:$4 sm:$0xff]   ;;  %v1666_v23 = vld [vmem:[%s2167_s1 + $0x80] ss:$12 sps:$4 sm:$0xff]   ;;  %v1670_v26 = vld [vmem:[%s2167_s1 + $0x150] ss:$12 sps:$4 sm:$0xff]  }
  0x2d   : > { %952 = vmatpush1.bf16.msra.mxu1 %v1624_v28  ;;  %900 = vmatprep.subr.bf16.mxu0 %v1625_v29  ;;  %v375_v15 = vsel %vm368_vm0, %v372_v41, %v374_v8  ;;  %v1667_v24 = vld [vmem:[%s2167_s1 + $0x154] ss:$12 sps:$4 sm:$0xff]   ;;  %v1669_v25 = vld [vmem:[%s2167_s1 + $0x158] ss:$12 sps:$4 sm:$0xff]   ;;  %v1674_v29 = vld [vmem:[%s2167_s1 + $0x170] ss:$12 sps:$4 sm:$0xff]  }
  0x2e   : > { %953 = vmatprep.subr.bf16.mxu1 %v1627_v30  ;;  %v1671_v27 = vld [vmem:[%s2167_s1 + $0x98] ss:$12 sps:$4 sm:$0xff]   ;;  %v1675_v30 = vld [vmem:[%s2167_s1 + $0x168] ss:$12 sps:$4 sm:$0xff]   ;;  %v1676_v31 = vld [vmem:[%s2167_s1 + $0xb0] ss:$12 sps:$4 sm:$0xff]  }
  0x2f   : > { %v1672_v28 = vld [vmem:[%s2167_s1 + $0x16c] ss:$12 sps:$4 sm:$0xff]   ;;  %v344_v41 = vrot.slane %v1917_v38, 7  ;;  %v1684_v50 = vld [vmem:[%s2167_s1 + $0x230] ss:$12 sps:$4 sm:$0xff]  }
  0x30   : > { %901 = vmatpush1.bf16.msra.mxu0 %v1629_v32  ;;  %v1679_v47 = vld [vmem:[%s2167_s1 + $0x1b8] ss:$12 sps:$4 sm:$0xff]  }
  0x31   : > { %954 = vmatpush1.bf16.msra.mxu1 %v1630_v33  ;;  %902 = vmatprep.subr.bf16.mxu0 %v1631_v34  ;;  %v343_v33 = vsel %vm338_vm6, %v340_v19, %v342_v20  ;;  %v1677_v34 = vld [vmem:[%s2167_s1 + $0x188] ss:$12 sps:$4 sm:$0xff]  }
  0x32   : > { %955 = vmatprep.subr.bf16.mxu1 %v1633_v36  ;;  %v270_v36 = vadd.s32 16, %v1865_v21 }
  0x34   : > { %903 = vmatpush1.bf16.msra.mxu0 %v1635_v43  ;;  %v1678_v43 = vld [vmem:[%s2167_s1 + $0x1a0] ss:$12 sps:$4 sm:$0xff]  }
  0x35   : > { %956 = vmatpush1.bf16.msra.mxu1 %v1636_v44  ;;  %904 = vmatprep.subr.bf16.mxu0 %v1637_v45  ;;  %v290_v44 = vand.u32 15, %v270_v36  ;;  %v345_v45 = vsel %vm338_vm6, %v342_v20, %v344_v41 }
  0x36   : > { %1486 = vmatprep.subr.bf16.mxu1 %v1639_v48 }
  0x37   : > { %vm323_vm9 = vcmp.ge.s32.totalorder %v290_v44, 1 }
  0x38   : > { %1438 = vmatmul.mubr.msk.bf16.vlgmr.msra.gmra.mrb[0].mxu1 %vm1947_vm3, %v1951_v51  ;;  %905 = vmatpush1.bf16.msra.mxu0 %v1640_v49  ;;  %vm1433_vm10 = vmpackc.low %vm1743_vm2, %vm323_vm9  ;;  %v1680_v49 = vld [vmem:[%s2167_s1 + $0x1d0] ss:$12 sps:$4 sm:$0xff]  }
  0x39   : > { %1487 = vmatpush3.bf16.msra.mxu1 %v1641_v52  ;;  %906 = vmatprep.subr.bf16.mxu0 %v1642_v53  ;;  %v1681_v52 = vld [vmem:[%s2167_s1 + $0x1e8] ss:$12 sps:$4 sm:$0xff]   ;;  %v1682_v53 = vld [vmem:[%s2167_s1 + $0x200] ss:$12 sps:$4 sm:$0xff]  }
  0x3a   : > { %1488 = vmatprep.subr.bf16.mxu1 %v1644_v54  ;;  %983 = vmatprep.mubr.bf16.mxu1 %v1742_v3  ;;  %v1744_v3 = vmov 0.0   ;;  %v1683_v54 = vld [vmem:[%s2167_s1 + $0x218] ss:$12 sps:$4 sm:$0xff]  }
  0x3b   : > { %v376_v4 = vrot.slane %v1744_v3, 1  ;;  %v339_v12 = vrot.slane %v1744_v3, 7 }
  0x3c   : > { %907 = vmatpush1.bf16.msra.mxu0 %v1645_v56 }
  0x3d   : > { %1489 = vmatpush3.bf16.msra.mxu1 %v1646_v57  ;;  %908 = vmatprep.subr.bf16.mxu0 %v1647_v58  ;;  %v377_v16 = vsel %vm368_vm0, %v374_v8, %v376_v4  ;;  %v341_v32 = vsel %vm338_vm6, %v339_v12, %v340_v19 }
  0x3e   : > { %1490 = vmatprep.subr.bf16.mxu1 %v1649_v59  ;;  %v2031_v18 = vpack.c.bf16 %v377_v16, %v375_v15  ;;  %v1431_v39 = vpack.c.bf16 %v343_v33, %v341_v32  ;;  %v1098_v32 = vld [vmem:[%s1796_s27 + $0x24] sm:$0xff] }
  0x40   : > { %909 = vmatpush1.bf16.msra.mxu0 %v1650_v60  ;;  %1441 = vmatmul.mubr.msk.bf16.gmra.mrb[4].mxu1 %vm2010_vm5, %v2031_v18 }
  0x41   : > { %1491 = vmatpush3.bf16.msra.mxu1 %v1651_v62  ;;  %910 = vmatprep.subr.bf16.mxu0 %v1652_v63  ;;  %v491_v62 = vsub.s32 0, %v1865_v21  ;;  %v2118_v63 = vld [vmem:[%s2168_s2] sm:$0x7] }
  0x42   : > { %1492 = vmatprep.subr.bf16.mxu1 %v1654_v0  ;;  %1026 = vmatprep.mubr.bf16.mxu1 %v1924_v42  ;;  %v346_v42 = vrot.slane %v2006_v7, 7  ;;  %v495_v0 = vsub.s32 1, %v1865_v21 }
  0x44   : > { %911 = vmatpush1.bf16.msra.mxu0 %v1655_v1  ;;  %v347_v46 = vsel %vm338_vm6, %v344_v41, %v346_v42  ;;  %v492_v1 = vrot.slane %v2118_v63, %v491_v62  ;;  %v496_v3 = vrot.slane %v2118_v63, %v495_v0 }
  0x45   : > { %1493 = vmatpush3.bf16.msra.mxu1 %v1656_v2  ;;  %912 = vmatprep.subr.bf16.mxu0 %v1657_v5  ;;  %v1434_v48 = vpack.c.bf16 %v347_v46, %v345_v45  ;;  %v1092_v2 = vld [vmem:[%s1796_s27] sm:$0xff]  ;;  %v1094_v5 = vld [vmem:[%s1796_s27 + $0xc] sm:$0xff] }
  0x46   : > { %1494 = vmatprep.subr.bf16.mxu1 %v1659_v6  ;;  %v1100_v9 = vunpack.c.l.bf16 %v1092_v2  ;;  %v1103_v19 = vunpack.c.l.bf16 %v1094_v5 }
  0x48   : > { %913 = vmatpush1.bf16.msra.mxu0 %v1660_v11 }
  0x49   : > { %1495 = vmatpush3.bf16.msra.mxu1 %v1661_v13  ;;  %914 = vmatprep.subr.bf16.mxu0 %v1662_v14  ;;  %v1101_v13 = vunpack.c.h.bf16 %v1092_v2 }
  0x4a   : > { %1496 = vmatprep.subr.bf16.mxu1 %v1664_v17 }
  0x4c   : > { %915 = vmatpush1.bf16.msra.mxu0 %v1665_v22 }
  0x4d   : > { %1497 = vmatpush3.bf16.msra.mxu1 %v1666_v23  ;;  %916 = vmatprep.subr.bf16.mxu0 %v1667_v24 }
  0x4e   : > { %1498 = vmatprep.subr.bf16.mxu1 %v1669_v25  ;;  %v1104_v25 = vunpack.c.h.bf16 %v1094_v5 }
  0x50   : > { %917 = vmatpush1.bf16.msra.mxu0 %v1670_v26 }
  0x51   : > { %1499 = vmatpush3.bf16.msra.mxu1 %v1671_v27  ;;  %918 = vmatprep.subr.bf16.mxu0 %v1672_v28 }
  0x52   : > { %1500 = vmatprep.subr.bf16.mxu1 %v1674_v29  ;;  %v1096_v29 = vld [vmem:[%s1796_s27 + $0x18] sm:$0xff] }
  0x53   : > { %v1106_v41 = vunpack.c.l.bf16 %v1096_v29  ;;  %v1107_v46 = vunpack.c.h.bf16 %v1096_v29 }
  0x54   : > { %919 = vmatpush1.bf16.msra.mxu0 %v1675_v30 }
  0x55   : > { %1501 = vmatpush3.bf16.msra.mxu1 %v1676_v31 }
  0x56   : > { %1524 = vmatprep.subr.bf16.mxu1 %v1677_v34 }
  0x57   : > { %1432 = vmatmul.mubr.msk.bf16.vlgmr.msra.gmra.mrb[0].mxu0 %vm1430_vm8, %v1431_v39 }
  0x58   : > { %1444 = vmatmul.mubr.msk.bf16.vlgmr.msra.gmra.mrb[8].mxu1 %vm1430_vm8, %v1431_v39  ;;  %930 = vmatprep.mubr.bf16.mxu0 %v390_v40 }
  0x59   : > { %1525 = vmatpush3.bf16.msra.mxu1 %v1677_v34  ;;  %1034 = vmatprep.mubr.bf16.mxu1 %v390_v40 }
  0x5a   : > { %1526 = vmatprep.subr.bf16.mxu1 %v1678_v43 }
  0x5d   : > { %1527 = vmatpush3.bf16.msra.mxu1 %v1678_v43 }
  0x5e   : > { %1528 = vmatprep.subr.bf16.mxu1 %v1679_v47 }
  0x5f   : > { %1435 = vmatmul.mubr.msk.bf16.gmra.mrb[4].mxu0 %vm1433_vm10, %v1434_v48 }
  0x60   : > { %1447 = vmatmul.mubr.msk.bf16.gmra.mrb[12].mxu1 %vm1433_vm10, %v1434_v48 }
  0x61   : > { %1529 = vmatpush3.bf16.msra.mxu1 %v1679_v47  ;;  %1540 = vmatprep.mubr.msk.bf16.mxu1 %vm1947_vm3, %v1951_v51  ;;  %v1109_v47 = vunpack.c.l.bf16 %v1098_v32 }
  0x62   : > { %1530 = vmatprep.subr.bf16.mxu1 %v1680_v49 }
  0x65   : > { %1531 = vmatpush3.bf16.msra.mxu1 %v1680_v49 }
  0x66   : > { %1532 = vmatprep.subr.bf16.mxu1 %v1681_v52 }
  0x69   : > { %1533 = vmatpush3.bf16.msra.mxu1 %v1681_v52 }
  0x6a   : > { %1534 = vmatprep.subr.bf16.mxu1 %v1682_v53 }
  0x6d   : > { %1535 = vmatpush3.bf16.msra.mxu1 %v1682_v53 }
  0x6e   : > { %1536 = vmatprep.subr.bf16.mxu1 %v1683_v54 }
  0x71   : > { %1537 = vmatpush3.bf16.msra.mxu1 %v1683_v54 }
  0x72   : > { %1538 = vmatprep.subr.bf16.mxu1 %v1684_v50 }
  0x75   : > { %1539 = vmatpush3.bf16.msra.mxu1 %v1684_v50 }
  0x78   : > { %1541 = vmatmul.mubr.msk.bf16.vlgmr.msra.gmra.mrb[16].mxu1 %vm2010_vm5, %v2031_v18 }
 0x10b   : > { %v975_v51 = vpop.f32.mrb[0].mxu1 }
 0x10c   : > { %v977_v55 = vpop.f32.mrb[1].mxu1 }
 0x10d   : > { %v979_v56 = vpop.f32.mrb[2].mxu1 }
 0x10e   : > { %v981_v57 = vpop.f32.mrb[3].mxu1 }
 0x113   : > { %v985_v58 = vpop.f32.mrb[4].mxu1 }
 0x114   : > { %v987_v59 = vpop.f32.mrb[5].mxu1 }
 0x115   : > { %v2110_v60 = vpop.f32.mrb[6].mxu1 }
 0x116   : > { %v2112_v61 = vpop.f32.mrb[7].mxu1 }
 0x12a   : > { %v922_v4 = vpop.f32.mrb[0].mxu0 }
 0x12b   : > { %v1502_v6 = vpop.f32.mrb[8].mxu1  ;;  %v923_v8 = vadd.f32 %v922_v4, %v492_v1  ;;  %v924_v10 = vpop.f32.mrb[1].mxu0 }
 0x12c   : > { %v1503_v11 = vpop.f32.mrb[9].mxu1  ;;  %v925_v12 = vadd.f32 %v924_v10, %v496_v3  ;;  %v926_v14 = vpop.f32.mrb[2].mxu0 }
 0x12d   : > { %v2125_v15 = vadd.f32 %v1503_v11, %v1502_v6  ;;  %v1505_v16 = vpop.f32.mrb[10].mxu1  ;;  %v976_v17 = vadd.f32 %v975_v51, %v923_v8  ;;  %v927_v18 = vadd.f32 %v926_v14, %v492_v1  ;;  %v928_v20 = vpop.f32.mrb[3].mxu0 }
 0x12e   : > { %v1506_v22 = vpop.f32.mrb[11].mxu1  ;;  %v978_v23 = vadd.f32 %v977_v55, %v925_v12  ;;  %v929_v24 = vadd.f32 %v928_v20, %v496_v3 }
 0x12f   : > { %v2127_v26 = vadd.f32 %v1506_v22, %v1505_v16  ;;  %v1112_v27 = vadd.f32 %v1100_v9, %v976_v17  ;;  %v980_v28 = vadd.f32 %v979_v56, %v927_v18 }
 0x130   : > { %v1140_v30 = vadd.f32 %v1101_v13, %v978_v23  ;;  %v982_v31 = vadd.f32 %v981_v57, %v929_v24  ;;  %v1110_v57 = vunpack.c.h.bf16 %v1098_v32 }
 0x131   : > { %v1454_v33 = vmul.f32 -1.442695, %v1112_v27  ;;  %v1113_v34 = vadd.f32 %v1103_v19, %v980_v28 }
 0x132   : > { %v1458_v36 = vmul.f32 -1.442695, %v1140_v30  ;;  %v1141_v39 = vadd.f32 %v1104_v25, %v982_v31  ;;  %v932_v40 = vpop.f32.mrb[4].mxu0 }
 0x133   : > { %v1508_v42 = vpop.f32.mrb[12].mxu1  ;;  %v1455_v43 = vmul.f32 -1.442695, %v1113_v34  ;;  %v933_v44 = vadd.f32 %v932_v40, %v492_v1  ;;  %v934_v45 = vpop.f32.mrb[5].mxu0 }
 0x134   : > { %v1509_v48 = vpop.f32.mrb[13].mxu1  ;;  %1685 = vpow2.f32 %v1458_v36  ;;  %v1459_v49 = vmul.f32 -1.442695, %v1141_v39  ;;  %v935_v52 = vadd.f32 %v934_v45, %v496_v3  ;;  %v936_v53 = vpop.f32.mrb[6].mxu0  ;;  %v1099_v39 = vld [vmem:[%s1796_s27 + $0x14] ss:$24 sps:$4 sm:$0xff]  }
 0x135   : > { %v1510_v54 = vadd.f32 %v1509_v48, %v1508_v42  ;;  %v1511_v50 = vpop.f32.mrb[14].mxu1  ;;  %1687 = vpow2.f32 %v1454_v33  ;;  %v986_v51 = vadd.f32 %v985_v58, %v933_v44  ;;  %v937_v55 = vadd.f32 %v936_v53, %v492_v1  ;;  %v938_v56 = vpop.f32.mrb[7].mxu0 }
 0x136   : > { %v1512_v62 = vpop.f32.mrb[15].mxu1  ;;  %1689 = vpow2.f32 %v1459_v49  ;;  %v988_v0 = vadd.f32 %v987_v59, %v935_v52  ;;  %v939_v2 = vadd.f32 %v938_v56, %v496_v3  ;;  %v1105_v49 = vunpack.c.l.bf16 %v1099_v39 }
 0x137   : > { %v1513_v4 = vadd.f32 %v1512_v62, %v1511_v50  ;;  %1691 = vpow2.f32 %v1455_v43  ;;  %v1114_v5 = vadd.f32 %v1106_v41, %v986_v51  ;;  %v990_v6 = vadd.f32 %v2110_v60, %v937_v55 }
 0x138   : > { %v1142_v8 = vadd.f32 %v1107_v46, %v988_v0  ;;  %v992_v9 = vadd.f32 %v2112_v61, %v939_v2  ;;  %v499_v60 = vsub.s32 2, %v1865_v21  ;;  %v1097_v21 = vld [vmem:[%s1796_s27 + $0x8] ss:$24 sps:$4 sm:$0xff]   ;;  %v1111_v0 = vunpack.c.h.bf16 %v1099_v39 }
 0x139   : > { %v1456_v10 = vmul.f32 -1.442695, %v1114_v5  ;;  %v1115_v11 = vadd.f32 %v1109_v47, %v990_v6  ;;  %v1102_v41 = vunpack.c.l.bf16 %v1097_v21  ;;  %v1108_v51 = vunpack.c.h.bf16 %v1097_v21 }
 0x13a   : > { %v1460_v12 = vmul.f32 -1.442695, %v1142_v8  ;;  %v1143_v13 = vadd.f32 %v1110_v57, %v992_v9  ;;  %v500_v22 = vrot.slane %v2118_v63, %v499_v60 }
 0x13b   : > { %1693 = vpow2.f32 %v1456_v10  ;;  %v1457_v58 = vmul.f32 -1.442695, %v1115_v11 }
 0x13c   : > { %1695 = vpow2.f32 %v1460_v12  ;;  %v1461_v1 = vmul.f32 -1.442695, %v1143_v13  ;;  %v1037_v27 = vadd.f32 %v1510_v54, %v500_v22  ;;  %v1040_v31 = vadd.f32 %v1513_v4, %v500_v22 }
 0x13d   : > { %1697 = vpow2.f32 %v1457_v58  ;;  %v1029_v34 = vadd.f32 %v2125_v15, %v500_v22  ;;  %v1032_v43 = vadd.f32 %v2127_v26, %v500_v22 }
 0x13e   : > { %v1686_v14 = vpop.eup %1685  ;;  %1699 = vpow2.f32 %v1461_v1 }
 0x13f   : > { %v1688_v59 = vpop.eup %1687  ;;  %v1156_v3 = vadd.f32 1.0, %v1686_v14 }
 0x140   : > { %v1690_v16 = vpop.eup %1689  ;;  %v1128_v19 = vadd.f32 1.0, %v1688_v59 }
 0x141   : > { %v1692_v17 = vpop.eup %1691  ;;  %v1157_v18 = vadd.f32 1.0, %v1690_v16  ;;  %1701 = vrcp.f32 %v1156_v3 }
 0x142   : > { %v1129_v61 = vadd.f32 1.0, %v1692_v17 }
 0x143   : > { %1703 = vrcp.f32 %v1157_v18 }
 0x144   : > { %1705 = vrcp.f32 %v1128_v19 }
 0x145   : > { %v1694_v20 = vpop.eup %1693  ;;  %1707 = vrcp.f32 %v1129_v61 }
 0x146   : > { %v1696_v23 = vpop.eup %1695  ;;  %v1130_v29 = vadd.f32 1.0, %v1694_v20 }
 0x147   : > { %v1698_v24 = vpop.eup %1697  ;;  %v1158_v25 = vadd.f32 1.0, %v1696_v23 }
 0x148   : > { %v1700_v28 = vpop.eup %1699  ;;  %v1131_v32 = vadd.f32 1.0, %v1698_v24 }
 0x149   : > { %1709 = vrcp.f32 %v1158_v25  ;;  %v1159_v30 = vadd.f32 1.0, %v1700_v28 }
 0x14b   : > { %v1542_v33 = vpop.f32.mrb[16].mxu1  ;;  %1711 = vrcp.f32 %v1159_v30  ;;  %v1702_v44 = vpop.eup %1701 }
 0x14c   : > { %v1086_v36 = vadd.f32 %v1542_v33, %v1037_v27  ;;  %v1077_v63 = vpop.f32.mrb[17].mxu1  ;;  %1713 = vrcp.f32 %v1130_v29 }
 0x14d   : > { %v1078_v40 = vadd.f32 %v1077_v63, %v1029_v34  ;;  %v1543_v42 = vpop.f32.mrb[18].mxu1  ;;  %1715 = vrcp.f32 %v1131_v32  ;;  %v1704_v52 = vpop.eup %1703 }
 0x14e   : > { %v1089_v45 = vadd.f32 %v1543_v42, %v1040_v31  ;;  %v1080_v46 = vpop.f32.mrb[19].mxu1  ;;  %v1706_v53 = vpop.eup %1705 }
 0x14f   : > { %v1168_v47 = vmul.f32 %v1702_v44, %v1078_v40  ;;  %v1081_v48 = vadd.f32 %v1080_v46, %v1032_v43  ;;  %v1708_v50 = vpop.eup %1707  ;;  %v1192_v62 = vsub.f32 1.0, %v1706_v53  ;;  %v1188_v6 = vmul.f32 %v1706_v53, %v1904_v35 }
 0x150   : > { %v1193_v9 = vsub.f32 1.0, %v1708_v50  ;;  %v1189_v1 = vmul.f32 %v1708_v50, %v1912_v37 }
 0x151   : > { %v1172_v15 = vadd.f32 %v1168_v47, %v1102_v41  ;;  %v1169_v54 = vmul.f32 %v1704_v52, %v1081_v48 }
 0x153   : > { %vm1176_vm11 = vcmp.gt.f32.partialorder %v1172_v15, 0.0  ;;  %v1180_v55 = vmul.f32 0.2, %v1172_v15  ;;  %v1173_v56 = vadd.f32 %v1169_v54, %v1105_v49  ;;  %v1710_v57 = vpop.eup %1709 }
 0x154   : > { %v1170_v26 = vmul.f32 %v1710_v57, %v1086_v36 }
 0x155   : > { %v1184_v2 = vsel %vm1176_vm11, %v1172_v15, %v1180_v55  ;;  %vm1177_vm12 = vcmp.gt.f32.partialorder %v1173_v56, 0.0  ;;  %v1181_v4 = vmul.f32 0.2, %v1173_v56  ;;  %v1712_v5 = vpop.eup %1711 }
 0x156   : > { %v1196_v8 = vmul.f32 %v1192_v62, %v1184_v2  ;;  %v1714_v10 = vpop.eup %1713  ;;  %v1174_v11 = vadd.f32 %v1170_v26, %v1108_v51  ;;  %v1171_v12 = vmul.f32 %v1712_v5, %v1089_v45 }
 0x157   : > { %v1185_v13 = vsel %vm1177_vm12, %v1173_v56, %v1181_v4  ;;  %v1716_v59 = vpop.eup %1715  ;;  %v1194_v17 = vsub.f32 1.0, %v1714_v10  ;;  %v1190_v19 = vmul.f32 %v1714_v10, %v1917_v38 }
 0x158   : > { %v1200_v58 = vadd.f32 %v1196_v8, %v1188_v6  ;;  %v1197_v14 = vmul.f32 %v1193_v9, %v1185_v13  ;;  %vm1178_vm13 = vcmp.gt.f32.partialorder %v1174_v11, 0.0  ;;  %v1182_v3 = vmul.f32 0.2, %v1174_v11 }
 0x159   : > { %v1175_v16 = vadd.f32 %v1171_v12, %v1111_v0  ;;  %v1195_v37 = vsub.f32 1.0, %v1716_v59  ;;  %v1191_v24 = vmul.f32 %v1716_v59, %v2006_v7 }
 0x15a   : > { %1204 = vst [vmem:[%s2170_s4] sm:$0xff] %v1200_v58  ;;  %v1201_v35 = vadd.f32 %v1197_v14, %v1189_v1  ;;  %v1186_v18 = vsel %vm1178_vm13, %v1174_v11, %v1182_v3 }
 0x15b   : > { %vm1179_vm14 = vcmp.gt.f32.partialorder %v1175_v16, 0.0  ;;  %v1183_v60 = vmul.f32 0.2, %v1175_v16  ;;  %v1198_v61 = vmul.f32 %v1194_v17, %v1186_v18 }
 0x15c   : > { %1205 = vst [vmem:[%s2170_s4 + $0x8] sm:$0xff] %v1201_v35  ;;  %v1478_v20 = vpack.c.bf16 %v1201_v35, %v1200_v58 }
 0x15d   : > { %v1187_v22 = vsel %vm1179_vm14, %v1175_v16, %v1183_v60  ;;  %v1202_v23 = vadd.f32 %v1198_v61, %v1190_v19 }
 0x15e   : > { %v1199_v25 = vmul.f32 %v1195_v37, %v1187_v22  ;;  %1479 = vst [vmem:[%s1791_s24] sm:$0xff] %v1478_v20  }
 0x15f   : > { %1206 = vst [vmem:[%s2170_s4 + $0x10] sm:$0xff] %v1202_v23 }
 0x160   : > { %v1203_v27 = vadd.f32 %v1199_v25, %v1191_v24 }
 0x162   : > { %1207 = vst [vmem:[%s2170_s4 + $0x18] sm:$0xff] %v1203_v27  ;;  %v1483_v38 = vpack.c.bf16 %v1203_v27, %v1202_v23 }
 0x164   : > { %1485 = vst [vmem:[%s1791_s24 + $0x8] sm:$0xff] %v1483_v38  }
 0x165 PF: > { %s15_s17 = sadd.s32 1, %s1739_s17   ;;  %s2175_s15 = smov %s1735_s16 }
 0x166   : > { %p12_p6 = scmp.ge.s32.totalorder %s15_s17, 10   ;;  %s2176_s16 = smov %s2178_s18 }
 0x168   :  { %14 = sbr.rel (!%p12_p6) target bundleno = 2 (0x2), region = 78 }

// kernel: _lambda_.7
= control target key start
LH: loop header
LB: loop body
LE: loop exit
PB: predicated region body
PF: predicated region fallthrough
CT: control target
= control target key end

     0   :  { %10 = vsyncpa [#allocation3], 0  ;;  %s2094_s0 = inlined_call_operand.vmem [shape: bf16[8,16,384], index: 0, kind: input, shape index: {}]   ;;  %s2095_s1 = inlined_call_operand.vmem [shape: bf16[384,384], index: 1, kind: input, shape index: {}]   ;;  %s2096_s2 = inlined_call_operand.vmem [shape: f32[1,384], index: 2, kind: input, shape index: {}]   ;;  %s2097_s3 = inlined_call_operand.hbm [shape: bf16[8,16,128], index: 3, kind: output, shape index: {0}]   ;;  %s2098_s4 = inlined_call_operand.vmem [shape: f32[16,128], index: 4, kind: output, shape index: {1}]  }
   0x1   :  { %12 = vsyncpa [#allocation3 + $0x1], 0  ;;  %s1638_s15 = smov 0   ;;  %s1640_s16 = smov 0  }
   0x2   :  { %s1642_s17 = smov 0   ;;  %s1644_s18 = smov 0  }
   0x3   :  { %s1646_s19 = smov 0   ;;  %s1648_s20 = smov 0  }
   0x4 LB: > { %s1180_s21 = sadd.s32 4294967295, %s1604_s20   ;;  %s1181_s22 = sadd.s32 4294967294, %s1604_s20   ;;  %s1604_s20 = sphi %s1648_s20, %s18_s20   ;;  %s1600_s19 = sphi %s1646_s19, %s2113_s19   ;;  %s1596_s18 = sphi %s1644_s18, %s2112_s18   ;;  %s1592_s17 = sphi %s1642_s17, %s2111_s17   ;;  %s1588_s16 = sphi %s1640_s16, %s2110_s16   ;;  %s1584_s15 = sphi %s1638_s15, %s2109_s15  }
   0x5   : > { %s27_s23 = sadd.s32 1, %s1600_s19  ;;  %s109_s24 = sadd.s32 1, %s1592_s17 }
   0x6   : > { %p28_p0 = scmp.ge.s32.totalorder %s27_s23, 8  ;;  %p119_p1 = scmp.ne.s32.totalorder %s1592_s17, %s1588_s16 }
   0x7   : > { %p120_p2 = scmp.eq.s32.totalorder %s1180_s21, 7  ;;  %p125_p3 = scmp.ne.s32.totalorder %s1588_s16, %s1584_s15 }
   0x8   : > { %s2115_s23 = smov (%p28_p0, %s27_s23), 0  ;;  %p126_p5 = scmp.eq.s32.totalorder %s1181_s22, 7 }
   0x9   : > { %p1678_p4 = por %p120_p2, %p119_p1  ;;  %s104_s26 = ssub.s32 %s1600_s19, %s2115_s23 }
   0xa   : > { %p1184_p6 = scmp.ge.s32.totalorder %s1604_s20, 1  ;;  %p107_p7 = scmp.eq.s32.totalorder %s104_s26, 0 }
   0xb   : > { %p1685_p8 = por %p126_p5, %p125_p3  ;;  %p190_p9 = scmp.lt.s32.totalorder %s1604_s20, 9 }
   0xc   : > { %s1691_s28 = scalar_select %p107_p7, %s1592_s17, %s109_s24  }
   0xd   : > { %p191_p10 = pnand %p1184_p6, %p190_p9 }
   0xe   : > { %s216_s29 = sand.u32 (!%p191_p10), 1, %s1588_s16   ;;  %p227_p11 = scmp.lt.s32.totalorder (!%p191_p10), %s1596_s18, 7 }
   0xf   : > { %194 = sbr.rel (%p191_p10) target bundleno = 400 (0x190), region = 32  ;;  %s1697_s30 = sshll.u32 (!%p191_p10), %s216_s29, 3 }
  0x10   : > { %s218_s10 = scalar_lea.vmem (!%p191_p10), [#allocation2], %s1697_s30  ;;  %p1187_p12 = scmp.ne.s32.totalorder (!%p191_p10), %s1596_s18, 0 }
  0x16   : > { %s228_s5 = scalar_select %p227_p11, %s1596_s18, 7 }
  0x17   : > { %248 = sbr.rel (%p1187_p12) target bundleno = 30 (0x1e), region = 36  ;;  %v1606_v0 = vmov (!%p1187_p12), 0.0  }
  0x18   : > { %s1352_s6 = smul.u32 24, %s228_s5  ;;  %249 = vst [vmem:[%s2098_s4] sm:$0xff] (!%p1187_p12), %v1606_v0  ;;  %250 = vst [vmem:[%s2098_s4 + $0x8] sm:$0xff] (!%p1187_p12), %v1606_v0 }
  0x1a   : > { %s1703_s9 = scalar_lea.vmem %s2094_s0, %s1352_s6 }
  0x1e PF: > { %v1414_v1 = vld [vmem:[%s2095_s1 + $0x4] ss:$12 sps:$4 sm:$0xff]   ;;  %v1416_v2 = vld [vmem:[%s2095_s1] ss:$12 sps:$4 sm:$0xff]   ;;  %v1417_v3 = vld [vmem:[%s2095_s1 + $0x1c] ss:$12 sps:$4 sm:$0xff]   ;;  %v253_v20 = vlaneseq }
  0x1f   : > { %815 = vmatprep.subr.bf16.mxu0 %v1414_v1  ;;  %v1419_v4 = vld [vmem:[%s2095_s1 + $0x18] ss:$12 sps:$4 sm:$0xff]   ;;  %v1420_v5 = vld [vmem:[%s2095_s1 + $0x34] ss:$12 sps:$4 sm:$0xff]   ;;  %v1422_v6 = vld [vmem:[%s2095_s1 + $0x30] ss:$12 sps:$4 sm:$0xff]  }
  0x20   : > { %816 = vmatpush1.bf16.msra.mxu0 %v1416_v2  ;;  %v1423_v7 = vld [vmem:[%s2095_s1 + $0x4c] ss:$12 sps:$4 sm:$0xff]   ;;  %v1425_v8 = vld [vmem:[%s2095_s1 + $0x48] ss:$12 sps:$4 sm:$0xff]   ;;  %v1426_v9 = vld [vmem:[%s2095_s1 + $0x64] ss:$12 sps:$4 sm:$0xff]  }
  0x21   : > { %817 = vmatprep.subr.bf16.mxu0 %v1417_v3  ;;  %v1440_v10 = vld [vmem:[%s2095_s1 + $0xc8] ss:$12 sps:$4 sm:$0xff]   ;;  %v1428_v12 = vld [vmem:[%s2095_s1 + $0x60] ss:$12 sps:$4 sm:$0xff]   ;;  %v1431_v16 = vld [vmem:[%s2095_s1 + $0x78] ss:$12 sps:$4 sm:$0xff]  }
  0x22   : > { %v1442_v11 = vld [vmem:[%s2095_s1 + $0x8] ss:$12 sps:$4 sm:$0xff]   ;;  %1293 = vmatprep.subr.bf16.mxu1 %v1440_v10  ;;  %v1445_v13 = vld [vmem:[%s2095_s1 + $0xe0] ss:$12 sps:$4 sm:$0xff]   ;;  %v1450_v18 = vld [vmem:[%s2095_s1 + $0xf8] ss:$12 sps:$4 sm:$0xff]  }
  0x23   : > { %1294 = vmatpush3.bf16.msra.mxu1 %v1442_v11  ;;  %v1429_v14 = vld [vmem:[%s2095_s1 + $0x7c] ss:$12 sps:$4 sm:$0xff]   ;;  %v1447_v15 = vld [vmem:[%s2095_s1 + $0x20] ss:$12 sps:$4 sm:$0xff]   ;;  %v1452_v19 = vld [vmem:[%s2095_s1 + $0x38] ss:$12 sps:$4 sm:$0xff]  }
  0x24   : > { %818 = vmatpush1.bf16.msra.mxu0 %v1419_v4  ;;  %1295 = vmatprep.subr.bf16.mxu1 %v1445_v13  ;;  %v1432_v17 = vld [vmem:[%s2095_s1 + $0x94] ss:$12 sps:$4 sm:$0xff]   ;;  %v1434_v21 = vld [vmem:[%s2095_s1 + $0x90] ss:$12 sps:$4 sm:$0xff]   ;;  %v1435_v24 = vld [vmem:[%s2095_s1 + $0xac] ss:$12 sps:$4 sm:$0xff]  }
  0x25   : > { %819 = vmatprep.subr.bf16.mxu0 %v1420_v5  ;;  %v1455_v22 = vld [vmem:[%s2095_s1 + $0x110] ss:$12 sps:$4 sm:$0xff]   ;;  %v1782_v25 = vshrl.u32 %v253_v20, 7  ;;  %v1460_v26 = vld [vmem:[%s2095_s1 + $0x128] ss:$12 sps:$4 sm:$0xff]   ;;  %v1831_v42 = vld [vmem:[%s2098_s4] sm:$0xff] }
  0x26   : > { %v1457_v23 = vld [vmem:[%s2095_s1 + $0x50] ss:$12 sps:$4 sm:$0xff]   ;;  %v1437_v27 = vld [vmem:[%s2095_s1 + $0xa8] ss:$12 sps:$4 sm:$0xff]   ;;  %v1465_v30 = vld [vmem:[%s2095_s1 + $0x140] ss:$12 sps:$4 sm:$0xff]  }
  0x27   : > { %1296 = vmatpush3.bf16.msra.mxu1 %v1447_v15  ;;  %v1462_v28 = vld [vmem:[%s2095_s1 + $0x68] ss:$12 sps:$4 sm:$0xff]   ;;  %v1438_v29 = vld [vmem:[%s2095_s1 + $0xc4] ss:$12 sps:$4 sm:$0xff]   ;;  %v1441_v31 = vld [vmem:[%s2095_s1 + $0xc0] ss:$12 sps:$4 sm:$0xff]  }
  0x28   : > { %820 = vmatpush1.bf16.msra.mxu0 %v1422_v6  ;;  %1297 = vmatprep.subr.bf16.mxu1 %v1450_v18  ;;  %v1803_v32 = vadd.s32 8, %v1782_v25  ;;  %v1467_v33 = vld [vmem:[%s2095_s1 + $0x80] ss:$12 sps:$4 sm:$0xff]   ;;  %v1443_v34 = vld [vmem:[%s2095_s1 + $0xdc] ss:$12 sps:$4 sm:$0xff]   ;;  %v260_v38 = vand.u32 7, %v1782_v25 }
  0x29   : > { %821 = vmatprep.subr.bf16.mxu0 %v1423_v7  ;;  %v1470_v35 = vld [vmem:[%s2095_s1 + $0x158] ss:$12 sps:$4 sm:$0xff]   ;;  %v1448_v37 = vld [vmem:[%s2095_s1 + $0xf4] ss:$12 sps:$4 sm:$0xff]   ;;  %v1475_v41 = vld [vmem:[%s2095_s1 + $0x170] ss:$12 sps:$4 sm:$0xff]  }
  0x2a   : > { %v1446_v36 = vld [vmem:[%s2095_s1 + $0xd8] ss:$12 sps:$4 sm:$0xff]   ;;  %v267_v39 = vand.u32 7, %v1803_v32  ;;  %v1836_v43 = vld [vmem:[%s2098_s4 + $0x8] sm:$0xff]  ;;  %vm290_vm0 = vcmask 1040384   ;;  %v1607_v44 = vmov 0.0  }
  0x2b   : > { %1298 = vmatpush3.bf16.msra.mxu1 %v1452_v19  ;;  %v1472_v40 = vld [vmem:[%s2095_s1 + $0x98] ss:$12 sps:$4 sm:$0xff]   ;;  %v291_v45 = vrot.slane %v1607_v44, 7  ;;  %v1451_v46 = vld [vmem:[%s2095_s1 + $0xf0] ss:$12 sps:$4 sm:$0xff]   ;;  %v317_v47 = vpack.c.bf16 %v1836_v43, %v1831_v42  ;;  %vm1846_vm1 = vcmp.ge.s32.totalorder %v260_v38, 1 }
  0x2c   : > { %822 = vmatpush1.bf16.msra.mxu0 %v1425_v8  ;;  %1299 = vmatprep.subr.bf16.mxu1 %v1455_v22  ;;  %vm1852_vm2 = vcmp.ge.s32.totalorder %v267_v39, 1  ;;  %v1477_v50 = vld [vmem:[%s2095_s1 + $0xb0] ss:$12 sps:$4 sm:$0xff]   ;;  %v292_v51 = vrot.slane %v1831_v42, 7  ;;  %v294_v52 = vrot.slane %v1836_v43, 7  ;;  %vm1608_vm4 = vmmov 0  }
  0x2d   : > { %823 = vmatprep.subr.bf16.mxu0 %v1426_v9  ;;  %v1453_v53 = vld [vmem:[%s2095_s1 + $0x10c] ss:$12 sps:$4 sm:$0xff]   ;;  %v1456_v54 = vld [vmem:[%s2095_s1 + $0x108] ss:$12 sps:$4 sm:$0xff]   ;;  %847 = vmatprep.mubr.bf16.mxu0 %v317_v47  ;;  %vm1260_vm3 = vmpackc.low %vm1852_vm2, %vm1846_vm1  ;;  %v310_v11 = vrot.slane %v1607_v44, 1  ;;  %v308_v13 = vrot.slane %v1836_v43, 1 }
  0x2e   : > { %933 = vmatprep.mubr.bf16.mxu1 %v317_v47  ;;  %v293_v55 = vsel %vm290_vm0, %v291_v45, %v292_v51  ;;  %v295_v56 = vsel %vm290_vm0, %v292_v51, %v294_v52  ;;  %v1481_v58 = vld [vmem:[%s2095_s1 + $0x188] ss:$12 sps:$4 sm:$0xff]   ;;  %v1458_v59 = vld [vmem:[%s2095_s1 + $0x124] ss:$12 sps:$4 sm:$0xff]   ;;  %v1461_v60 = vld [vmem:[%s2095_s1 + $0x120] ss:$12 sps:$4 sm:$0xff]  }
  0x2f   : > { %1300 = vmatpush3.bf16.msra.mxu1 %v1457_v23  ;;  %v1261_v57 = vpack.c.bf16 %v295_v56, %v293_v55  ;;  %v1485_v61 = vld [vmem:[%s2095_s1 + $0x1a0] ss:$12 sps:$4 sm:$0xff]   ;;  %v1463_v62 = vld [vmem:[%s2095_s1 + $0x13c] ss:$12 sps:$4 sm:$0xff]   ;;  %v1466_v63 = vld [vmem:[%s2095_s1 + $0x138] ss:$12 sps:$4 sm:$0xff]  }
  0x30   : > { %824 = vmatpush1.bf16.msra.mxu0 %v1428_v12  ;;  %1301 = vmatprep.subr.bf16.mxu1 %v1460_v26  ;;  %v1489_v0 = vld [vmem:[%s2095_s1 + $0x1b8] ss:$12 sps:$4 sm:$0xff]   ;;  %v1468_v1 = vld [vmem:[%s2095_s1 + $0x154] ss:$12 sps:$4 sm:$0xff]   ;;  %v1471_v2 = vld [vmem:[%s2095_s1 + $0x150] ss:$12 sps:$4 sm:$0xff]  }
  0x31   : > { %825 = vmatprep.subr.bf16.mxu0 %v1429_v14  ;;  %v1493_v3 = vld [vmem:[%s2095_s1 + $0x1d0] ss:$12 sps:$4 sm:$0xff]   ;;  %v1473_v4 = vld [vmem:[%s2095_s1 + $0x16c] ss:$12 sps:$4 sm:$0xff]   ;;  %v1476_v5 = vld [vmem:[%s2095_s1 + $0x168] ss:$12 sps:$4 sm:$0xff]  }
  0x32   : > { %v1497_v6 = vld [vmem:[%s2095_s1 + $0x1e8] ss:$12 sps:$4 sm:$0xff]   ;;  %v1480_v7 = vld [vmem:[%s2095_s1 + $0x184] ss:$12 sps:$4 sm:$0xff]   ;;  %v1478_v8 = vld [vmem:[%s2095_s1 + $0x180] ss:$12 sps:$4 sm:$0xff]  }
  0x33   : > { %1302 = vmatpush3.bf16.msra.mxu1 %v1462_v28  ;;  %v1501_v9 = vld [vmem:[%s2095_s1 + $0x200] ss:$12 sps:$4 sm:$0xff]   ;;  %v1484_v10 = vld [vmem:[%s2095_s1 + $0x19c] ss:$12 sps:$4 sm:$0xff]   ;;  %v307_v12 = vrot.slane %v1831_v42, 1  ;;  %vm306_vm5 = vcmask 1046528  }
  0x34   : > { %826 = vmatpush1.bf16.msra.mxu0 %v1431_v16  ;;  %1303 = vmatprep.subr.bf16.mxu1 %v1465_v30  ;;  %v1482_v14 = vld [vmem:[%s2095_s1 + $0x198] ss:$12 sps:$4 sm:$0xff]   ;;  %v1488_v16 = vld [vmem:[%s2095_s1 + $0x1b4] ss:$12 sps:$4 sm:$0xff]   ;;  %v1486_v18 = vld [vmem:[%s2095_s1 + $0x1b0] ss:$12 sps:$4 sm:$0xff]  }
  0x35   : > { %827 = vmatprep.subr.bf16.mxu0 %v1432_v17  ;;  %v1505_v15 = vld [vmem:[%s2095_s1 + $0x218] ss:$12 sps:$4 sm:$0xff]   ;;  %v1609_v17 = vmov 0   ;;  %v1509_v19 = vld [vmem:[%s2095_s1 + $0x230] ss:$12 sps:$4 sm:$0xff]   ;;  %v309_v20 = vsel %vm306_vm5, %v307_v12, %v308_v13  ;;  %vm1966_vm6 = vcmp.lt.s32.totalorder %v260_v38, 7 }
  0x36   : > { %v1492_v22 = vld [vmem:[%s2095_s1 + $0x1cc] ss:$12 sps:$4 sm:$0xff]   ;;  %vm1972_vm7 = vcmp.lt.s32.totalorder %v267_v39, 7  ;;  %v1496_v28 = vld [vmem:[%s2095_s1 + $0x1e4] ss:$12 sps:$4 sm:$0xff]   ;;  %v418_v55 = vsub.s32 0, %v1782_v25 }
  0x37   : > { %1304 = vmatpush3.bf16.msra.mxu1 %v1467_v33  ;;  %vm1263_vm8 = vmpackc.low %vm1972_vm7, %vm1966_vm6  ;;  %v1500_v30 = vld [vmem:[%s2095_s1 + $0x1fc] ss:$12 sps:$4 sm:$0xff]   ;;  %v1504_v32 = vld [vmem:[%s2095_s1 + $0x214] ss:$12 sps:$4 sm:$0xff]   ;;  %v422_v56 = vsub.s32 1, %v1782_v25  ;;  %s1072_s7 = sshll.u32 %s218_s10, 4  ;;  %s2039_s7 = int_to_ptr.vmem [resolvable:$true] %s1072_s7 }
  0x38   : > { %828 = vmatpush1.bf16.msra.mxu0 %v1434_v21  ;;  %1305 = vmatprep.subr.bf16.mxu1 %v1470_v35  ;;  %v311_v21 = vsel %vm306_vm5, %v308_v13, %v310_v11  ;;  %v1502_v33 = vld [vmem:[%s2095_s1 + $0x210] ss:$12 sps:$4 sm:$0xff]   ;;  %v1506_v35 = vld [vmem:[%s2095_s1 + $0x228] ss:$12 sps:$4 sm:$0xff]   ;;  %v280_v45 = vld [vmem:[%s2096_s2] sm:$0x7] }
  0x39   : > { %829 = vmatprep.subr.bf16.mxu0 %v1435_v24  ;;  %v1264_v26 = vpack.c.bf16 %v311_v21, %v309_v20  ;;  %v984_v24 = vld [vmem:[%s1703_s9 + $0x8] ss:$12 sps:$4 sm:$0xff]   ;;  %s1526_s24 = scalar_lea.vmem %s2039_s7, 128  ;;  %s1610_s26 = smov [#allocation2]  }
  0x3a   : > { %p1527_p13 = scmp.ne.s32.totalorder %s2039_s7, %s1526_s24  ;;  %s1530_s5 = sshll.u32 %s1610_s26, 4  ;;  %s1531_s5 = int_to_ptr.vmem [resolvable:$false] %s1530_s5 }
  0x3b   : > { %1306 = vmatpush3.bf16.msra.mxu1 %v1472_v40  ;;  %s1532_s6 = scalar_lea.vmem %s1531_s5, 256  ;;  %p1533_p2 = scmp.lt.s32.totalorder %s2039_s7, %s1531_s5 }
  0x3c   : > { %830 = vmatpush1.bf16.msra.mxu0 %v1437_v27  ;;  %1307 = vmatprep.subr.bf16.mxu1 %v1475_v41  ;;  %v1490_v27 = vld [vmem:[%s2095_s1 + $0x1c8] ss:$12 sps:$4 sm:$0xff]   ;;  %p1528_p0 = pnand %p1527_p13, %p1678_p4  ;;  %p1534_p3 = scmp.lt.s32.totalorder %s1532_s6, %s1526_s24 }
  0x3d   : > { %831 = vmatprep.subr.bf16.mxu0 %v1438_v29  ;;  %v1494_v29 = vld [vmem:[%s2095_s1 + $0x1e0] ss:$12 sps:$4 sm:$0xff]  }
  0x3e   : > { %p1529_p1 = pneg %p1528_p0  ;;  %p1535_p5 = por %p1534_p3, %p1533_p2 }
  0x3f   : > { %1308 = vmatpush3.bf16.msra.mxu1 %v1477_v50 }
  0x40   : > { %832 = vmatpush1.bf16.msra.mxu0 %v1441_v31  ;;  %1324 = vmatprep.subr.bf16.mxu1 %v1607_v44  ;;  %v1498_v31 = vld [vmem:[%s2095_s1 + $0x1f8] ss:$12 sps:$4 sm:$0xff]   ;;  %p1536_p6 = pnand %p1535_p5, %p1529_p1 }
  0x41   : > { %833 = vmatprep.subr.bf16.mxu0 %v1443_v34  ;;  %v1508_v34 = vld [vmem:[%s2095_s1 + $0x22c] ss:$12 sps:$4 sm:$0xff]  }
  0x42   : > { %1268 = vmatmul.mubr.msk.bf16.vlgmr.msra.gmra.mrb[0].mxu1 %vm1260_vm3, %v1261_v57 }
  0x43   : > { %1325 = vmatpush3.bf16.msra.mxu1 %v1481_v58  ;;  %1340 = vmatprep.mubr.msk.bf16.mxu1 %vm1608_vm4, %v1607_v44  ;;  %v419_v58 = vrot.slane %v280_v45, %v418_v55 }
  0x44   : > { %834 = vmatpush1.bf16.msra.mxu0 %v1446_v36  ;;  %1326 = vmatprep.subr.bf16.mxu1 %v1607_v44 }
  0x45   : > { %835 = vmatprep.subr.bf16.mxu0 %v1448_v37 }
  0x47   : > { %1327 = vmatpush3.bf16.msra.mxu1 %v1485_v61 }
  0x48   : > { %836 = vmatpush1.bf16.msra.mxu0 %v1451_v46  ;;  %1328 = vmatprep.subr.bf16.mxu1 %v1607_v44 }
  0x49   : > { %837 = vmatprep.subr.bf16.mxu0 %v1453_v53 }
  0x4b   : > { %1329 = vmatpush3.bf16.msra.mxu1 %v1489_v0 }
  0x4c   : > { %838 = vmatpush1.bf16.msra.mxu0 %v1456_v54  ;;  %1330 = vmatprep.subr.bf16.mxu1 %v1607_v44 }
  0x4d   : > { %839 = vmatprep.subr.bf16.mxu0 %v1458_v59  ;;  %v423_v59 = vrot.slane %v280_v45, %v422_v56 }
  0x4f   : > { %1331 = vmatpush3.bf16.msra.mxu1 %v1493_v3 }
  0x50   : > { %840 = vmatpush1.bf16.msra.mxu0 %v1461_v60  ;;  %1332 = vmatprep.subr.bf16.mxu1 %v1607_v44  ;;  %v985_v60 = vld [vmem:[%s1703_s9 + $0xc] sm:$0xff] }
  0x51   : > { %841 = vmatprep.subr.bf16.mxu0 %v1463_v62 }
  0x53   : > { %1333 = vmatpush3.bf16.msra.mxu1 %v1497_v6 }
  0x54   : > { %842 = vmatpush1.bf16.msra.mxu0 %v1466_v63  ;;  %1334 = vmatprep.subr.bf16.mxu1 %v1607_v44 }
  0x55   : > { %843 = vmatprep.subr.bf16.mxu0 %v1468_v1 }
  0x57   : > { %1335 = vmatpush3.bf16.msra.mxu1 %v1501_v9 }
  0x58   : > { %844 = vmatpush1.bf16.msra.mxu0 %v1471_v2  ;;  %1336 = vmatprep.subr.bf16.mxu1 %v1607_v44  ;;  %v990_v2 = vunpack.c.l.bf16 %v985_v60 }
  0x59   : > { %845 = vmatprep.subr.bf16.mxu0 %v1473_v4 }
  0x5b   : > { %1337 = vmatpush3.bf16.msra.mxu1 %v1505_v15 }
  0x5c   : > { %846 = vmatpush1.bf16.msra.mxu0 %v1476_v5  ;;  %1338 = vmatprep.subr.bf16.mxu1 %v1607_v44  ;;  %v426_v44 = vsub.s32 2, %v1782_v25  ;;  %v991_v5 = vunpack.c.h.bf16 %v985_v60 }
  0x5d   : > { %858 = vmatprep.subr.bf16.mxu0 %v1480_v7 }
  0x5e   : > { %v427_v46 = vrot.slane %v280_v45, %v426_v44 }
  0x5f   : > { %1262 = vmatmul.mubr.msk.bf16.vlgmr.msra.gmra.mrb[0].mxu0 %vm1260_vm3, %v1261_v57  ;;  %1339 = vmatpush3.bf16.msra.mxu1 %v1509_v19  ;;  %v983_v57 = vld [vmem:[%s1703_s9] sm:$0xff]  ;;  %s1287_s9 = sshll.u32 %s1596_s18, 7  ;;  %s2048_s18 = scalar_lea.sflag [#allocation3], %s216_s29 }
  0x60   : > { %859 = vmatpush1.bf16.msra.mxu0 %v1478_v8  ;;  %890 = vmatprep.mubr.bf16.mxu0 %v1609_v17  ;;  %v987_v61 = vunpack.c.l.bf16 %v983_v57  ;;  %v988_v63 = vunpack.c.h.bf16 %v983_v57  ;;  %s2037_s14 = scalar_lea.hbm %s2097_s3, %s1287_s9 }
  0x61   : > { %860 = vmatprep.subr.bf16.mxu0 %v1484_v10 }
  0x62   : > { %1341 = vmatmul.mubr.msk.bf16.vlgmr.msra.gmra.mrb[4].mxu1 %vm1263_vm8, %v1264_v26 }
  0x64   : > { %861 = vmatpush1.bf16.msra.mxu0 %v1482_v14 }
  0x65   : > { %862 = vmatprep.subr.bf16.mxu0 %v1488_v16 }
  0x68   : > { %863 = vmatpush1.bf16.msra.mxu0 %v1486_v18 }
  0x69   : > { %864 = vmatprep.subr.bf16.mxu0 %v1492_v22 }
  0x6c   : > { %865 = vmatpush1.bf16.msra.mxu0 %v1490_v27 }
  0x6d   : > { %866 = vmatprep.subr.bf16.mxu0 %v1496_v28 }
  0x70   : > { %867 = vmatpush1.bf16.msra.mxu0 %v1494_v29  ;;  %v992_v29 = vunpack.c.h.bf16 %v984_v24 }
  0x71   : > { %868 = vmatprep.subr.bf16.mxu0 %v1500_v30 }
  0x74   : > { %869 = vmatpush1.bf16.msra.mxu0 %v1498_v31 }
  0x75   : > { %870 = vmatprep.subr.bf16.mxu0 %v1504_v32 }
  0x78   : > { %871 = vmatpush1.bf16.msra.mxu0 %v1502_v33 }
  0x79   : > { %872 = vmatprep.subr.bf16.mxu0 %v1508_v34 }
  0x7c   : > { %873 = vmatpush1.bf16.msra.mxu0 %v1506_v35 }
  0x7f   : > { %1265 = vmatmul.mubr.msk.bf16.vlgmr.msra.gmra.mrb[0].mxu0 %vm1263_vm8, %v1264_v26  ;;  %v989_v26 = vunpack.c.l.bf16 %v984_v24 }
 0x115   : > { %v1309_v36 = vpop.f32.mrb[0].mxu1 }
 0x116   : > { %v1310_v37 = vpop.f32.mrb[1].mxu1 }
 0x117   : > { %v1311_v38 = vadd.f32 %v1310_v37, %v1309_v36  ;;  %v1312_v39 = vpop.f32.mrb[2].mxu1 }
 0x118   : > { %v1313_v40 = vpop.f32.mrb[3].mxu1 }
 0x119   : > { %v1314_v41 = vadd.f32 %v1313_v40, %v1312_v39  ;;  %v936_v47 = vadd.f32 %v1311_v38, %v427_v46 }
 0x11b   : > { %v939_v48 = vadd.f32 %v1314_v41, %v427_v46 }
 0x135   : > { %v976_v49 = vpop.f32.mrb[4].mxu1 }
 0x136   : > { %v977_v50 = vadd.f32 %v976_v49, %v936_v47  ;;  %v1342_v51 = vpop.f32.mrb[5].mxu1 }
 0x137   : > { %v979_v52 = vpop.f32.mrb[6].mxu1 }
 0x138   : > { %v980_v53 = vadd.f32 %v979_v52, %v939_v48  ;;  %v1343_v54 = vpop.f32.mrb[7].mxu1 }
 0x152   : > { %v892_v62 = vpop.f32.mrb[0].mxu0 }
 0x153   : > { %v1344_v0 = vadd.f32 %v892_v62, %v419_v58  ;;  %v894_v1 = vpop.f32.mrb[1].mxu0 }
 0x154   : > { %v1345_v3 = vadd.f32 %v894_v1, %v423_v59  ;;  %v896_v4 = vpop.f32.mrb[2].mxu0 }
 0x155   : > { %v993_v6 = vadd.f32 %v1344_v0, %v987_v61  ;;  %v1346_v7 = vadd.f32 %v896_v4, %v419_v58  ;;  %v898_v8 = vpop.f32.mrb[3].mxu0 }
 0x156   : > { %v1007_v9 = vadd.f32 %v1345_v3, %v988_v63  ;;  %v1347_v10 = vadd.f32 %v898_v8, %v423_v59 }
 0x157   : > { %v1272_v11 = vmul.f32 -1.442695, %v993_v6  ;;  %v994_v25 = vadd.f32 %v1346_v7, %v990_v2 }
 0x158   : > { %v1274_v12 = vmul.f32 -1.442695, %v1007_v9  ;;  %v1008_v13 = vadd.f32 %v1347_v10, %v991_v5 }
 0x159   : > { %1510 = vpow2.f32 %v1272_v11  ;;  %v1273_v14 = vmul.f32 -1.442695, %v994_v25 }
 0x15a   : > { %1512 = vpow2.f32 %v1274_v12  ;;  %v1275_v15 = vmul.f32 -1.442695, %v1008_v13 }
 0x15b   : > { %1514 = vpow2.f32 %v1273_v14 }
 0x15c   : > { %1516 = vpow2.f32 %v1275_v15 }
 0x163   : > { %v1511_v16 = vpop.eup %1510 }
 0x164   : > { %v1513_v17 = vpop.eup %1512  ;;  %v1001_v21 = vadd.f32 1.0, %v1511_v16 }
 0x165   : > { %v1515_v18 = vpop.eup %1514  ;;  %v1015_v19 = vadd.f32 1.0, %v1513_v17 }
 0x166   : > { %v1517_v20 = vpop.eup %1516  ;;  %v1002_v23 = vadd.f32 1.0, %v1515_v18 }
 0x167   : > { %1518 = vrcp.f32 %v1015_v19  ;;  %v1016_v22 = vadd.f32 1.0, %v1517_v20 }
 0x169   : > { %1520 = vrcp.f32 %v1016_v22 }
 0x16a   : > { %1522 = vrcp.f32 %v1001_v21 }
 0x16b   : > { %1524 = vrcp.f32 %v1002_v23 }
 0x171   : > { %v1519_v27 = vpop.eup %1518 }
 0x172   : > { %v1021_v28 = vmul.f32 %v1519_v27, %v977_v50 }
 0x173   : > { %v1521_v30 = vpop.eup %1520 }
 0x174   : > { %v1523_v31 = vpop.eup %1522  ;;  %v1022_v32 = vmul.f32 %v1521_v30, %v980_v53  ;;  %v1023_v33 = vadd.f32 %v1021_v28, %v989_v26 }
 0x175   : > { %v1525_v34 = vpop.eup %1524  ;;  %v1033_v37 = vsub.f32 1.0, %v1523_v31  ;;  %v1031_v40 = vmul.f32 %v1523_v31, %v1831_v42 }
 0x176   : > { %v1024_v35 = vadd.f32 %v1022_v32, %v992_v29  ;;  %vm1025_vm9 = vcmp.gt.f32.partialorder %v1023_v33, 0.0  ;;  %v1027_v36 = vmul.f32 0.2, %v1023_v33  ;;  %v1034_v41 = vsub.f32 1.0, %v1525_v34 }
 0x177   : > { %v1032_v46 = vmul.f32 %v1525_v34, %v1836_v43 }
 0x178   : > { %vm1026_vm10 = vcmp.gt.f32.partialorder %v1024_v35, 0.0  ;;  %v1028_v38 = vmul.f32 0.2, %v1024_v35  ;;  %v1029_v39 = vsel %vm1025_vm9, %v1023_v33, %v1027_v36 }
 0x179   : > { %v1035_v44 = vmul.f32 %v1033_v37, %v1029_v39 }
 0x17a   : > { %v1030_v45 = vsel %vm1026_vm10, %v1024_v35, %v1028_v38 }
 0x17b   : > { %v1036_v47 = vmul.f32 %v1034_v41, %v1030_v45  ;;  %v1037_v48 = vadd.f32 %v1035_v44, %v1031_v40 }
 0x17d   : > { %v1038_v49 = vadd.f32 %v1036_v47, %v1032_v46  ;;  %1039 = vst [vmem:[%s2098_s4] sm:$0xff] %v1037_v48 }
 0x17f   : > { %1040 = vst [vmem:[%s2098_s4 + $0x8] sm:$0xff] %v1038_v49  ;;  %v1291_v42 = vpack.c.bf16 %v1038_v49, %v1037_v48 }
 0x181   : > { %1292 = vst [vmem:[%s218_s10] sm:$0xff] %v1291_v42  }
 0x182   : > { %1539 = shalt.err (!%p1536_p6)
}
 0x183   : > { %s1540_s29 = scalar_lea.hbm %s2037_s14, 128  ;;  %s1544_s9 = scalar_lea.hbm %s2097_s3, 1024 }
 0x184   : > { %p1541_p7 = scmp.ne.s32.totalorder %s2037_s14, %s1540_s29  ;;  %p1545_p11 = scmp.lt.u32.totalorder %s2037_s14, %s2097_s3 }
 0x185   : > { %p1546_p12 = scmp.lt.u32.totalorder %s1544_s9, %s1540_s29  ;;  %p1548_p0 = scmp.lt.u32.totalorder %s1540_s29, %s2037_s14 }
 0x186   : > { %p1542_p9 = pnand %p1541_p7, %p1678_p4 }
 0x187   : > { %p1547_p13 = por %p1546_p12, %p1545_p11 }
 0x188   : > { %p1543_p10 = pneg %p1542_p9 }
 0x189   : > { %p1549_p1 = por %p1548_p0, %p1547_p13 }
 0x18b   : > { %p1550_p2 = pnand %p1549_p1, %p1543_p10 }
 0x18d   : > { %1553 = shalt.err (!%p1550_p2)
}
 0x18e   : > { %s1611_s12 = smov 64   ;;  %s1612_s13 = smov 4  }
 0x18f   : > { %1353 = dma.vmem_to_hbm [thread:$0]  (%p1678_p4), %s2039_s7, 128, %s2037_s14, %s2048_s18, %s1611_s12, %s1611_s12, %s1612_s13  }
 0x190 PF: > { %p1359_p3 = scmp.ge.s32.totalorder %s1604_s20, 2  ;;  %s1099_s21 = sand.u32 1, %s1584_s15  }
 0x191   : > { %s1100_s22 = scalar_lea.sflag [#allocation3], %s1099_s21 }
 0x192   : > { %p1356_p5 = pnand %p1359_p3, %p1685_p8 }
 0x194   : > { %1579 = dma.done.wait (!%p1356_p5), %s1100_s22, 128  }
 0x195   : > { %1581 = vsyncadd (!%p1356_p5), %s1100_s22, 4294967168  ;;  %s18_s20 = sadd.s32 1, %s1604_s20   ;;  %s2109_s15 = smov %s1588_s16 }
 0x196   : > { %p15_p6 = scmp.ge.s32.totalorder %s18_s20, 10   ;;  %s2110_s16 = smov %s1592_s17 }
 0x197   : > { %s2111_s17 = smov %s1691_s28  ;;  %s2112_s18 = smov %s1600_s19 }
 0x198   : > { %s2113_s19 = smov %s2115_s23  ;;  %17 = sbr.rel (!%p15_p6) target bundleno = 4 (0x4), region = 83 }
 0x19f   :  { %1105 = vsyncpa [#allocation3], 1 }
 0x1a0   :  { %1107 = vsyncpa [#allocation3 + $0x1], 1 }

// kernel: _lambda_.6
= control target key start
LH: loop header
LB: loop body
LE: loop exit
PB: predicated region body
PF: predicated region fallthrough
CT: control target
= control target key end

     0   :  { %s2085_s18 = smov 0   ;;  %s2605_s0 = inlined_call_operand.vmem [shape: bf16[128,256], index: 0, kind: input, shape index: {}]   ;;  %s2606_s1 = inlined_call_operand.vmem [shape: bf16[512,128], index: 1, kind: input, shape index: {}]   ;;  %s2607_s2 = inlined_call_operand.vmem [shape: f32[1,128], index: 2, kind: input, shape index: {}]   ;;  %s2608_s3 = inlined_call_operand.vmem [shape: bf16[384,384], index: 3, kind: input, shape index: {}]   ;;  %s2609_s4 = inlined_call_operand.vmem [shape: f32[1,384], index: 4, kind: input, shape index: {}]   ;;  %s2610_s5 = inlined_call_operand.vmem [shape: bf16[128,384], index: 5, kind: output, shape index: {}]  }
   0x1 LB: > { %s1598_s19 = sadd.s32 4294967295, %s2051_s18   ;;  %p1602_p0 = scmp.ge.s32.totalorder %s2051_s18, 1  ;;  %s2051_s18 = sphi %s2085_s18, %s15_s18  }
   0x2   : > { %p189_p1 = scmp.lt.s32.totalorder %s2051_s18, 5 }
   0x4   : > { %p190_p2 = pnand %p1602_p0, %p189_p1 }
   0x5   : > { %v1913_v0 = vld [vmem:[%s2606_s1 + $0x40] sm:$0xff] (!%p190_p2)   ;;  %s1603_s22 = sshll.u32 (!%p190_p2), %s1598_s19, 2  ;;  %v1915_v2 = vld [vmem:[%s2606_s1 + $0x48] sm:$0xff] (!%p190_p2)   ;;  %v246_v3 = vlaneseq (!%p190_p2)  ;;  %v1917_v5 = vld [vmem:[%s2606_s1 + $0x50] sm:$0xff] (!%p190_p2)   ;;  %v2053_v21 = vmov (!%p190_p2), 0.0   ;;  %vm321_vm2 = vcmask (!%p190_p2), 1040384  }
   0x6   : > { %193 = sbr.rel (%p190_p2) target bundleno = 557 (0x22d), region = 40  ;;  %v1914_v1 = vld [vmem:[%s2606_s1] sm:$0xff] (!%p190_p2)   ;;  %1772 = vmatprep.subr.bf16.mxu1 (!%p190_p2), %v1913_v0  ;;  %p220_p3 = scmp.lt.s32.totalorder (!%p190_p2), %s1603_s22, 15  ;;  %v1916_v4 = vld [vmem:[%s2606_s1 + $0x8] sm:$0xff] (!%p190_p2)   ;;  %v1918_v7 = vld [vmem:[%s2606_s1 + $0x10] sm:$0xff] (!%p190_p2)   ;;  %v2156_v22 = vrot.slane (!%p190_p2), %v2053_v21, 7 }
   0x7   : > { %1773 = vmatpush3.bf16.msra.mxu1 (!%p190_p2), %v1914_v1  ;;  %v2110_v6 = vshrl.u32 (!%p190_p2), %v246_v3, 7  ;;  %v1919_v8 = vld [vmem:[%s2606_s1 + $0x58] sm:$0xff] (!%p190_p2)   ;;  %v1921_v11 = vld [vmem:[%s2606_s1 + $0x60] sm:$0xff] (!%p190_p2)   ;;  %v1923_v15 = vld [vmem:[%s2606_s1 + $0x68] sm:$0xff] (!%p190_p2)   ;;  %vm768_vm12 = vcmask (!%p190_p2), 1046528  }
   0x8   : > { %1774 = vmatprep.subr.bf16.mxu1 (!%p190_p2), %v1915_v2  ;;  %v1920_v10 = vld [vmem:[%s2606_s1 + $0x18] sm:$0xff] (!%p190_p2)   ;;  %v1922_v14 = vld [vmem:[%s2606_s1 + $0x20] sm:$0xff] (!%p190_p2)   ;;  %v1924_v23 = vld [vmem:[%s2606_s1 + $0x28] sm:$0xff] (!%p190_p2)  }
   0x9   : > { %v2120_v9 = vadd.s32 (!%p190_p2), 8, %v2110_v6  ;;  %v255_v12 = vand.u32 (!%p190_p2), 7, %v2110_v6  ;;  %v1925_v28 = vld [vmem:[%s2606_s1 + $0x70] sm:$0xff] (!%p190_p2)   ;;  %v2178_v32 = vadd.s32 (!%p190_p2), 16, %v2110_v6  ;;  %v2184_v35 = vadd.s32 (!%p190_p2), 24, %v2110_v6  ;;  %v1927_v38 = vld [vmem:[%s2606_s1 + $0x78] sm:$0xff] (!%p190_p2)  }
   0xa   : > { %v1926_v33 = vld [vmem:[%s2606_s1 + $0x30] sm:$0xff] (!%p190_p2)   ;;  %v1928_v41 = vld [vmem:[%s2606_s1 + $0x38] sm:$0xff] (!%p190_p2)   ;;  %v1929_v45 = vld [vmem:[%s2606_s1 + $0xc0] sm:$0xff] (!%p190_p2)  }
   0xb   : > { %1775 = vmatpush3.bf16.msra.mxu1 (!%p190_p2), %v1916_v4  ;;  %v262_v13 = vand.u32 (!%p190_p2), 7, %v2120_v9  ;;  %vm2151_vm0 = vcmp.ge.s32.totalorder (!%p190_p2), %v255_v12, 1  ;;  %v269_v39 = vand.u32 (!%p190_p2), 7, %v2178_v32  ;;  %v276_v40 = vand.u32 (!%p190_p2), 7, %v2184_v35  ;;  %v1930_v53 = vld [vmem:[%s2606_s1 + $0x80] sm:$0xff] (!%p190_p2)   ;;  %v1931_v58 = vld [vmem:[%s2606_s1 + $0xc8] sm:$0xff] (!%p190_p2)  }
   0xc   : > { %1776 = vmatprep.subr.bf16.mxu1 (!%p190_p2), %v1917_v5  ;;  %v1932_v60 = vld [vmem:[%s2606_s1 + $0x88] sm:$0xff] (!%p190_p2)   ;;  %v1933_v63 = vld [vmem:[%s2606_s1 + $0xd0] sm:$0xff] (!%p190_p2)   ;;  %vm2492_vm15 = vcmp.lt.s32.totalorder (!%p190_p2), %v255_v12, 7 }
   0xd   : > { %s2628_s22 = smov (!%p220_p3, %s1603_s22), 15  ;;  %vm301_vm1 = vcmp.ge.s32.totalorder %v262_v13, 1  ;;  %vm2213_vm4 = vcmp.ge.s32.totalorder %v269_v39, 1  ;;  %vm303_vm5 = vcmp.ge.s32.totalorder %v276_v40, 1  ;;  %v1949_v3 = vld [vmem:[%s2608_s3 + $0x4] ss:$12 sps:$4 sm:$0xff]  }
   0xe   : > { %s1763_s10 = sshll.u32 %s2628_s22, 3  ;;  %vm2173_vm3 = vmpackc.low %vm301_vm1, %vm2151_vm0  ;;  %v1951_v4 = vld [vmem:[%s2608_s3] ss:$12 sps:$4 sm:$0xff]   ;;  %v1934_v5 = vld [vmem:[%s2606_s1 + $0x90] sm:$0xff]   ;;  %1288 = vmatprep.subr.bf16.mxu0 %v1949_v3  ;;  %vm2444_vm7 = vcmp.lt.s32.totalorder %v269_v39, 7  ;;  %vm2450_vm8 = vcmp.lt.s32.totalorder %v276_v40, 7 }
   0xf   : > { %1777 = vmatpush3.bf16.msra.mxu1 %v1918_v7  ;;  %s2131_s17 = scalar_lea.vmem %s2605_s0, %s1763_s10  ;;  %vm2233_vm6 = vmpackc.low %vm303_vm5, %vm2213_vm4  ;;  %v1952_v7 = vld [vmem:[%s2608_s3 + $0x1c] ss:$12 sps:$4 sm:$0xff]   ;;  %1289 = vmatpush1.bf16.msra.mxu0 %v1951_v4  ;;  %v1958_v20 = vld [vmem:[%s2608_s3 + $0x4c] ss:$12 sps:$4 sm:$0xff]   ;;  %vm2498_vm0 = vcmp.lt.s32.totalorder %v262_v13, 7  ;;  %s1902_s30 = smul.u32 12, %s2628_s22 }
  0x10   : > { %1778 = vmatprep.subr.bf16.mxu1 %v1919_v8  ;;  %v2142_v16 = vld [vmem:[%s2131_s17] sm:$0xff]  ;;  %v2145_v17 = vld [vmem:[%s2131_s17 + $0x8] sm:$0xff]  ;;  %v2200_v44 = vld [vmem:[%s2131_s17 + $0x10] sm:$0xff]  ;;  %1290 = vmatprep.subr.bf16.mxu0 %v1952_v7 }
  0x11   : > { %v239_v18 = vunpack.c.h.bf16 %v2142_v16  ;;  %v241_v19 = vunpack.c.h.bf16 %v2145_v17  ;;  %v238_v26 = vunpack.c.l.bf16 %v2142_v16  ;;  %v240_v27 = vunpack.c.l.bf16 %v2145_v17  ;;  %v2206_v46 = vld [vmem:[%s2131_s17 + $0x18] sm:$0xff]  ;;  %v1982_v50 = vld [vmem:[%s2608_s3 + $0x20] ss:$12 sps:$4 sm:$0xff]   ;;  %vm1738_vm9 = vmpackc.low %vm2450_vm8, %vm2444_vm7  ;;  %s2592_s8 = scalar_lea.vmem %s2610_s5, %s1902_s30 }
  0x12   : > { %v243_v47 = vunpack.c.h.bf16 %v2200_v44  ;;  %v242_v48 = vunpack.c.l.bf16 %v2200_v44  ;;  %v245_v49 = vunpack.c.h.bf16 %v2206_v46  ;;  %v244_v51 = vunpack.c.l.bf16 %v2206_v46  ;;  %v1935_v8 = vld [vmem:[%s2606_s1 + $0xd8] sm:$0xff]   ;;  %v2000_v4 = vld [vmem:[%s2608_s3 + $0x140] ss:$12 sps:$4 sm:$0xff]   ;;  %vm1735_vm1 = vmpackc.low %vm2498_vm0, %vm2492_vm15 }
  0x13   : > { %1779 = vmatpush3.bf16.msra.mxu1 %v1920_v10  ;;  %v325_v24 = vrot.slane %v239_v18, 7  ;;  %v329_v25 = vrot.slane %v241_v19, 7  ;;  %v323_v36 = vrot.slane %v238_v26, 7  ;;  %v327_v37 = vrot.slane %v240_v27, 7  ;;  %v1957_v18 = vld [vmem:[%s2608_s3 + $0x30] ss:$12 sps:$4 sm:$0xff]  }
  0x14   : > { %1780 = vmatprep.subr.bf16.mxu1 %v1921_v11  ;;  %v333_v54 = vrot.slane %v243_v47, 7  ;;  %v331_v55 = vrot.slane %v242_v48, 7  ;;  %v337_v56 = vrot.slane %v245_v49, 7  ;;  %v335_v57 = vrot.slane %v244_v51, 7  ;;  %v1954_v11 = vld [vmem:[%s2608_s3 + $0x18] ss:$12 sps:$4 sm:$0xff]  }
  0x15   : > { %v326_v29 = vsel %vm321_vm2, %v2156_v22, %v325_v24  ;;  %v330_v30 = vsel %vm321_vm2, %v325_v24, %v329_v25  ;;  %v324_v42 = vsel %vm321_vm2, %v2156_v22, %v323_v36  ;;  %v328_v43 = vsel %vm321_vm2, %v323_v36, %v327_v37  ;;  %v1936_v19 = vld [vmem:[%s2606_s1 + $0x98] sm:$0xff]   ;;  %1291 = vmatpush1.bf16.msra.mxu0 %v1954_v11  ;;  %v1960_v24 = vld [vmem:[%s2608_s3 + $0x48] ss:$12 sps:$4 sm:$0xff]   ;;  %v1961_v26 = vld [vmem:[%s2608_s3 + $0x64] ss:$12 sps:$4 sm:$0xff]  }
  0x16   : > { %v1646_v34 = vpack.c.bf16 %v330_v30, %v326_v29  ;;  %v1649_v52 = vpack.c.bf16 %v328_v43, %v324_v42  ;;  %v334_v59 = vsel %vm321_vm2, %v329_v25, %v333_v54  ;;  %v338_v61 = vsel %vm321_vm2, %v333_v54, %v337_v56  ;;  %v1938_v25 = vld [vmem:[%s2606_s1 + $0xa0] sm:$0xff]   ;;  %v1939_v27 = vld [vmem:[%s2606_s1 + $0xe8] sm:$0xff]   ;;  %v1941_v29 = vld [vmem:[%s2606_s1 + $0xf0] sm:$0xff]  }
  0x17   : > { %1781 = vmatpush3.bf16.msra.mxu1 %v1922_v14  ;;  %v1652_v0 = vpack.c.bf16 %v338_v61, %v334_v59  ;;  %v332_v1 = vsel %vm321_vm2, %v327_v37, %v331_v55  ;;  %v336_v2 = vsel %vm321_vm2, %v331_v55, %v335_v57  ;;  %v1609_v14 = vcombine.high %v2142_v16, %v2145_v17  ;;  %v1942_v30 = vld [vmem:[%s2606_s1 + $0xb0] sm:$0xff]   ;;  %v1964_v42 = vld [vmem:[%s2608_s3 + $0x7c] ss:$12 sps:$4 sm:$0xff]   ;;  %v1980_v48 = vld [vmem:[%s2608_s3 + $0xe0] ss:$12 sps:$4 sm:$0xff]  }
  0x18   : > { %1782 = vmatprep.subr.bf16.mxu1 %v1923_v15  ;;  %1647 = vmatprep.mubr.msk.bf16.mxu1 %vm2173_vm3, %v1646_v34  ;;  %v1655_v10 = vpack.c.bf16 %v336_v2, %v332_v1  ;;  %v1955_v15 = vld [vmem:[%s2608_s3 + $0x34] ss:$12 sps:$4 sm:$0xff]   ;;  %v1944_v34 = vld [vmem:[%s2606_s1 + $0xb8] sm:$0xff]   ;;  %v1608_v36 = vcombine.low %v2142_v16, %v2145_v17  ;;  %v1611_v37 = vcombine.high %v2200_v44, %v2206_v46  ;;  %v1973_v49 = vld [vmem:[%s2608_s3 + $0xc4] ss:$12 sps:$4 sm:$0xff]  }
  0x19   : > { %1292 = vmatprep.subr.bf16.mxu0 %v1955_v15  ;;  %v1966_v16 = vld [vmem:[%s2608_s3 + $0x78] ss:$12 sps:$4 sm:$0xff]   ;;  %v1967_v17 = vld [vmem:[%s2608_s3 + $0x94] ss:$12 sps:$4 sm:$0xff]   ;;  %v1969_v43 = vld [vmem:[%s2608_s3 + $0x90] ss:$12 sps:$4 sm:$0xff]  }
  0x1a   : > { %1293 = vmatpush1.bf16.msra.mxu0 %v1957_v18  ;;  %v1977_v47 = vld [vmem:[%s2608_s3 + $0x8] ss:$12 sps:$4 sm:$0xff]   ;;  %v1976_v51 = vld [vmem:[%s2608_s3 + $0xc0] ss:$12 sps:$4 sm:$0xff]   ;;  %v1987_v54 = vld [vmem:[%s2608_s3 + $0x38] ss:$12 sps:$4 sm:$0xff]  }
  0x1b   : > { %1783 = vmatpush3.bf16.msra.mxu1 %v1924_v23  ;;  %v1937_v23 = vld [vmem:[%s2606_s1 + $0xe0] sm:$0xff]   ;;  %1294 = vmatprep.subr.bf16.mxu0 %v1958_v20  ;;  %v1990_v55 = vld [vmem:[%s2608_s3 + $0x110] ss:$12 sps:$4 sm:$0xff]   ;;  %v1995_v59 = vld [vmem:[%s2608_s3 + $0x128] ss:$12 sps:$4 sm:$0xff]  }
  0x1c   : > { %1784 = vmatprep.subr.bf16.mxu1 %v1925_v28  ;;  %v1940_v28 = vld [vmem:[%s2606_s1 + $0xa8] sm:$0xff]   ;;  %v1981_v56 = vld [vmem:[%s2608_s3 + $0xd8] ss:$12 sps:$4 sm:$0xff]   ;;  %v1983_v57 = vld [vmem:[%s2608_s3 + $0xf4] ss:$12 sps:$4 sm:$0xff]  }
  0x1d   : > { %v1988_v61 = vld [vmem:[%s2608_s3 + $0x10c] ss:$12 sps:$4 sm:$0xff]   ;;  %v1997_v2 = vld [vmem:[%s2608_s3 + $0x68] ss:$12 sps:$4 sm:$0xff]   ;;  %v2006_v11 = vld [vmem:[%s2608_s3 + $0x150] ss:$12 sps:$4 sm:$0xff]  }
  0x1e   : > { %1295 = vmatpush1.bf16.msra.mxu0 %v1960_v24  ;;  %v1996_v1 = vld [vmem:[%s2608_s3 + $0x120] ss:$12 sps:$4 sm:$0xff]   ;;  %v1998_v3 = vld [vmem:[%s2608_s3 + $0x13c] ss:$12 sps:$4 sm:$0xff]  }
  0x1f   : > { %1785 = vmatpush3.bf16.msra.mxu1 %v1926_v33  ;;  %1296 = vmatprep.subr.bf16.mxu0 %v1961_v26  ;;  %v1943_v33 = vld [vmem:[%s2606_s1 + $0xf8] sm:$0xff]   ;;  %v2002_v7 = vld [vmem:[%s2608_s3 + $0x80] ss:$12 sps:$4 sm:$0xff]   ;;  %v2439_v24 = vld [vmem:[%s2608_s3 + $0x188] ss:$12 sps:$4 sm:$0xff]   ;;  %v891_v26 = vsub.s32 0, %v2110_v6 }
  0x20   : > { %1786 = vmatprep.subr.bf16.mxu1 %v1927_v38  ;;  %v1610_v38 = vcombine.low %v2200_v44, %v2206_v46  ;;  %v1970_v44 = vld [vmem:[%s2608_s3 + $0xac] ss:$12 sps:$4 sm:$0xff]   ;;  %v1972_v46 = vld [vmem:[%s2608_s3 + $0xa8] ss:$12 sps:$4 sm:$0xff]   ;;  %v2010_v18 = vld [vmem:[%s2608_s3 + $0x170] ss:$12 sps:$4 sm:$0xff]  }
  0x21   : > { %v2008_v15 = vld [vmem:[%s2608_s3 + $0x16c] ss:$12 sps:$4 sm:$0xff]   ;;  %v2012_v20 = vld [vmem:[%s2608_s3 + $0xb0] ss:$12 sps:$4 sm:$0xff]   ;;  %v2023_v31 = vld [vmem:[%s2608_s3 + $0x1b4] ss:$12 sps:$4 sm:$0xff]  }
  0x22   : > { %v2032_v62 = vld [vmem:[%s2608_s3 + $0x1e8] ss:$12 sps:$4 sm:$0xff]  }
  0x23   : > { %1787 = vmatpush3.bf16.msra.mxu1 %v1928_v41  ;;  %v1963_v41 = vld [vmem:[%s2608_s3 + $0x60] ss:$12 sps:$4 sm:$0xff]  }
  0x24   : > { %1800 = vmatprep.subr.bf16.mxu1 %v1929_v45  ;;  %1297 = vmatpush1.bf16.msra.mxu0 %v1963_v41  ;;  %v1975_v45 = vld [vmem:[%s2608_s3 + $0xc8] ss:$12 sps:$4 sm:$0xff]  }
  0x25   : > { %1298 = vmatprep.subr.bf16.mxu0 %v1964_v42 }
  0x26   : > { %1650 = vmatmul.mubr.msk.bf16.vlgmr.msra.gmra.mrb[0].mxu1 %vm2173_vm3, %v1649_v52  ;;  %v1985_v52 = vld [vmem:[%s2608_s3 + $0xf8] ss:$12 sps:$4 sm:$0xff]  }
  0x27   : > { %1801 = vmatpush3.bf16.msra.mxu1 %v1930_v53  ;;  %1653 = vmatprep.mubr.msk.bf16.mxu1 %vm2233_vm6, %v1652_v0  ;;  %v1978_v53 = vld [vmem:[%s2608_s3 + $0xdc] ss:$12 sps:$4 sm:$0xff]   ;;  %v1993_v0 = vld [vmem:[%s2608_s3 + $0x124] ss:$12 sps:$4 sm:$0xff]  }
  0x28   : > { %1802 = vmatprep.subr.bf16.mxu1 %v1931_v58  ;;  %1299 = vmatpush1.bf16.msra.mxu0 %v1966_v16  ;;  %v1992_v58 = vld [vmem:[%s2608_s3 + $0x50] ss:$12 sps:$4 sm:$0xff]  }
  0x29   : > { %1300 = vmatprep.subr.bf16.mxu0 %v1967_v17 }
  0x2b   : > { %1803 = vmatpush3.bf16.msra.mxu1 %v1932_v60  ;;  %v1986_v60 = vld [vmem:[%s2608_s3 + $0xf0] ss:$12 sps:$4 sm:$0xff]  }
  0x2c   : > { %1804 = vmatprep.subr.bf16.mxu1 %v1933_v63  ;;  %1301 = vmatpush1.bf16.msra.mxu0 %v1969_v43  ;;  %v1991_v63 = vld [vmem:[%s2608_s3 + $0x108] ss:$12 sps:$4 sm:$0xff]  }
  0x2d   : > { %1302 = vmatprep.subr.bf16.mxu0 %v1970_v44 }
  0x2e   : > { %1656 = vmatmul.mubr.msk.bf16.gmra.mrb[4].mxu1 %vm2233_vm6, %v1655_v10  ;;  %v2005_v10 = vld [vmem:[%s2608_s3 + $0x158] ss:$12 sps:$4 sm:$0xff]  }
  0x2f   : > { %1805 = vmatpush3.bf16.msra.mxu1 %v1934_v5  ;;  %706 = vmatprep.mubr.bf16.mxu1 %v1609_v14  ;;  %v2001_v5 = vld [vmem:[%s2608_s3 + $0x138] ss:$12 sps:$4 sm:$0xff]  }
  0x30   : > { %1806 = vmatprep.subr.bf16.mxu1 %v1935_v8  ;;  %1303 = vmatpush1.bf16.msra.mxu0 %v1972_v46  ;;  %v2003_v8 = vld [vmem:[%s2608_s3 + $0x154] ss:$12 sps:$4 sm:$0xff]   ;;  %v2007_v14 = vld [vmem:[%s2608_s3 + $0x98] ss:$12 sps:$4 sm:$0xff]  }
  0x31   : > { %1304 = vmatprep.subr.bf16.mxu0 %v1973_v49 }
  0x33   : > { %1807 = vmatpush3.bf16.msra.mxu1 %v1936_v19  ;;  %v2011_v19 = vld [vmem:[%s2608_s3 + $0x168] ss:$12 sps:$4 sm:$0xff]  }
  0x34   : > { %1808 = vmatprep.subr.bf16.mxu1 %v1937_v23  ;;  %1305 = vmatpush1.bf16.msra.mxu0 %v1976_v51  ;;  %v2015_v23 = vld [vmem:[%s2608_s3 + $0x184] ss:$12 sps:$4 sm:$0xff]  }
  0x35   : > { %1306 = vmatprep.subr.bf16.mxu0 %v1978_v53 }
  0x37   : > { %1809 = vmatpush3.bf16.msra.mxu1 %v1938_v25  ;;  %v735_v25 = vld [vmem:[%s2609_s4] sm:$0x7] }
  0x38   : > { %1810 = vmatprep.subr.bf16.mxu1 %v1939_v27  ;;  %1307 = vmatpush1.bf16.msra.mxu0 %v1981_v56 }
  0x39   : > { %1308 = vmatprep.subr.bf16.mxu0 %v1983_v57 }
  0x3b   : > { %1811 = vmatpush3.bf16.msra.mxu1 %v1940_v28 }
  0x3c   : > { %1812 = vmatprep.subr.bf16.mxu1 %v1941_v29  ;;  %1309 = vmatpush1.bf16.msra.mxu0 %v1986_v60 }
  0x3d   : > { %1310 = vmatprep.subr.bf16.mxu0 %v1988_v61 }
  0x3f   : > { %1813 = vmatpush3.bf16.msra.mxu1 %v1942_v30 }
  0x40   : > { %1814 = vmatprep.subr.bf16.mxu1 %v1943_v33  ;;  %1311 = vmatpush1.bf16.msra.mxu0 %v1991_v63 }
  0x41   : > { %1312 = vmatprep.subr.bf16.mxu0 %v1993_v0 }
  0x43   : > { %1815 = vmatpush3.bf16.msra.mxu1 %v1944_v34 }
  0x44   : > { %1828 = vmatprep.subr.bf16.mxu1 %v1975_v45  ;;  %1313 = vmatpush1.bf16.msra.mxu0 %v1996_v1 }
  0x45   : > { %1314 = vmatprep.subr.bf16.mxu0 %v1998_v3 }
  0x46   : > { %707 = vmatmul.mubr.bf16.vlgmr.msra.gmra.mrb[8].mxu1 %v1608_v36 }
  0x47   : > { %714 = vmatprep.mubr.bf16.mxu1 %v1611_v37  ;;  %1829 = vmatpush3.bf16.msra.mxu1 %v1977_v47 }
  0x48   : > { %1830 = vmatprep.subr.bf16.mxu1 %v1980_v48  ;;  %1315 = vmatpush1.bf16.msra.mxu0 %v2001_v5 }
  0x49   : > { %1316 = vmatprep.subr.bf16.mxu0 %v2003_v8  ;;  %v2019_v8 = vld [vmem:[%s2608_s3 + $0x19c] ss:$12 sps:$4 sm:$0xff]  }
  0x4b   : > { %1831 = vmatpush3.bf16.msra.mxu1 %v1982_v50 }
  0x4c   : > { %1832 = vmatprep.subr.bf16.mxu1 %v1985_v52  ;;  %1317 = vmatpush1.bf16.msra.mxu0 %v2006_v11 }
  0x4d   : > { %1318 = vmatprep.subr.bf16.mxu0 %v2008_v15 }
  0x4e   : > { %715 = vmatmul.mubr.bf16.gmra.mrb[12].mxu1 %v1610_v38  ;;  %v1612_v38 = vld [vmem:[%s2607_s2] ss:$0 sm:$0xff] }
  0x4f   : > { %1833 = vmatpush3.bf16.msra.mxu1 %v1987_v54 }
  0x50   : > { %1834 = vmatprep.subr.bf16.mxu1 %v1990_v55  ;;  %1319 = vmatpush1.bf16.msra.mxu0 %v2011_v19 }
  0x51   : > { %1341 = vmatprep.subr.bf16.mxu0 %v2015_v23  ;;  %v2017_v23 = vld [vmem:[%s2608_s3 + $0x198] ss:$12 sps:$4 sm:$0xff]  }
  0x53   : > { %1835 = vmatpush3.bf16.msra.mxu1 %v1992_v58 }
  0x54   : > { %1836 = vmatprep.subr.bf16.mxu1 %v1995_v59 }
  0x57   : > { %1837 = vmatpush3.bf16.msra.mxu1 %v1997_v2 }
  0x58   : > { %1838 = vmatprep.subr.bf16.mxu1 %v2000_v4  ;;  %v2013_v4 = vld [vmem:[%s2608_s3 + $0x180] ss:$12 sps:$4 sm:$0xff]  }
  0x5b   : > { %1839 = vmatpush3.bf16.msra.mxu1 %v2002_v7 }
  0x5c   : > { %1840 = vmatprep.subr.bf16.mxu1 %v2005_v10 }
  0x5f   : > { %1841 = vmatpush3.bf16.msra.mxu1 %v2007_v14 }
  0x60   : > { %1842 = vmatprep.subr.bf16.mxu1 %v2010_v18  ;;  %v2020_v18 = vld [vmem:[%s2608_s3 + $0x1a0] ss:$12 sps:$4 sm:$0xff]  }
  0x63   : > { %1843 = vmatpush3.bf16.msra.mxu1 %v2012_v20  ;;  %v776_v20 = vrot.slane %v2053_v21, 1  ;;  %v2024_v21 = vld [vmem:[%s2608_s3 + $0x1b8] ss:$12 sps:$4 sm:$0xff]  }
  0x64   : > { %1866 = vmatprep.subr.bf16.mxu1 %v2439_v24 }
  0xf9   : > { %v1788_v27 = vpop.f32.mrb[0].mxu1 }
  0xfa   : > { %v1789_v28 = vpop.f32.mrb[1].mxu1 }
  0xfb   : > { %v1790_v29 = vadd.f32 %v1789_v28, %v1788_v27  ;;  %v1791_v30 = vpop.f32.mrb[2].mxu1 }
  0xfc   : > { %v1792_v32 = vpop.f32.mrb[3].mxu1 }
  0xfd   : > { %v1793_v39 = vadd.f32 %v1792_v32, %v1791_v30  ;;  %v660_v16 = vadd.f32 %v1790_v29, %v1612_v38 }
  0xff   : > { %v663_v45 = vadd.f32 %v1793_v39, %v1612_v38 }
 0x101   : > { %v1794_v33 = vpop.f32.mrb[4].mxu1 }
 0x102   : > { %v1795_v34 = vpop.f32.mrb[5].mxu1 }
 0x103   : > { %v1796_v36 = vadd.f32 %v1795_v34, %v1794_v33  ;;  %v1797_v37 = vpop.f32.mrb[6].mxu1 }
 0x104   : > { %v1798_v35 = vpop.f32.mrb[7].mxu1 }
 0x105   : > { %v1799_v40 = vadd.f32 %v1798_v35, %v1797_v37  ;;  %v668_v55 = vadd.f32 %v1796_v36, %v1612_v38  ;;  %v2021_v37 = vld [vmem:[%s2608_s3 + $0x1b0] ss:$12 sps:$4 sm:$0xff]  }
 0x107   : > { %v671_v1 = vadd.f32 %v1799_v40, %v1612_v38  ;;  %v2027_v38 = vld [vmem:[%s2608_s3 + $0x1cc] ss:$12 sps:$4 sm:$0xff]  }
 0x119   : > { %v1816_v41 = vpop.f32.mrb[8].mxu1 }
 0x11a   : > { %v1817_v42 = vpop.f32.mrb[9].mxu1 }
 0x11b   : > { %v1818_v17 = vadd.f32 %v1817_v42, %v1816_v41  ;;  %v1819_v43 = vpop.f32.mrb[10].mxu1  ;;  %v2028_v42 = vld [vmem:[%s2608_s3 + $0x1d0] ss:$12 sps:$4 sm:$0xff]  }
 0x11c   : > { %v1820_v44 = vpop.f32.mrb[11].mxu1 }
 0x11d   : > { %v709_v46 = vadd.f32 %v1818_v17, %v660_v16  ;;  %v1821_v47 = vadd.f32 %v1820_v44, %v1819_v43  ;;  %v2025_v16 = vld [vmem:[%s2608_s3 + $0x1c8] ss:$12 sps:$4 sm:$0xff]   ;;  %v2031_v17 = vld [vmem:[%s2608_s3 + $0x1e4] ss:$12 sps:$4 sm:$0xff]   ;;  %v2054_v43 = vmov 0  }
 0x11e   : > { %v2029_v44 = vld [vmem:[%s2608_s3 + $0x1e0] ss:$12 sps:$4 sm:$0xff]  }
 0x11f   : > { %v727_v48 = vmul.f32 0.2, %v709_v46  ;;  %v712_v49 = vadd.f32 %v1821_v47, %v663_v45  ;;  %vm723_vm10 = vcmp.gt.f32.partialorder %v709_v46, 0.0  ;;  %v2035_v45 = vld [vmem:[%s2608_s3 + $0x1fc] ss:$12 sps:$4 sm:$0xff]  }
 0x120   : > { %v2033_v47 = vld [vmem:[%s2608_s3 + $0x1f8] ss:$12 sps:$4 sm:$0xff]  }
 0x121   : > { %v728_v50 = vmul.f32 0.2, %v712_v49  ;;  %v1822_v51 = vpop.f32.mrb[12].mxu1  ;;  %vm724_vm11 = vcmp.gt.f32.partialorder %v712_v49, 0.0  ;;  %v731_v52 = vsel %vm723_vm10, %v709_v46, %v727_v48  ;;  %v2036_v46 = vld [vmem:[%s2608_s3 + $0x200] ss:$12 sps:$4 sm:$0xff]  }
 0x122   : > { %v1823_v53 = vpop.f32.mrb[13].mxu1  ;;  %v740_v54 = vrot.slane %v731_v52, 7  ;;  %v769_v61 = vrot.slane %v731_v52, 1  ;;  %v2039_v48 = vld [vmem:[%s2608_s3 + $0x214] ss:$12 sps:$4 sm:$0xff]  }
 0x123   : > { %v1824_v56 = vadd.f32 %v1823_v53, %v1822_v51  ;;  %v1825_v57 = vpop.f32.mrb[14].mxu1  ;;  %v732_v58 = vsel %vm724_vm11, %v712_v49, %v728_v50  ;;  %v2040_v49 = vld [vmem:[%s2608_s3 + $0x218] ss:$12 sps:$4 sm:$0xff]   ;;  %v2037_v50 = vld [vmem:[%s2608_s3 + $0x210] ss:$12 sps:$4 sm:$0xff]  }
 0x124   : > { %v1826_v59 = vpop.f32.mrb[15].mxu1  ;;  %v742_v60 = vrot.slane %v732_v58, 7  ;;  %v770_v63 = vrot.slane %v732_v58, 1  ;;  %v787_v0 = vpack.c.bf16 %v732_v58, %v731_v52  ;;  %v741_v5 = vsel %vm321_vm2, %v2156_v22, %v740_v54  ;;  %v2043_v51 = vld [vmem:[%s2608_s3 + $0x22c] ss:$12 sps:$4 sm:$0xff]  }
 0x125   : > { %v717_v2 = vadd.f32 %v1824_v56, %v668_v55  ;;  %v1827_v3 = vadd.f32 %v1826_v59, %v1825_v57  ;;  %v2044_v52 = vld [vmem:[%s2608_s3 + $0x230] ss:$12 sps:$4 sm:$0xff]   ;;  %v2041_v53 = vld [vmem:[%s2608_s3 + $0x228] ss:$12 sps:$4 sm:$0xff]  }
 0x126   : > { %1320 = vmatprep.mubr.bf16.mxu0 %v787_v0  ;;  %1426 = vmatprep.mubr.bf16.mxu1 %v787_v0  ;;  %v743_v7 = vsel %vm321_vm2, %v740_v54, %v742_v60  ;;  %v771_v10 = vsel %vm768_vm12, %v769_v61, %v770_v63 }
 0x127   : > { %vm725_vm13 = vcmp.gt.f32.partialorder %v717_v2, 0.0  ;;  %v729_v11 = vmul.f32 0.2, %v717_v2  ;;  %v720_v14 = vadd.f32 %v1827_v3, %v671_v1  ;;  %v1730_v15 = vpack.c.bf16 %v743_v7, %v741_v5 }
 0x128   : > { %v899_v3 = vsub.s32 2, %v2110_v6  ;;  %v892_v7 = vrot.slane %v735_v25, %v891_v26 }
 0x129   : > { %vm726_vm14 = vcmp.gt.f32.partialorder %v720_v14, 0.0  ;;  %v730_v19 = vmul.f32 0.2, %v720_v14  ;;  %1731 = vmatmul.mubr.msk.bf16.vlgmr.msra.gmra.mrb[0].mxu0 %vm2173_vm3, %v1730_v15  ;;  %1743 = vmatmul.mubr.msk.bf16.vlgmr.msra.gmra.mrb[16].mxu1 %vm2173_vm3, %v1730_v15  ;;  %v733_v22 = vsel %vm725_vm13, %v717_v2, %v729_v11 }
 0x12a   : > { %1342 = vmatpush1.bf16.msra.mxu0 %v2013_v4  ;;  %1867 = vmatpush3.bf16.msra.mxu1 %v2439_v24  ;;  %v744_v27 = vrot.slane %v733_v22, 7  ;;  %v772_v28 = vrot.slane %v733_v22, 1  ;;  %v895_v4 = vsub.s32 1, %v2110_v6  ;;  %v900_v5 = vrot.slane %v735_v25, %v899_v3 }
 0x12b   : > { %1343 = vmatprep.subr.bf16.mxu0 %v2019_v8  ;;  %1868 = vmatprep.subr.bf16.mxu1 %v2020_v18  ;;  %v734_v29 = vsel %vm726_vm14, %v720_v14, %v730_v19 }
 0x12c   : > { %v746_v30 = vrot.slane %v734_v29, 7  ;;  %v774_v32 = vrot.slane %v734_v29, 1  ;;  %v790_v39 = vpack.c.bf16 %v734_v29, %v733_v22  ;;  %v745_v24 = vsel %vm321_vm2, %v742_v60, %v744_v27 }
 0x12d   : > { %v773_v36 = vsel %vm768_vm12, %v770_v63, %v772_v28  ;;  %v896_v8 = vrot.slane %v735_v25, %v895_v4 }
 0x12e   : > { %1344 = vmatpush1.bf16.msra.mxu0 %v2017_v23  ;;  %1869 = vmatpush3.bf16.msra.mxu1 %v2020_v18  ;;  %v747_v35 = vsel %vm321_vm2, %v744_v27, %v746_v30  ;;  %v775_v12 = vsel %vm768_vm12, %v772_v28, %v774_v32  ;;  %v777_v40 = vsel %vm768_vm12, %v774_v32, %v776_v20 }
 0x12f   : > { %1330 = vmatprep.mubr.bf16.mxu0 %v790_v39  ;;  %1434 = vmatprep.mubr.bf16.mxu1 %v790_v39  ;;  %v1733_v9 = vpack.c.bf16 %v747_v35, %v745_v24  ;;  %v1736_v13 = vpack.c.bf16 %v773_v36, %v771_v10  ;;  %v1739_v41 = vpack.c.bf16 %v777_v40, %v775_v12 }
 0x130   : > { %1345 = vmatprep.subr.bf16.mxu0 %v2023_v31  ;;  %1870 = vmatprep.subr.bf16.mxu1 %v2024_v21 }
 0x131   : > { %1734 = vmatmul.mubr.msk.bf16.gmra.mrb[4].mxu0 %vm2233_vm6, %v1733_v9  ;;  %1746 = vmatmul.mubr.msk.bf16.gmra.mrb[20].mxu1 %vm2233_vm6, %v1733_v9 }
 0x132   : > { %1346 = vmatpush1.bf16.msra.mxu0 %v2021_v37  ;;  %1871 = vmatpush3.bf16.msra.mxu1 %v2024_v21 }
 0x133   : > { %1882 = vmatprep.mubr.msk.bf16.mxu1 %vm1735_vm1, %v1736_v13  ;;  %1347 = vmatprep.subr.bf16.mxu0 %v2027_v38 }
 0x134   : > { %1872 = vmatprep.subr.bf16.mxu1 %v2028_v42  ;;  %1373 = vmatprep.mubr.bf16.mxu0 %v2054_v43 }
 0x136   : > { %1348 = vmatpush1.bf16.msra.mxu0 %v2025_v16  ;;  %1873 = vmatpush3.bf16.msra.mxu1 %v2028_v42 }
 0x137   : > { %1349 = vmatprep.subr.bf16.mxu0 %v2031_v17  ;;  %1874 = vmatprep.subr.bf16.mxu1 %v2032_v62 }
 0x13a   : > { %1350 = vmatpush1.bf16.msra.mxu0 %v2029_v44  ;;  %1875 = vmatpush3.bf16.msra.mxu1 %v2032_v62 }
 0x13b   : > { %1351 = vmatprep.subr.bf16.mxu0 %v2035_v45  ;;  %1876 = vmatprep.subr.bf16.mxu1 %v2036_v46 }
 0x13e   : > { %1352 = vmatpush1.bf16.msra.mxu0 %v2033_v47  ;;  %1877 = vmatpush3.bf16.msra.mxu1 %v2036_v46 }
 0x13f   : > { %1353 = vmatprep.subr.bf16.mxu0 %v2039_v48  ;;  %1878 = vmatprep.subr.bf16.mxu1 %v2040_v49 }
 0x142   : > { %1354 = vmatpush1.bf16.msra.mxu0 %v2037_v50  ;;  %1879 = vmatpush3.bf16.msra.mxu1 %v2040_v49 }
 0x143   : > { %1355 = vmatprep.subr.bf16.mxu0 %v2043_v51  ;;  %1880 = vmatprep.subr.bf16.mxu1 %v2044_v52 }
 0x146   : > { %1356 = vmatpush1.bf16.msra.mxu0 %v2041_v53  ;;  %1881 = vmatpush3.bf16.msra.mxu1 %v2044_v52 }
 0x149   : > { %1737 = vmatmul.mubr.msk.bf16.vlgmr.msra.gmra.mrb[0].mxu0 %vm1735_vm1, %v1736_v13  ;;  %1883 = vmatmul.mubr.msk.bf16.vlgmr.msra.gmra.mrb[24].mxu1 %vm1738_vm9, %v1739_v41 }
 0x14a   : > { %1383 = vmatprep.mubr.bf16.mxu0 %v2054_v43 }
 0x151   : > { %1740 = vmatmul.mubr.msk.bf16.gmra.mrb[4].mxu0 %vm1738_vm9, %v1739_v41 }
 0x1fc   : > { %v1844_v54 = vpop.f32.mrb[16].mxu1 }
 0x1fd   : > { %v1845_v55 = vpop.f32.mrb[17].mxu1 }
 0x1fe   : > { %v1846_v56 = vadd.f32 %v1845_v55, %v1844_v54  ;;  %v1847_v57 = vpop.f32.mrb[18].mxu1 }
 0x1ff   : > { %v1848_v58 = vpop.f32.mrb[19].mxu1 }
 0x200   : > { %v1849_v59 = vadd.f32 %v1848_v58, %v1847_v57  ;;  %v1429_v15 = vadd.f32 %v1846_v56, %v900_v5 }
 0x202   : > { %v1432_v30 = vadd.f32 %v1849_v59, %v900_v5 }
 0x204   : > { %v1850_v60 = vpop.f32.mrb[20].mxu1 }
 0x205   : > { %v1851_v61 = vpop.f32.mrb[21].mxu1 }
 0x206   : > { %v1852_v63 = vadd.f32 %v1851_v61, %v1850_v60  ;;  %v1853_v0 = vpop.f32.mrb[22].mxu1 }
 0x207   : > { %v1854_v1 = vpop.f32.mrb[23].mxu1 }
 0x208   : > { %v1855_v2 = vadd.f32 %v1854_v1, %v1853_v0  ;;  %v1437_v10 = vadd.f32 %v1852_v63, %v900_v5 }
 0x20a   : > { %v1440_v23 = vadd.f32 %v1855_v2, %v900_v5 }
 0x21c   : > { %v1375_v11 = vpop.f32.mrb[0].mxu0  ;;  %v1884_v14 = vpop.f32.mrb[24].mxu1 }
 0x21d   : > { %v1886_v18 = vadd.f32 %v1375_v11, %v892_v7  ;;  %v1486_v19 = vadd.f32 %v1884_v14, %v1437_v10  ;;  %v1377_v22 = vpop.f32.mrb[1].mxu0  ;;  %v1477_v20 = vpop.f32.mrb[25].mxu1 }
 0x21e   : > { %v1887_v6 = vadd.f32 %v1377_v22, %v896_v8  ;;  %v1478_v27 = vadd.f32 %v1477_v20, %v1429_v15  ;;  %v1379_v28 = vpop.f32.mrb[2].mxu0  ;;  %v1885_v29 = vpop.f32.mrb[26].mxu1 }
 0x21f   : > { %v1769_v32 = vpack.c.bf16 %v1486_v19, %v1486_v19  ;;  %v1888_v39 = vadd.f32 %v1379_v28, %v892_v7  ;;  %v1489_v31 = vadd.f32 %v1885_v29, %v1440_v23  ;;  %v1381_v21 = vpop.f32.mrb[3].mxu0  ;;  %v1480_v24 = vpop.f32.mrb[27].mxu1 }
 0x220   : > { %v1764_v33 = vpack.c.bf16 %v1887_v6, %v1886_v18  ;;  %v1765_v34 = vpack.c.bf16 %v1478_v27, %v1478_v27  ;;  %v1889_v36 = vadd.f32 %v1381_v21, %v896_v8  ;;  %v1481_v37 = vadd.f32 %v1480_v24, %v1432_v30 }
 0x221   : > { %1537 = vst [vmem:[%s2592_s8 + $0x20] sm:$0xf] %v1769_v32  ;;  %v1771_v35 = vpack.c.bf16 %v1489_v31, %v1489_v31 }
 0x222   : > { %1532 = vst [vmem:[%s2592_s8] sm:$0xff] %v1764_v33  ;;  %1533 = vst [vmem:[%s2592_s8 + $0x8] sm:$0xf] %v1765_v34  ;;  %v1766_v12 = vpack.c.bf16 %v1889_v36, %v1888_v39  ;;  %v1767_v40 = vpack.c.bf16 %v1481_v37, %v1481_v37 }
 0x223   : > { %1539 = vst [vmem:[%s2592_s8 + $0x2c] sm:$0xf] %v1771_v35 }
 0x224   : > { %1534 = vst [vmem:[%s2592_s8 + $0xc] sm:$0xff] %v1766_v12  ;;  %1535 = vst [vmem:[%s2592_s8 + $0x14] sm:$0xf] %v1767_v40  ;;  %v1385_v9 = vpop.f32.mrb[4].mxu0 }
 0x225   : > { %v1890_v13 = vadd.f32 %v1385_v9, %v892_v7  ;;  %v1387_v38 = vpop.f32.mrb[5].mxu0 }
 0x226   : > { %v1891_v41 = vadd.f32 %v1387_v38, %v896_v8  ;;  %v1389_v42 = vpop.f32.mrb[6].mxu0 }
 0x227   : > { %v1892_v16 = vadd.f32 %v1389_v42, %v892_v7  ;;  %v1391_v17 = vpop.f32.mrb[7].mxu0 }
 0x228   : > { %v1768_v62 = vpack.c.bf16 %v1891_v41, %v1890_v13  ;;  %v1893_v43 = vadd.f32 %v1391_v17, %v896_v8 }
 0x22a   : > { %1536 = vst [vmem:[%s2592_s8 + $0x18] sm:$0xff] %v1768_v62  ;;  %v1770_v44 = vpack.c.bf16 %v1893_v43, %v1892_v16 }
 0x22c   : > { %1538 = vst [vmem:[%s2592_s8 + $0x24] sm:$0xff] %v1770_v44 }
 0x22d PF: > { %s15_s18 = sadd.s32 1, %s2051_s18  }
 0x22e   : > { %p12_p4 = scmp.ge.s32.totalorder %s15_s18, 6  }
 0x230   :  { %14 = sbr.rel (!%p12_p4) target bundleno = 1 (0x1), region = 70 }

</bundles_post_ra>
